<compile_context>
chip_gen: v6e
topology: v6e:2x2x1
jax: 0.10.0
libtpu: 0.0.40
codegen_flags: <defaults>
</compile_context>

<pallas_src>
import jax
import jax.numpy as jnp
from jax import lax
from jax.experimental import pallas as pl
from jax.experimental.pallas import tpu as pltpu

# ----------------------------- config ---------------------------------------
B = 2          # batch
C = 3          # image channels
H = 16         # image height
W = 16         # image width
P = 4          # patch size
NP = (H // P) * (W // P)   # 16 patches
N = NP + 1                 # +1 cls token -> 17 tokens
N_PAD = 24                 # token rows padded to a multiple of 8 sublanes
RTOT = B * N_PAD           # 48 rows; batch folded into one grid step
D = 32                     # hidden dim (stands in for 384 of ViT-S)
HEADS = 2
HD = D // HEADS
MLP = 4 * D
DEPTH = 2
EPS = 1e-6
CPP = C * P * P            # flattened patch dim = 48
LANE = 128                 # lane-dense output width


# --------------------------- kernel helpers ----------------------------------
def _ln(x, g, b):
    mu = jnp.mean(x, axis=-1, keepdims=True)
    var = jnp.mean((x - mu) ** 2, axis=-1, keepdims=True)
    return (x - mu) * lax.rsqrt(var + EPS) * g + b


def _fused_vit_kernel(patches_ref, bias0_ref, abias_ref, pw_ref,
                      vecd_ref, wqkv_ref, wproj_ref, w1_ref, b1_ref, w2_ref,
                      ng_ref, nb_ref, o_ref):
    """Entire ViT forward_features (batch folded) in one invocation."""
    # ---- patch embed: (RTOT, CPP) @ (CPP, D) + precomputed bias -------------
    # bias0 = conv-bias + pos on patch rows, cls + pos[0] on cls rows, 0 on pad
    x = jnp.dot(patches_ref[...], pw_ref[...],
                preferred_element_type=jnp.float32) + bias0_ref[...]   # (RTOT, D)

    # head lane-masks (replace 16-lane offset slicing of q/k/v)
    lane = lax.broadcasted_iota(jnp.int32, (RTOT, D), 1)
    head_masks = [jnp.logical_and(lane >= h_ * HD, lane < (h_ + 1) * HD)
                  for h_ in range(HEADS)]

    abias = abias_ref[...]                     # (RTOT, RTOT) additive key mask
    scale = 1.0 / (HD ** 0.5)

    for l in range(DEPTH):                     # static unroll over blocks
        vb = vecd_ref[l]                       # (9, D) packed per-block vectors
        ln1g, ln1b = vb[0:1, :], vb[1:2, :]
        bq, bk, bv = vb[2:3, :], vb[3:4, :], vb[4:5, :]
        bproj = vb[5:6, :]
        ln2g, ln2b = vb[6:7, :], vb[7:8, :]
        b2 = vb[8:9, :]
        wqkv_l = wqkv_ref[l]                   # (3, D, D)
        wp = wproj_ref[l]                      # (D, D)

        # ---------------- attention ----------------
        hx = _ln(x, ln1g, ln1b)
        q = jnp.dot(hx, wqkv_l[0], preferred_element_type=jnp.float32) + bq
        k = jnp.dot(hx, wqkv_l[1], preferred_element_type=jnp.float32) + bk
        v = jnp.dot(hx, wqkv_l[2], preferred_element_type=jnp.float32) + bv

        attn = jnp.zeros((RTOT, D), jnp.float32)
        for hm in head_masks:
            # mask q to head lanes -> full-width contraction == q_h @ k_h^T
            qm = jnp.where(hm, q, 0.0)
            s = lax.dot_general(qm, k, (((1,), (1,)), ((), ())),
                                preferred_element_type=jnp.float32) * scale
            s = s + abias                      # kill pad / cross-batch keys
            s = s - jnp.max(s, axis=-1, keepdims=True)
            e = jnp.exp(s)
            a = e * pl.reciprocal(jnp.sum(e, axis=-1, keepdims=True),
                                  approx=False)
            # (v * mask_h) @ W_proj == v_h @ W_proj[h*HD:(h+1)*HD, :]
            vp = jnp.dot(jnp.where(hm, v, 0.0), wp,
                         preferred_element_type=jnp.float32)           # (RTOT, D)
            attn = attn + jnp.dot(a, vp, preferred_element_type=jnp.float32)
        x = x + attn + bproj

        # ---------------- MLP ----------------
        h2 = _ln(x, ln2g, ln2b)
        h2 = jnp.dot(h2, w1_ref[l], preferred_element_type=jnp.float32) + b1_ref[l]
        h2 = jax.nn.gelu(h2, approximate=True)
        h2 = jnp.dot(h2, w2_ref[l], preferred_element_type=jnp.float32) + b2
        x = x + h2

    # ---- final LayerNorm + lane-dense store (last dim 128 -> unmasked vst) --
    y = _ln(x, ng_ref[...], nb_ref[...])
    o_ref[...] = jnp.concatenate(
        [y, jnp.zeros((RTOT, LANE - D), jnp.float32)], axis=1)


# ----------------------------- wrapper ----------------------------------------
def _const_spec(shape):
    nd = len(shape)
    return pl.BlockSpec(shape, lambda i, _n=nd: (0,) * _n)


def patchify(image):
    # NCHW -> (B, NP, C*P*P), matching PyTorch Conv2d(patch) weight flattening.
    x = image.reshape(B, C, H // P, P, W // P, P)
    x = jnp.transpose(x, (0, 2, 4, 1, 3, 5))        # (B, gh, gw, C, P, P)
    return x.reshape(B, NP, CPP)


def forward_features(image, packed):
    patches = patchify(image)                                    # (B, NP, CPP)
    pad = jnp.zeros((B, N_PAD - NP, CPP), jnp.float32)
    patches_pad = jnp.concatenate([patches, pad], axis=1).reshape(RTOT, CPP)

    in_arrays = (patches_pad,) + packed
    raw = pl.pallas_call(
        _fused_vit_kernel,
        out_shape=jax.ShapeDtypeStruct((RTOT, LANE), jnp.float32),
        grid=(1,),
        in_specs=[_const_spec(a.shape) for a in in_arrays],
        out_specs=pl.BlockSpec((RTOT, LANE), lambda i: (0, 0)),
        compiler_params=pltpu.CompilerParams(
            dimension_semantics=("arbitrary",)),
    )(*in_arrays)

    o = raw[:, :D].reshape(B, N_PAD, D)
    # kernel token order per block = [patch0..15, cls, pad...]; restore [cls, patches]
    return jnp.concatenate([o[:, NP:NP + 1, :], o[:, :NP, :]], axis=1)  # (B, N, D)


# ------------------------ parameter initialization ---------------------------
def init_params(key):
    def nrm(k, shape, scale=0.02):
        return scale * jax.random.normal(k, shape, dtype=jnp.float32)

    keys = jax.random.split(key, 6 + DEPTH)
    params = {
        "patch_w": nrm(keys[0], (CPP, D)),          # conv weight flattened/transposed
        "patch_b": nrm(keys[1], (1, D)),
        "cls": nrm(keys[2], (1, 1, D)),
        "pos": nrm(keys[3], (1, N, D)),
        "norm_g": 1.0 + nrm(keys[4], (1, D), 0.1),
        "norm_b": nrm(keys[5], (1, D), 0.1),
        "blocks": [],
    }
    for i in range(DEPTH):
        bk = jax.random.split(keys[6 + i], 12)
        params["blocks"].append((
            1.0 + nrm(bk[0], (1, D), 0.1), nrm(bk[1], (1, D), 0.1),   # ln1 g/b
            nrm(bk[2], (D, 3 * D)),        nrm(bk[3], (1, 3 * D)),     # qkv w/b
            nrm(bk[4], (D, D)),            nrm(bk[5], (1, D)),         # proj w/b
            1.0 + nrm(bk[6], (1, D), 0.1), nrm(bk[7], (1, D), 0.1),   # ln2 g/b
            nrm(bk[8], (D, MLP)),          nrm(bk[9], (1, MLP)),       # fc1 w/b
            nrm(bk[10], (MLP, D)),         nrm(bk[11], (1, D)),        # fc2 w/b
        ))
    return params


def pack_params(params):
    """Stack per-block weights and precompute the fused-kernel constants."""
    blocks = params["blocks"]
    # per-block D-width vectors: ln1g, ln1b, bq, bk, bv, bproj, ln2g, ln2b, b2
    vecd = jnp.stack([
        jnp.concatenate([bp[0], bp[1],
                         bp[3][:, :D], bp[3][:, D:2 * D], bp[3][:, 2 * D:],
                         bp[5], bp[6], bp[7], bp[11]], axis=0)
        for bp in blocks])                                       # (DEPTH, 9, D)
    wqkv = jnp.stack([jnp.stack([bp[2][:, :D], bp[2][:, D:2 * D], bp[2][:, 2 * D:]])
                      for bp in blocks])                         # (DEPTH, 3, D, D)
    wproj = jnp.stack([bp[4] for bp in blocks])                  # (DEPTH, D, D)
    w1 = jnp.stack([bp[8] for bp in blocks])                     # (DEPTH, D, MLP)
    b1 = jnp.stack([bp[9] for bp in blocks])                     # (DEPTH, 1, MLP)
    w2 = jnp.stack([bp[10] for bp in blocks])                    # (DEPTH, MLP, D)

    # bias0: conv-bias + pos on patch rows, cls + pos[0] on cls row, 0 on pads
    pos = params["pos"].reshape(N, D)
    cls = params["cls"].reshape(1, D)
    block_bias = jnp.concatenate(
        [params["patch_b"] + pos[1:], cls + pos[0:1],
         jnp.zeros((N_PAD - N, D), jnp.float32)], axis=0)        # (N_PAD, D)
    bias0 = jnp.tile(block_bias, (B, 1))                         # (RTOT, D)

    # additive attention mask: allow same-batch, non-padded keys only
    rows = jnp.arange(RTOT)
    same_batch = (rows[:, None] // N_PAD) == (rows[None, :] // N_PAD)
    real_key = (rows[None, :] % N_PAD) < N
    attn_bias = jnp.where(same_batch & real_key, 0.0, -1e30).astype(jnp.float32)

    return (bias0, attn_bias, params["patch_w"], vecd, wqkv, wproj,
            w1, b1, w2, params["norm_g"], params["norm_b"])


# ------------------------- pure-JAX reference ---------------------------------
def forward_features_ref(image, params):
    patches = patchify(image)                                # (B, NP, CPP)
    tok = patches @ params["patch_w"] + params["patch_b"]    # (B, NP, D)
    cls = jnp.broadcast_to(params["cls"], (B, 1, D))
    x = jnp.concatenate([cls, tok], axis=1) + params["pos"]  # (B, N, D)
    for (l1g, l1b, wqkv, bqkv, wp, bp_, l2g, l2b, w1, b1, w2, b2) in params["blocks"]:
        h = _ln(x, l1g, l1b)
        qkv = h @ wqkv + bqkv
        q, k, v = qkv[..., :D], qkv[..., D:2 * D], qkv[..., 2 * D:]
        q = q.reshape(B, N, HEADS, HD).transpose(0, 2, 1, 3)
        k = k.reshape(B, N, HEADS, HD).transpose(0, 2, 1, 3)
        v = v.reshape(B, N, HEADS, HD).transpose(0, 2, 1, 3)
        s = jnp.einsum("bhqd,bhkd->bhqk", q, k) / (HD ** 0.5)
        a = jax.nn.softmax(s, axis=-1)
        o = jnp.einsum("bhqk,bhkd->bhqd", a, v).transpose(0, 2, 1, 3).reshape(B, N, D)
        x = x + (o @ wp + bp_)
        h2 = _ln(x, l2g, l2b)
        h2 = jax.nn.gelu(h2 @ w1 + b1, approximate=True) @ w2 + b2
        x = x + h2
    return _ln(x, params["norm_g"], params["norm_b"])


# -------------------------------- main ----------------------------------------
if __name__ == "__main__":
    key = jax.random.PRNGKey(0)
    k_img, k_par = jax.random.split(key)
    image = jax.random.normal(k_img, (B, C, H, W), dtype=jnp.float32)  # NCHW
    params = init_params(k_par)
    packed = pack_params(params)

    out = jax.block_until_ready(forward_features(image, packed))

    ref = forward_features_ref(image, params)
    assert out.shape == (B, N, D)
    assert jnp.allclose(out, ref, atol=2e-3, rtol=2e-3), "mismatch vs pure-JAX reference"
    print("KERNEL_OK")
</pallas_src>

<mosaic_0001>
module attributes {stable_mosaic.version = 11 : i64} {
  func.func @_fused_vit_kernel(%arg0: i32, %arg1: memref<48x48xf32, #tpu.memory_space<vmem>>, %arg2: memref<48x32xf32, #tpu.memory_space<vmem>>, %arg3: memref<48x48xf32, #tpu.memory_space<vmem>>, %arg4: memref<48x32xf32, #tpu.memory_space<vmem>>, %arg5: memref<2x9x32xf32, #tpu.memory_space<vmem>>, %arg6: memref<2x3x32x32xf32, #tpu.memory_space<vmem>>, %arg7: memref<2x32x32xf32, #tpu.memory_space<vmem>>, %arg8: memref<2x32x128xf32, #tpu.memory_space<vmem>>, %arg9: memref<2x1x128xf32, #tpu.memory_space<vmem>>, %arg10: memref<2x128x32xf32, #tpu.memory_space<vmem>>, %arg11: memref<1x32xf32, #tpu.memory_space<vmem>>, %arg12: memref<1x32xf32, #tpu.memory_space<vmem>>, %arg13: memref<48x128xf32, #tpu.memory_space<vmem>>) attributes {dimension_semantics = [#tpu.dimension_semantics<arbitrary>], iteration_bounds = array<i64: 1>, scalar_prefetch = 0 : i64, scratch_operands = 0 : i64, tpu.core_type = #tpu.core_type<tc>, window_params = [{pipeline_mode = #tpu.pipeline_mode<synchronous>, transform_indices = @transform_0, window_bounds = array<i64: 48, 48>}, {pipeline_mode = #tpu.pipeline_mode<synchronous>, transform_indices = @transform_1, window_bounds = array<i64: 48, 32>}, {pipeline_mode = #tpu.pipeline_mode<synchronous>, transform_indices = @transform_2, window_bounds = array<i64: 48, 48>}, {pipeline_mode = #tpu.pipeline_mode<synchronous>, transform_indices = @transform_3, window_bounds = array<i64: 48, 32>}, {pipeline_mode = #tpu.pipeline_mode<synchronous>, transform_indices = @transform_4, window_bounds = array<i64: 2, 9, 32>}, {pipeline_mode = #tpu.pipeline_mode<synchronous>, transform_indices = @transform_5, window_bounds = array<i64: 2, 3, 32, 32>}, {pipeline_mode = #tpu.pipeline_mode<synchronous>, transform_indices = @transform_6, window_bounds = array<i64: 2, 32, 32>}, {pipeline_mode = #tpu.pipeline_mode<synchronous>, transform_indices = @transform_7, window_bounds = array<i64: 2, 32, 128>}, {pipeline_mode = #tpu.pipeline_mode<synchronous>, transform_indices = @transform_8, window_bounds = array<i64: 2, 1, 128>}, {pipeline_mode = #tpu.pipeline_mode<synchronous>, transform_indices = @transform_9, window_bounds = array<i64: 2, 128, 32>}, {pipeline_mode = #tpu.pipeline_mode<synchronous>, transform_indices = @transform_10, window_bounds = array<i64: 1, 32>}, {pipeline_mode = #tpu.pipeline_mode<synchronous>, transform_indices = @transform_11, window_bounds = array<i64: 1, 32>}, {pipeline_mode = #tpu.pipeline_mode<synchronous>, transform_indices = @transform_12, window_bounds = array<i64: 48, 128>}]} {
    %c0 = arith.constant 0 : index
    %c0_0 = arith.constant 0 : index
    %0 = vector.load %arg1[%c0, %c0_0] : memref<48x48xf32, #tpu.memory_space<vmem>>, vector<48x48xf32>
    %c0_1 = arith.constant 0 : index
    %c0_2 = arith.constant 0 : index
    %1 = vector.load %arg4[%c0_1, %c0_2] : memref<48x32xf32, #tpu.memory_space<vmem>>, vector<48x32xf32>
    %cst = arith.constant dense<0.000000e+00> : vector<48x32xf32>
    %2 = tpu.matmul %0, %1, %cst {dimension_numbers = #tpu.dot_dimension_numbers<[1], [0], [0], [1], [0, 0, 1, 1], [], []>} : vector<48x48xf32>, vector<48x32xf32>, vector<48x32xf32> -> vector<48x32xf32>
    %c0_3 = arith.constant 0 : index
    %c0_4 = arith.constant 0 : index
    %3 = vector.load %arg2[%c0_3, %c0_4] : memref<48x32xf32, #tpu.memory_space<vmem>>, vector<48x32xf32>
    %4 = arith.addf %2, %3 : vector<48x32xf32>
    %5 = tpu.iota {dimensions = array<i32: 1>} : vector<48x32xi32>
    %c0_i32 = arith.constant 0 : i32
    %6 = vector.broadcast %c0_i32 : i32 to vector<48x32xi32>
    %7 = arith.cmpi sge, %5, %6 : vector<48x32xi32>
    %c16_i32 = arith.constant 16 : i32
    %8 = vector.broadcast %c16_i32 : i32 to vector<48x32xi32>
    %9 = arith.cmpi slt, %5, %8 : vector<48x32xi32>
    %10 = arith.andi %7, %9 : vector<48x32xi1>
    %c16_i32_5 = arith.constant 16 : i32
    %11 = vector.broadcast %c16_i32_5 : i32 to vector<48x32xi32>
    %12 = arith.cmpi sge, %5, %11 : vector<48x32xi32>
    %c32_i32 = arith.constant 32 : i32
    %13 = vector.broadcast %c32_i32 : i32 to vector<48x32xi32>
    %14 = arith.cmpi slt, %5, %13 : vector<48x32xi32>
    %15 = arith.andi %12, %14 : vector<48x32xi1>
    %c0_6 = arith.constant 0 : index
    %c0_7 = arith.constant 0 : index
    %16 = vector.load %arg3[%c0_6, %c0_7] : memref<48x48xf32, #tpu.memory_space<vmem>>, vector<48x48xf32>
    %c0_8 = arith.constant 0 : index
    %c0_9 = arith.constant 0 : index
    %c0_10 = arith.constant 0 : index
    %17 = vector.load %arg5[%c0_8, %c0_9, %c0_10] : memref<2x9x32xf32, #tpu.memory_space<vmem>>, vector<1x9x32xf32>
    %18 = vector.shape_cast %17 : vector<1x9x32xf32> to vector<9x32xf32>
    %19 = vector.extract_strided_slice %18 {offsets = [0, 0], sizes = [1, 32], strides = [1, 1]} : vector<9x32xf32> to vector<1x32xf32>
    %20 = vector.extract_strided_slice %18 {offsets = [1, 0], sizes = [1, 32], strides = [1, 1]} : vector<9x32xf32> to vector<1x32xf32>
    %21 = vector.extract_strided_slice %18 {offsets = [2, 0], sizes = [1, 32], strides = [1, 1]} : vector<9x32xf32> to vector<1x32xf32>
    %22 = vector.extract_strided_slice %18 {offsets = [3, 0], sizes = [1, 32], strides = [1, 1]} : vector<9x32xf32> to vector<1x32xf32>
    %23 = vector.extract_strided_slice %18 {offsets = [4, 0], sizes = [1, 32], strides = [1, 1]} : vector<9x32xf32> to vector<1x32xf32>
    %24 = vector.extract_strided_slice %18 {offsets = [5, 0], sizes = [1, 32], strides = [1, 1]} : vector<9x32xf32> to vector<1x32xf32>
    %25 = vector.extract_strided_slice %18 {offsets = [6, 0], sizes = [1, 32], strides = [1, 1]} : vector<9x32xf32> to vector<1x32xf32>
    %26 = vector.extract_strided_slice %18 {offsets = [7, 0], sizes = [1, 32], strides = [1, 1]} : vector<9x32xf32> to vector<1x32xf32>
    %27 = vector.extract_strided_slice %18 {offsets = [8, 0], sizes = [1, 32], strides = [1, 1]} : vector<9x32xf32> to vector<1x32xf32>
    %c0_11 = arith.constant 0 : index
    %c0_12 = arith.constant 0 : index
    %c0_13 = arith.constant 0 : index
    %c0_14 = arith.constant 0 : index
    %28 = vector.load %arg6[%c0_11, %c0_12, %c0_13, %c0_14] : memref<2x3x32x32xf32, #tpu.memory_space<vmem>>, vector<1x3x32x32xf32>
    %29 = vector.shape_cast %28 : vector<1x3x32x32xf32> to vector<3x32x32xf32>
    %c0_15 = arith.constant 0 : index
    %c0_16 = arith.constant 0 : index
    %c0_17 = arith.constant 0 : index
    %30 = vector.load %arg7[%c0_15, %c0_16, %c0_17] : memref<2x32x32xf32, #tpu.memory_space<vmem>>, vector<1x32x32xf32>
    %31 = vector.shape_cast %30 : vector<1x32x32xf32> to vector<32x32xf32>
    %cst_18 = arith.constant dense<0.000000e+00> : vector<48xf32>
    %32 = vector.multi_reduction <add>, %4, %cst_18 [1] : vector<48x32xf32> to vector<48xf32>
    %33 = vector.shape_cast %32 : vector<48xf32> to vector<48x1xf32>
    %cst_19 = arith.constant 3.200000e+01 : f32
    %34 = vector.broadcast %cst_19 : f32 to vector<48x1xf32>
    %35 = arith.divf %33, %34 : vector<48x1xf32>
    %36 = vector.broadcast %35 : vector<48x1xf32> to vector<48x32xf32>
    %37 = arith.subf %4, %36 : vector<48x32xf32>
    %38 = arith.mulf %37, %37 : vector<48x32xf32>
    %cst_20 = arith.constant dense<0.000000e+00> : vector<48xf32>
    %39 = vector.multi_reduction <add>, %38, %cst_20 [1] : vector<48x32xf32> to vector<48xf32>
    %40 = vector.shape_cast %39 : vector<48xf32> to vector<48x1xf32>
    %cst_21 = arith.constant 3.200000e+01 : f32
    %41 = vector.broadcast %cst_21 : f32 to vector<48x1xf32>
    %42 = arith.divf %40, %41 : vector<48x1xf32>
    %43 = vector.broadcast %35 : vector<48x1xf32> to vector<48x32xf32>
    %44 = arith.subf %4, %43 : vector<48x32xf32>
    %cst_22 = arith.constant 9.99999997E-7 : f32
    %45 = vector.broadcast %cst_22 : f32 to vector<48x1xf32>
    %46 = arith.addf %42, %45 : vector<48x1xf32>
    %47 = math.rsqrt %46 : vector<48x1xf32>
    %48 = vector.broadcast %47 : vector<48x1xf32> to vector<48x32xf32>
    %49 = arith.mulf %44, %48 : vector<48x32xf32>
    %50 = vector.broadcast %19 : vector<1x32xf32> to vector<48x32xf32>
    %51 = arith.mulf %49, %50 : vector<48x32xf32>
    %52 = vector.broadcast %20 : vector<1x32xf32> to vector<48x32xf32>
    %53 = arith.addf %51, %52 : vector<48x32xf32>
    %54 = vector.extract_strided_slice %29 {offsets = [0, 0, 0], sizes = [1, 32, 32], strides = [1, 1, 1]} : vector<3x32x32xf32> to vector<1x32x32xf32>
    %55 = vector.shape_cast %54 : vector<1x32x32xf32> to vector<32x32xf32>
    %cst_23 = arith.constant dense<0.000000e+00> : vector<48x32xf32>
    %56 = tpu.matmul %53, %55, %cst_23 {dimension_numbers = #tpu.dot_dimension_numbers<[1], [0], [0], [1], [0, 0, 1, 1], [], []>} : vector<48x32xf32>, vector<32x32xf32>, vector<48x32xf32> -> vector<48x32xf32>
    %57 = vector.broadcast %21 : vector<1x32xf32> to vector<48x32xf32>
    %58 = arith.addf %56, %57 : vector<48x32xf32>
    %59 = vector.extract_strided_slice %29 {offsets = [1, 0, 0], sizes = [1, 32, 32], strides = [1, 1, 1]} : vector<3x32x32xf32> to vector<1x32x32xf32>
    %60 = vector.shape_cast %59 : vector<1x32x32xf32> to vector<32x32xf32>
    %cst_24 = arith.constant dense<0.000000e+00> : vector<48x32xf32>
    %61 = tpu.matmul %53, %60, %cst_24 {dimension_numbers = #tpu.dot_dimension_numbers<[1], [0], [0], [1], [0, 0, 1, 1], [], []>} : vector<48x32xf32>, vector<32x32xf32>, vector<48x32xf32> -> vector<48x32xf32>
    %62 = vector.broadcast %22 : vector<1x32xf32> to vector<48x32xf32>
    %63 = arith.addf %61, %62 : vector<48x32xf32>
    %64 = vector.extract_strided_slice %29 {offsets = [2, 0, 0], sizes = [1, 32, 32], strides = [1, 1, 1]} : vector<3x32x32xf32> to vector<1x32x32xf32>
    %65 = vector.shape_cast %64 : vector<1x32x32xf32> to vector<32x32xf32>
    %cst_25 = arith.constant dense<0.000000e+00> : vector<48x32xf32>
    %66 = tpu.matmul %53, %65, %cst_25 {dimension_numbers = #tpu.dot_dimension_numbers<[1], [0], [0], [1], [0, 0, 1, 1], [], []>} : vector<48x32xf32>, vector<32x32xf32>, vector<48x32xf32> -> vector<48x32xf32>
    %67 = vector.broadcast %23 : vector<1x32xf32> to vector<48x32xf32>
    %68 = arith.addf %66, %67 : vector<48x32xf32>
    %cst_26 = arith.constant 0.000000e+00 : f32
    %69 = vector.broadcast %cst_26 : f32 to vector<48x32xf32>
    %cst_27 = arith.constant 0.000000e+00 : f32
    %70 = vector.broadcast %cst_27 : f32 to vector<48x32xf32>
    %71 = arith.select %10, %58, %70 : vector<48x32xi1>, vector<48x32xf32>
    %cst_28 = arith.constant dense<0.000000e+00> : vector<48x48xf32>
    %72 = tpu.matmul %71, %63, %cst_28 {dimension_numbers = #tpu.dot_dimension_numbers<[1], [1], [0], [0], [0, 0, 1, 0], [], []>} : vector<48x32xf32>, vector<48x32xf32>, vector<48x48xf32> -> vector<48x48xf32>
    %cst_29 = arith.constant 2.500000e-01 : f32
    %73 = vector.broadcast %cst_29 : f32 to vector<48x48xf32>
    %74 = arith.mulf %72, %73 : vector<48x48xf32>
    %75 = arith.addf %74, %16 : vector<48x48xf32>
    %cst_30 = arith.constant dense<0xFF800000> : vector<48xf32>
    %76 = vector.multi_reduction <maximumf>, %75, %cst_30 [1] : vector<48x48xf32> to vector<48xf32>
    %77 = vector.shape_cast %76 : vector<48xf32> to vector<48x1xf32>
    %78 = vector.broadcast %77 : vector<48x1xf32> to vector<48x48xf32>
    %79 = arith.subf %75, %78 : vector<48x48xf32>
    %80 = math.exp %79 : vector<48x48xf32>
    %cst_31 = arith.constant dense<0.000000e+00> : vector<48xf32>
    %81 = vector.multi_reduction <add>, %80, %cst_31 [1] : vector<48x48xf32> to vector<48xf32>
    %82 = vector.shape_cast %81 : vector<48xf32> to vector<48x1xf32>
    %83 = tpu.reciprocal %82 : vector<48x1xf32> -> vector<48x1xf32>
    %84 = vector.broadcast %83 : vector<48x1xf32> to vector<48x48xf32>
    %85 = arith.mulf %80, %84 : vector<48x48xf32>
    %cst_32 = arith.constant 0.000000e+00 : f32
    %86 = vector.broadcast %cst_32 : f32 to vector<48x32xf32>
    %87 = arith.select %10, %68, %86 : vector<48x32xi1>, vector<48x32xf32>
    %cst_33 = arith.constant dense<0.000000e+00> : vector<48x32xf32>
    %88 = tpu.matmul %87, %31, %cst_33 {dimension_numbers = #tpu.dot_dimension_numbers<[1], [0], [0], [1], [0, 0, 1, 1], [], []>} : vector<48x32xf32>, vector<32x32xf32>, vector<48x32xf32> -> vector<48x32xf32>
    %cst_34 = arith.constant dense<0.000000e+00> : vector<48x32xf32>
    %89 = tpu.matmul %85, %88, %cst_34 {dimension_numbers = #tpu.dot_dimension_numbers<[1], [0], [0], [1], [0, 0, 1, 1], [], []>} : vector<48x48xf32>, vector<48x32xf32>, vector<48x32xf32> -> vector<48x32xf32>
    %90 = arith.addf %69, %89 : vector<48x32xf32>
    %cst_35 = arith.constant 0.000000e+00 : f32
    %91 = vector.broadcast %cst_35 : f32 to vector<48x32xf32>
    %92 = arith.select %15, %58, %91 : vector<48x32xi1>, vector<48x32xf32>
    %cst_36 = arith.constant dense<0.000000e+00> : vector<48x48xf32>
    %93 = tpu.matmul %92, %63, %cst_36 {dimension_numbers = #tpu.dot_dimension_numbers<[1], [1], [0], [0], [0, 0, 1, 0], [], []>} : vector<48x32xf32>, vector<48x32xf32>, vector<48x48xf32> -> vector<48x48xf32>
    %cst_37 = arith.constant 2.500000e-01 : f32
    %94 = vector.broadcast %cst_37 : f32 to vector<48x48xf32>
    %95 = arith.mulf %93, %94 : vector<48x48xf32>
    %96 = arith.addf %95, %16 : vector<48x48xf32>
    %cst_38 = arith.constant dense<0xFF800000> : vector<48xf32>
    %97 = vector.multi_reduction <maximumf>, %96, %cst_38 [1] : vector<48x48xf32> to vector<48xf32>
    %98 = vector.shape_cast %97 : vector<48xf32> to vector<48x1xf32>
    %99 = vector.broadcast %98 : vector<48x1xf32> to vector<48x48xf32>
    %100 = arith.subf %96, %99 : vector<48x48xf32>
    %101 = math.exp %100 : vector<48x48xf32>
    %cst_39 = arith.constant dense<0.000000e+00> : vector<48xf32>
    %102 = vector.multi_reduction <add>, %101, %cst_39 [1] : vector<48x48xf32> to vector<48xf32>
    %103 = vector.shape_cast %102 : vector<48xf32> to vector<48x1xf32>
    %104 = tpu.reciprocal %103 : vector<48x1xf32> -> vector<48x1xf32>
    %105 = vector.broadcast %104 : vector<48x1xf32> to vector<48x48xf32>
    %106 = arith.mulf %101, %105 : vector<48x48xf32>
    %cst_40 = arith.constant 0.000000e+00 : f32
    %107 = vector.broadcast %cst_40 : f32 to vector<48x32xf32>
    %108 = arith.select %15, %68, %107 : vector<48x32xi1>, vector<48x32xf32>
    %cst_41 = arith.constant dense<0.000000e+00> : vector<48x32xf32>
    %109 = tpu.matmul %108, %31, %cst_41 {dimension_numbers = #tpu.dot_dimension_numbers<[1], [0], [0], [1], [0, 0, 1, 1], [], []>} : vector<48x32xf32>, vector<32x32xf32>, vector<48x32xf32> -> vector<48x32xf32>
    %cst_42 = arith.constant dense<0.000000e+00> : vector<48x32xf32>
    %110 = tpu.matmul %106, %109, %cst_42 {dimension_numbers = #tpu.dot_dimension_numbers<[1], [0], [0], [1], [0, 0, 1, 1], [], []>} : vector<48x48xf32>, vector<48x32xf32>, vector<48x32xf32> -> vector<48x32xf32>
    %111 = arith.addf %90, %110 : vector<48x32xf32>
    %112 = arith.addf %4, %111 : vector<48x32xf32>
    %113 = vector.broadcast %24 : vector<1x32xf32> to vector<48x32xf32>
    %114 = arith.addf %112, %113 : vector<48x32xf32>
    %cst_43 = arith.constant dense<0.000000e+00> : vector<48xf32>
    %115 = vector.multi_reduction <add>, %114, %cst_43 [1] : vector<48x32xf32> to vector<48xf32>
    %116 = vector.shape_cast %115 : vector<48xf32> to vector<48x1xf32>
    %cst_44 = arith.constant 3.200000e+01 : f32
    %117 = vector.broadcast %cst_44 : f32 to vector<48x1xf32>
    %118 = arith.divf %116, %117 : vector<48x1xf32>
    %119 = vector.broadcast %118 : vector<48x1xf32> to vector<48x32xf32>
    %120 = arith.subf %114, %119 : vector<48x32xf32>
    %121 = arith.mulf %120, %120 : vector<48x32xf32>
    %cst_45 = arith.constant dense<0.000000e+00> : vector<48xf32>
    %122 = vector.multi_reduction <add>, %121, %cst_45 [1] : vector<48x32xf32> to vector<48xf32>
    %123 = vector.shape_cast %122 : vector<48xf32> to vector<48x1xf32>
    %cst_46 = arith.constant 3.200000e+01 : f32
    %124 = vector.broadcast %cst_46 : f32 to vector<48x1xf32>
    %125 = arith.divf %123, %124 : vector<48x1xf32>
    %126 = vector.broadcast %118 : vector<48x1xf32> to vector<48x32xf32>
    %127 = arith.subf %114, %126 : vector<48x32xf32>
    %cst_47 = arith.constant 9.99999997E-7 : f32
    %128 = vector.broadcast %cst_47 : f32 to vector<48x1xf32>
    %129 = arith.addf %125, %128 : vector<48x1xf32>
    %130 = math.rsqrt %129 : vector<48x1xf32>
    %131 = vector.broadcast %130 : vector<48x1xf32> to vector<48x32xf32>
    %132 = arith.mulf %127, %131 : vector<48x32xf32>
    %133 = vector.broadcast %25 : vector<1x32xf32> to vector<48x32xf32>
    %134 = arith.mulf %132, %133 : vector<48x32xf32>
    %135 = vector.broadcast %26 : vector<1x32xf32> to vector<48x32xf32>
    %136 = arith.addf %134, %135 : vector<48x32xf32>
    %c0_48 = arith.constant 0 : index
    %c0_49 = arith.constant 0 : index
    %c0_50 = arith.constant 0 : index
    %137 = vector.load %arg8[%c0_48, %c0_49, %c0_50] : memref<2x32x128xf32, #tpu.memory_space<vmem>>, vector<1x32x128xf32>
    %138 = vector.shape_cast %137 : vector<1x32x128xf32> to vector<32x128xf32>
    %cst_51 = arith.constant dense<0.000000e+00> : vector<48x128xf32>
    %139 = tpu.matmul %136, %138, %cst_51 {dimension_numbers = #tpu.dot_dimension_numbers<[1], [0], [0], [1], [0, 0, 1, 1], [], []>} : vector<48x32xf32>, vector<32x128xf32>, vector<48x128xf32> -> vector<48x128xf32>
    %c0_52 = arith.constant 0 : index
    %c0_53 = arith.constant 0 : index
    %c0_54 = arith.constant 0 : index
    %140 = vector.load %arg9[%c0_52, %c0_53, %c0_54] : memref<2x1x128xf32, #tpu.memory_space<vmem>>, vector<1x1x128xf32>
    %141 = vector.shape_cast %140 : vector<1x1x128xf32> to vector<1x128xf32>
    %142 = vector.broadcast %141 : vector<1x128xf32> to vector<48x128xf32>
    %143 = arith.addf %139, %142 : vector<48x128xf32>
    %144 = arith.mulf %143, %143 : vector<48x128xf32>
    %145 = arith.mulf %143, %144 : vector<48x128xf32>
    %cst_55 = arith.constant 4.471500e-02 : f32
    %146 = vector.broadcast %cst_55 : f32 to vector<48x128xf32>
    %147 = arith.mulf %146, %145 : vector<48x128xf32>
    %148 = arith.addf %143, %147 : vector<48x128xf32>
    %cst_56 = arith.constant 0.797884583 : f32
    %149 = vector.broadcast %cst_56 : f32 to vector<48x128xf32>
    %150 = arith.mulf %149, %148 : vector<48x128xf32>
    %151 = math.tanh %150 : vector<48x128xf32>
    %cst_57 = arith.constant 1.000000e+00 : f32
    %152 = vector.broadcast %cst_57 : f32 to vector<48x128xf32>
    %153 = arith.addf %152, %151 : vector<48x128xf32>
    %cst_58 = arith.constant 5.000000e-01 : f32
    %154 = vector.broadcast %cst_58 : f32 to vector<48x128xf32>
    %155 = arith.mulf %154, %153 : vector<48x128xf32>
    %156 = arith.mulf %143, %155 : vector<48x128xf32>
    %c0_59 = arith.constant 0 : index
    %c0_60 = arith.constant 0 : index
    %c0_61 = arith.constant 0 : index
    %157 = vector.load %arg10[%c0_59, %c0_60, %c0_61] : memref<2x128x32xf32, #tpu.memory_space<vmem>>, vector<1x128x32xf32>
    %158 = vector.shape_cast %157 : vector<1x128x32xf32> to vector<128x32xf32>
    %cst_62 = arith.constant dense<0.000000e+00> : vector<48x32xf32>
    %159 = tpu.matmul %156, %158, %cst_62 {dimension_numbers = #tpu.dot_dimension_numbers<[1], [0], [0], [1], [0, 0, 1, 1], [], []>} : vector<48x128xf32>, vector<128x32xf32>, vector<48x32xf32> -> vector<48x32xf32>
    %160 = vector.broadcast %27 : vector<1x32xf32> to vector<48x32xf32>
    %161 = arith.addf %159, %160 : vector<48x32xf32>
    %162 = arith.addf %114, %161 : vector<48x32xf32>
    %c1 = arith.constant 1 : index
    %c0_63 = arith.constant 0 : index
    %c0_64 = arith.constant 0 : index
    %163 = vector.load %arg5[%c1, %c0_63, %c0_64] : memref<2x9x32xf32, #tpu.memory_space<vmem>>, vector<1x9x32xf32>
    %164 = vector.shape_cast %163 : vector<1x9x32xf32> to vector<9x32xf32>
    %165 = vector.extract_strided_slice %164 {offsets = [0, 0], sizes = [1, 32], strides = [1, 1]} : vector<9x32xf32> to vector<1x32xf32>
    %166 = vector.extract_strided_slice %164 {offsets = [1, 0], sizes = [1, 32], strides = [1, 1]} : vector<9x32xf32> to vector<1x32xf32>
    %167 = vector.extract_strided_slice %164 {offsets = [2, 0], sizes = [1, 32], strides = [1, 1]} : vector<9x32xf32> to vector<1x32xf32>
    %168 = vector.extract_strided_slice %164 {offsets = [3, 0], sizes = [1, 32], strides = [1, 1]} : vector<9x32xf32> to vector<1x32xf32>
    %169 = vector.extract_strided_slice %164 {offsets = [4, 0], sizes = [1, 32], strides = [1, 1]} : vector<9x32xf32> to vector<1x32xf32>
    %170 = vector.extract_strided_slice %164 {offsets = [5, 0], sizes = [1, 32], strides = [1, 1]} : vector<9x32xf32> to vector<1x32xf32>
    %171 = vector.extract_strided_slice %164 {offsets = [6, 0], sizes = [1, 32], strides = [1, 1]} : vector<9x32xf32> to vector<1x32xf32>
    %172 = vector.extract_strided_slice %164 {offsets = [7, 0], sizes = [1, 32], strides = [1, 1]} : vector<9x32xf32> to vector<1x32xf32>
    %173 = vector.extract_strided_slice %164 {offsets = [8, 0], sizes = [1, 32], strides = [1, 1]} : vector<9x32xf32> to vector<1x32xf32>
    %c1_65 = arith.constant 1 : index
    %c0_66 = arith.constant 0 : index
    %c0_67 = arith.constant 0 : index
    %c0_68 = arith.constant 0 : index
    %174 = vector.load %arg6[%c1_65, %c0_66, %c0_67, %c0_68] : memref<2x3x32x32xf32, #tpu.memory_space<vmem>>, vector<1x3x32x32xf32>
    %175 = vector.shape_cast %174 : vector<1x3x32x32xf32> to vector<3x32x32xf32>
    %c1_69 = arith.constant 1 : index
    %c0_70 = arith.constant 0 : index
    %c0_71 = arith.constant 0 : index
    %176 = vector.load %arg7[%c1_69, %c0_70, %c0_71] : memref<2x32x32xf32, #tpu.memory_space<vmem>>, vector<1x32x32xf32>
    %177 = vector.shape_cast %176 : vector<1x32x32xf32> to vector<32x32xf32>
    %cst_72 = arith.constant dense<0.000000e+00> : vector<48xf32>
    %178 = vector.multi_reduction <add>, %162, %cst_72 [1] : vector<48x32xf32> to vector<48xf32>
    %179 = vector.shape_cast %178 : vector<48xf32> to vector<48x1xf32>
    %cst_73 = arith.constant 3.200000e+01 : f32
    %180 = vector.broadcast %cst_73 : f32 to vector<48x1xf32>
    %181 = arith.divf %179, %180 : vector<48x1xf32>
    %182 = vector.broadcast %181 : vector<48x1xf32> to vector<48x32xf32>
    %183 = arith.subf %162, %182 : vector<48x32xf32>
    %184 = arith.mulf %183, %183 : vector<48x32xf32>
    %cst_74 = arith.constant dense<0.000000e+00> : vector<48xf32>
    %185 = vector.multi_reduction <add>, %184, %cst_74 [1] : vector<48x32xf32> to vector<48xf32>
    %186 = vector.shape_cast %185 : vector<48xf32> to vector<48x1xf32>
    %cst_75 = arith.constant 3.200000e+01 : f32
    %187 = vector.broadcast %cst_75 : f32 to vector<48x1xf32>
    %188 = arith.divf %186, %187 : vector<48x1xf32>
    %189 = vector.broadcast %181 : vector<48x1xf32> to vector<48x32xf32>
    %190 = arith.subf %162, %189 : vector<48x32xf32>
    %cst_76 = arith.constant 9.99999997E-7 : f32
    %191 = vector.broadcast %cst_76 : f32 to vector<48x1xf32>
    %192 = arith.addf %188, %191 : vector<48x1xf32>
    %193 = math.rsqrt %192 : vector<48x1xf32>
    %194 = vector.broadcast %193 : vector<48x1xf32> to vector<48x32xf32>
    %195 = arith.mulf %190, %194 : vector<48x32xf32>
    %196 = vector.broadcast %165 : vector<1x32xf32> to vector<48x32xf32>
    %197 = arith.mulf %195, %196 : vector<48x32xf32>
    %198 = vector.broadcast %166 : vector<1x32xf32> to vector<48x32xf32>
    %199 = arith.addf %197, %198 : vector<48x32xf32>
    %200 = vector.extract_strided_slice %175 {offsets = [0, 0, 0], sizes = [1, 32, 32], strides = [1, 1, 1]} : vector<3x32x32xf32> to vector<1x32x32xf32>
    %201 = vector.shape_cast %200 : vector<1x32x32xf32> to vector<32x32xf32>
    %cst_77 = arith.constant dense<0.000000e+00> : vector<48x32xf32>
    %202 = tpu.matmul %199, %201, %cst_77 {dimension_numbers = #tpu.dot_dimension_numbers<[1], [0], [0], [1], [0, 0, 1, 1], [], []>} : vector<48x32xf32>, vector<32x32xf32>, vector<48x32xf32> -> vector<48x32xf32>
    %203 = vector.broadcast %167 : vector<1x32xf32> to vector<48x32xf32>
    %204 = arith.addf %202, %203 : vector<48x32xf32>
    %205 = vector.extract_strided_slice %175 {offsets = [1, 0, 0], sizes = [1, 32, 32], strides = [1, 1, 1]} : vector<3x32x32xf32> to vector<1x32x32xf32>
    %206 = vector.shape_cast %205 : vector<1x32x32xf32> to vector<32x32xf32>
    %cst_78 = arith.constant dense<0.000000e+00> : vector<48x32xf32>
    %207 = tpu.matmul %199, %206, %cst_78 {dimension_numbers = #tpu.dot_dimension_numbers<[1], [0], [0], [1], [0, 0, 1, 1], [], []>} : vector<48x32xf32>, vector<32x32xf32>, vector<48x32xf32> -> vector<48x32xf32>
    %208 = vector.broadcast %168 : vector<1x32xf32> to vector<48x32xf32>
    %209 = arith.addf %207, %208 : vector<48x32xf32>
    %210 = vector.extract_strided_slice %175 {offsets = [2, 0, 0], sizes = [1, 32, 32], strides = [1, 1, 1]} : vector<3x32x32xf32> to vector<1x32x32xf32>
    %211 = vector.shape_cast %210 : vector<1x32x32xf32> to vector<32x32xf32>
    %cst_79 = arith.constant dense<0.000000e+00> : vector<48x32xf32>
    %212 = tpu.matmul %199, %211, %cst_79 {dimension_numbers = #tpu.dot_dimension_numbers<[1], [0], [0], [1], [0, 0, 1, 1], [], []>} : vector<48x32xf32>, vector<32x32xf32>, vector<48x32xf32> -> vector<48x32xf32>
    %213 = vector.broadcast %169 : vector<1x32xf32> to vector<48x32xf32>
    %214 = arith.addf %212, %213 : vector<48x32xf32>
    %cst_80 = arith.constant 0.000000e+00 : f32
    %215 = vector.broadcast %cst_80 : f32 to vector<48x32xf32>
    %cst_81 = arith.constant 0.000000e+00 : f32
    %216 = vector.broadcast %cst_81 : f32 to vector<48x32xf32>
    %217 = arith.select %10, %204, %216 : vector<48x32xi1>, vector<48x32xf32>
    %cst_82 = arith.constant dense<0.000000e+00> : vector<48x48xf32>
    %218 = tpu.matmul %217, %209, %cst_82 {dimension_numbers = #tpu.dot_dimension_numbers<[1], [1], [0], [0], [0, 0, 1, 0], [], []>} : vector<48x32xf32>, vector<48x32xf32>, vector<48x48xf32> -> vector<48x48xf32>
    %cst_83 = arith.constant 2.500000e-01 : f32
    %219 = vector.broadcast %cst_83 : f32 to vector<48x48xf32>
    %220 = arith.mulf %218, %219 : vector<48x48xf32>
    %221 = arith.addf %220, %16 : vector<48x48xf32>
    %cst_84 = arith.constant dense<0xFF800000> : vector<48xf32>
    %222 = vector.multi_reduction <maximumf>, %221, %cst_84 [1] : vector<48x48xf32> to vector<48xf32>
    %223 = vector.shape_cast %222 : vector<48xf32> to vector<48x1xf32>
    %224 = vector.broadcast %223 : vector<48x1xf32> to vector<48x48xf32>
    %225 = arith.subf %221, %224 : vector<48x48xf32>
    %226 = math.exp %225 : vector<48x48xf32>
    %cst_85 = arith.constant dense<0.000000e+00> : vector<48xf32>
    %227 = vector.multi_reduction <add>, %226, %cst_85 [1] : vector<48x48xf32> to vector<48xf32>
    %228 = vector.shape_cast %227 : vector<48xf32> to vector<48x1xf32>
    %229 = tpu.reciprocal %228 : vector<48x1xf32> -> vector<48x1xf32>
    %230 = vector.broadcast %229 : vector<48x1xf32> to vector<48x48xf32>
    %231 = arith.mulf %226, %230 : vector<48x48xf32>
    %cst_86 = arith.constant 0.000000e+00 : f32
    %232 = vector.broadcast %cst_86 : f32 to vector<48x32xf32>
    %233 = arith.select %10, %214, %232 : vector<48x32xi1>, vector<48x32xf32>
    %cst_87 = arith.constant dense<0.000000e+00> : vector<48x32xf32>
    %234 = tpu.matmul %233, %177, %cst_87 {dimension_numbers = #tpu.dot_dimension_numbers<[1], [0], [0], [1], [0, 0, 1, 1], [], []>} : vector<48x32xf32>, vector<32x32xf32>, vector<48x32xf32> -> vector<48x32xf32>
    %cst_88 = arith.constant dense<0.000000e+00> : vector<48x32xf32>
    %235 = tpu.matmul %231, %234, %cst_88 {dimension_numbers = #tpu.dot_dimension_numbers<[1], [0], [0], [1], [0, 0, 1, 1], [], []>} : vector<48x48xf32>, vector<48x32xf32>, vector<48x32xf32> -> vector<48x32xf32>
    %236 = arith.addf %215, %235 : vector<48x32xf32>
    %cst_89 = arith.constant 0.000000e+00 : f32
    %237 = vector.broadcast %cst_89 : f32 to vector<48x32xf32>
    %238 = arith.select %15, %204, %237 : vector<48x32xi1>, vector<48x32xf32>
    %cst_90 = arith.constant dense<0.000000e+00> : vector<48x48xf32>
    %239 = tpu.matmul %238, %209, %cst_90 {dimension_numbers = #tpu.dot_dimension_numbers<[1], [1], [0], [0], [0, 0, 1, 0], [], []>} : vector<48x32xf32>, vector<48x32xf32>, vector<48x48xf32> -> vector<48x48xf32>
    %cst_91 = arith.constant 2.500000e-01 : f32
    %240 = vector.broadcast %cst_91 : f32 to vector<48x48xf32>
    %241 = arith.mulf %239, %240 : vector<48x48xf32>
    %242 = arith.addf %241, %16 : vector<48x48xf32>
    %cst_92 = arith.constant dense<0xFF800000> : vector<48xf32>
    %243 = vector.multi_reduction <maximumf>, %242, %cst_92 [1] : vector<48x48xf32> to vector<48xf32>
    %244 = vector.shape_cast %243 : vector<48xf32> to vector<48x1xf32>
    %245 = vector.broadcast %244 : vector<48x1xf32> to vector<48x48xf32>
    %246 = arith.subf %242, %245 : vector<48x48xf32>
    %247 = math.exp %246 : vector<48x48xf32>
    %cst_93 = arith.constant dense<0.000000e+00> : vector<48xf32>
    %248 = vector.multi_reduction <add>, %247, %cst_93 [1] : vector<48x48xf32> to vector<48xf32>
    %249 = vector.shape_cast %248 : vector<48xf32> to vector<48x1xf32>
    %250 = tpu.reciprocal %249 : vector<48x1xf32> -> vector<48x1xf32>
    %251 = vector.broadcast %250 : vector<48x1xf32> to vector<48x48xf32>
    %252 = arith.mulf %247, %251 : vector<48x48xf32>
    %cst_94 = arith.constant 0.000000e+00 : f32
    %253 = vector.broadcast %cst_94 : f32 to vector<48x32xf32>
    %254 = arith.select %15, %214, %253 : vector<48x32xi1>, vector<48x32xf32>
    %cst_95 = arith.constant dense<0.000000e+00> : vector<48x32xf32>
    %255 = tpu.matmul %254, %177, %cst_95 {dimension_numbers = #tpu.dot_dimension_numbers<[1], [0], [0], [1], [0, 0, 1, 1], [], []>} : vector<48x32xf32>, vector<32x32xf32>, vector<48x32xf32> -> vector<48x32xf32>
    %cst_96 = arith.constant dense<0.000000e+00> : vector<48x32xf32>
    %256 = tpu.matmul %252, %255, %cst_96 {dimension_numbers = #tpu.dot_dimension_numbers<[1], [0], [0], [1], [0, 0, 1, 1], [], []>} : vector<48x48xf32>, vector<48x32xf32>, vector<48x32xf32> -> vector<48x32xf32>
    %257 = arith.addf %236, %256 : vector<48x32xf32>
    %258 = arith.addf %162, %257 : vector<48x32xf32>
    %259 = vector.broadcast %170 : vector<1x32xf32> to vector<48x32xf32>
    %260 = arith.addf %258, %259 : vector<48x32xf32>
    %cst_97 = arith.constant dense<0.000000e+00> : vector<48xf32>
    %261 = vector.multi_reduction <add>, %260, %cst_97 [1] : vector<48x32xf32> to vector<48xf32>
    %262 = vector.shape_cast %261 : vector<48xf32> to vector<48x1xf32>
    %cst_98 = arith.constant 3.200000e+01 : f32
    %263 = vector.broadcast %cst_98 : f32 to vector<48x1xf32>
    %264 = arith.divf %262, %263 : vector<48x1xf32>
    %265 = vector.broadcast %264 : vector<48x1xf32> to vector<48x32xf32>
    %266 = arith.subf %260, %265 : vector<48x32xf32>
    %267 = arith.mulf %266, %266 : vector<48x32xf32>
    %cst_99 = arith.constant dense<0.000000e+00> : vector<48xf32>
    %268 = vector.multi_reduction <add>, %267, %cst_99 [1] : vector<48x32xf32> to vector<48xf32>
    %269 = vector.shape_cast %268 : vector<48xf32> to vector<48x1xf32>
    %cst_100 = arith.constant 3.200000e+01 : f32
    %270 = vector.broadcast %cst_100 : f32 to vector<48x1xf32>
    %271 = arith.divf %269, %270 : vector<48x1xf32>
    %272 = vector.broadcast %264 : vector<48x1xf32> to vector<48x32xf32>
    %273 = arith.subf %260, %272 : vector<48x32xf32>
    %cst_101 = arith.constant 9.99999997E-7 : f32
    %274 = vector.broadcast %cst_101 : f32 to vector<48x1xf32>
    %275 = arith.addf %271, %274 : vector<48x1xf32>
    %276 = math.rsqrt %275 : vector<48x1xf32>
    %277 = vector.broadcast %276 : vector<48x1xf32> to vector<48x32xf32>
    %278 = arith.mulf %273, %277 : vector<48x32xf32>
    %279 = vector.broadcast %171 : vector<1x32xf32> to vector<48x32xf32>
    %280 = arith.mulf %278, %279 : vector<48x32xf32>
    %281 = vector.broadcast %172 : vector<1x32xf32> to vector<48x32xf32>
    %282 = arith.addf %280, %281 : vector<48x32xf32>
    %c1_102 = arith.constant 1 : index
    %c0_103 = arith.constant 0 : index
    %c0_104 = arith.constant 0 : index
    %283 = vector.load %arg8[%c1_102, %c0_103, %c0_104] : memref<2x32x128xf32, #tpu.memory_space<vmem>>, vector<1x32x128xf32>
    %284 = vector.shape_cast %283 : vector<1x32x128xf32> to vector<32x128xf32>
    %cst_105 = arith.constant dense<0.000000e+00> : vector<48x128xf32>
    %285 = tpu.matmul %282, %284, %cst_105 {dimension_numbers = #tpu.dot_dimension_numbers<[1], [0], [0], [1], [0, 0, 1, 1], [], []>} : vector<48x32xf32>, vector<32x128xf32>, vector<48x128xf32> -> vector<48x128xf32>
    %c1_106 = arith.constant 1 : index
    %c0_107 = arith.constant 0 : index
    %c0_108 = arith.constant 0 : index
    %286 = vector.load %arg9[%c1_106, %c0_107, %c0_108] : memref<2x1x128xf32, #tpu.memory_space<vmem>>, vector<1x1x128xf32>
    %287 = vector.shape_cast %286 : vector<1x1x128xf32> to vector<1x128xf32>
    %288 = vector.broadcast %287 : vector<1x128xf32> to vector<48x128xf32>
    %289 = arith.addf %285, %288 : vector<48x128xf32>
    %290 = arith.mulf %289, %289 : vector<48x128xf32>
    %291 = arith.mulf %289, %290 : vector<48x128xf32>
    %cst_109 = arith.constant 4.471500e-02 : f32
    %292 = vector.broadcast %cst_109 : f32 to vector<48x128xf32>
    %293 = arith.mulf %292, %291 : vector<48x128xf32>
    %294 = arith.addf %289, %293 : vector<48x128xf32>
    %cst_110 = arith.constant 0.797884583 : f32
    %295 = vector.broadcast %cst_110 : f32 to vector<48x128xf32>
    %296 = arith.mulf %295, %294 : vector<48x128xf32>
    %297 = math.tanh %296 : vector<48x128xf32>
    %cst_111 = arith.constant 1.000000e+00 : f32
    %298 = vector.broadcast %cst_111 : f32 to vector<48x128xf32>
    %299 = arith.addf %298, %297 : vector<48x128xf32>
    %cst_112 = arith.constant 5.000000e-01 : f32
    %300 = vector.broadcast %cst_112 : f32 to vector<48x128xf32>
    %301 = arith.mulf %300, %299 : vector<48x128xf32>
    %302 = arith.mulf %289, %301 : vector<48x128xf32>
    %c1_113 = arith.constant 1 : index
    %c0_114 = arith.constant 0 : index
    %c0_115 = arith.constant 0 : index
    %303 = vector.load %arg10[%c1_113, %c0_114, %c0_115] : memref<2x128x32xf32, #tpu.memory_space<vmem>>, vector<1x128x32xf32>
    %304 = vector.shape_cast %303 : vector<1x128x32xf32> to vector<128x32xf32>
    %cst_116 = arith.constant dense<0.000000e+00> : vector<48x32xf32>
    %305 = tpu.matmul %302, %304, %cst_116 {dimension_numbers = #tpu.dot_dimension_numbers<[1], [0], [0], [1], [0, 0, 1, 1], [], []>} : vector<48x128xf32>, vector<128x32xf32>, vector<48x32xf32> -> vector<48x32xf32>
    %306 = vector.broadcast %173 : vector<1x32xf32> to vector<48x32xf32>
    %307 = arith.addf %305, %306 : vector<48x32xf32>
    %308 = arith.addf %260, %307 : vector<48x32xf32>
    %c0_117 = arith.constant 0 : index
    %c0_118 = arith.constant 0 : index
    %309 = vector.load %arg11[%c0_117, %c0_118] : memref<1x32xf32, #tpu.memory_space<vmem>>, vector<1x32xf32>
    %c0_119 = arith.constant 0 : index
    %c0_120 = arith.constant 0 : index
    %310 = vector.load %arg12[%c0_119, %c0_120] : memref<1x32xf32, #tpu.memory_space<vmem>>, vector<1x32xf32>
    %cst_121 = arith.constant dense<0.000000e+00> : vector<48xf32>
    %311 = vector.multi_reduction <add>, %308, %cst_121 [1] : vector<48x32xf32> to vector<48xf32>
    %312 = vector.shape_cast %311 : vector<48xf32> to vector<48x1xf32>
    %cst_122 = arith.constant 3.200000e+01 : f32
    %313 = vector.broadcast %cst_122 : f32 to vector<48x1xf32>
    %314 = arith.divf %312, %313 : vector<48x1xf32>
    %315 = vector.broadcast %314 : vector<48x1xf32> to vector<48x32xf32>
    %316 = arith.subf %308, %315 : vector<48x32xf32>
    %317 = arith.mulf %316, %316 : vector<48x32xf32>
    %cst_123 = arith.constant dense<0.000000e+00> : vector<48xf32>
    %318 = vector.multi_reduction <add>, %317, %cst_123 [1] : vector<48x32xf32> to vector<48xf32>
    %319 = vector.shape_cast %318 : vector<48xf32> to vector<48x1xf32>
    %cst_124 = arith.constant 3.200000e+01 : f32
    %320 = vector.broadcast %cst_124 : f32 to vector<48x1xf32>
    %321 = arith.divf %319, %320 : vector<48x1xf32>
    %322 = vector.broadcast %314 : vector<48x1xf32> to vector<48x32xf32>
    %323 = arith.subf %308, %322 : vector<48x32xf32>
    %cst_125 = arith.constant 9.99999997E-7 : f32
    %324 = vector.broadcast %cst_125 : f32 to vector<48x1xf32>
    %325 = arith.addf %321, %324 : vector<48x1xf32>
    %326 = math.rsqrt %325 : vector<48x1xf32>
    %327 = vector.broadcast %326 : vector<48x1xf32> to vector<48x32xf32>
    %328 = arith.mulf %323, %327 : vector<48x32xf32>
    %329 = vector.broadcast %309 : vector<1x32xf32> to vector<48x32xf32>
    %330 = arith.mulf %328, %329 : vector<48x32xf32>
    %331 = vector.broadcast %310 : vector<1x32xf32> to vector<48x32xf32>
    %332 = arith.addf %330, %331 : vector<48x32xf32>
    %cst_126 = arith.constant 0.000000e+00 : f32
    %333 = vector.broadcast %cst_126 : f32 to vector<48x96xf32>
    %334 = tpu.concatenate %332, %333 in 1 : vector<48x32xf32>, vector<48x96xf32> -> vector<48x128xf32>
    %c0_127 = arith.constant 0 : index
    %c0_128 = arith.constant 0 : index
    %335 = vector.load %arg13[%c0_127, %c0_128] : memref<48x128xf32, #tpu.memory_space<vmem>>, vector<48x128xf32>
    tpu.vector_store %arg13[%c0_127, %c0_128], %334 {strides = array<i32>} : memref<48x128xf32, #tpu.memory_space<vmem>>, vector<48x128xf32>,
    return
  }
  func.func @transform_0(%arg0: i32) -> (i32, i32) {
    %c0_i32 = arith.constant 0 : i32
    %c0_i32_0 = arith.constant 0 : i32
    %c0_i32_1 = arith.constant 0 : i32
    return %c0_i32, %c0_i32_0 : i32, i32
  }
  func.func @transform_1(%arg0: i32) -> (i32, i32) {
    %c0_i32 = arith.constant 0 : i32
    %c0_i32_0 = arith.constant 0 : i32
    %c0_i32_1 = arith.constant 0 : i32
    return %c0_i32, %c0_i32_0 : i32, i32
  }
  func.func @transform_2(%arg0: i32) -> (i32, i32) {
    %c0_i32 = arith.constant 0 : i32
    %c0_i32_0 = arith.constant 0 : i32
    %c0_i32_1 = arith.constant 0 : i32
    return %c0_i32, %c0_i32_0 : i32, i32
  }
  func.func @transform_3(%arg0: i32) -> (i32, i32) {
    %c0_i32 = arith.constant 0 : i32
    %c0_i32_0 = arith.constant 0 : i32
    %c0_i32_1 = arith.constant 0 : i32
    return %c0_i32, %c0_i32_0 : i32, i32
  }
  func.func @transform_4(%arg0: i32) -> (i32, i32, i32) {
    %c0_i32 = arith.constant 0 : i32
    %c0_i32_0 = arith.constant 0 : i32
    %c0_i32_1 = arith.constant 0 : i32
    %c0_i32_2 = arith.constant 0 : i32
    return %c0_i32, %c0_i32_0, %c0_i32_1 : i32, i32, i32
  }
  func.func @transform_5(%arg0: i32) -> (i32, i32, i32, i32) {
    %c0_i32 = arith.constant 0 : i32
    %c0_i32_0 = arith.constant 0 : i32
    %c0_i32_1 = arith.constant 0 : i32
    %c0_i32_2 = arith.constant 0 : i32
    %c0_i32_3 = arith.constant 0 : i32
    return %c0_i32, %c0_i32_0, %c0_i32_1, %c0_i32_2 : i32, i32, i32, i32
  }
  func.func @transform_6(%arg0: i32) -> (i32, i32, i32) {
    %c0_i32 = arith.constant 0 : i32
    %c0_i32_0 = arith.constant 0 : i32
    %c0_i32_1 = arith.constant 0 : i32
    %c0_i32_2 = arith.constant 0 : i32
    return %c0_i32, %c0_i32_0, %c0_i32_1 : i32, i32, i32
  }
  func.func @transform_7(%arg0: i32) -> (i32, i32, i32) {
    %c0_i32 = arith.constant 0 : i32
    %c0_i32_0 = arith.constant 0 : i32
    %c0_i32_1 = arith.constant 0 : i32
    %c0_i32_2 = arith.constant 0 : i32
    return %c0_i32, %c0_i32_0, %c0_i32_1 : i32, i32, i32
  }
  func.func @transform_8(%arg0: i32) -> (i32, i32, i32) {
    %c0_i32 = arith.constant 0 : i32
    %c0_i32_0 = arith.constant 0 : i32
    %c0_i32_1 = arith.constant 0 : i32
    %c0_i32_2 = arith.constant 0 : i32
    return %c0_i32, %c0_i32_0, %c0_i32_1 : i32, i32, i32
  }
  func.func @transform_9(%arg0: i32) -> (i32, i32, i32) {
    %c0_i32 = arith.constant 0 : i32
    %c0_i32_0 = arith.constant 0 : i32
    %c0_i32_1 = arith.constant 0 : i32
    %c0_i32_2 = arith.constant 0 : i32
    return %c0_i32, %c0_i32_0, %c0_i32_1 : i32, i32, i32
  }
  func.func @transform_10(%arg0: i32) -> (i32, i32) {
    %c0_i32 = arith.constant 0 : i32
    %c0_i32_0 = arith.constant 0 : i32
    %c0_i32_1 = arith.constant 0 : i32
    return %c0_i32, %c0_i32_0 : i32, i32
  }
  func.func @transform_11(%arg0: i32) -> (i32, i32) {
    %c0_i32 = arith.constant 0 : i32
    %c0_i32_0 = arith.constant 0 : i32
    %c0_i32_1 = arith.constant 0 : i32
    return %c0_i32, %c0_i32_0 : i32, i32
  }
  func.func @transform_12(%arg0: i32) -> (i32, i32) {
    %c0_i32 = arith.constant 0 : i32
    %c0_i32_0 = arith.constant 0 : i32
    %c0_i32_1 = arith.constant 0 : i32
    return %c0_i32, %c0_i32_0 : i32, i32
  }
}

</mosaic_0001>

<bundles_post_ra>
// kernel: tpu_custom_call.1
= control target key start
LH: loop header
LB: loop body
LE: loop exit
PB: predicated region body
PF: predicated region fallthrough
CT: control target
= control target key end

     0   :  { %vm60_vm0 = vcmask 392192   ;;  %s6284_s0 = inlined_call_operand.vmem [shape: f32[48,48], index: 0, kind: input, shape index: {}]   ;;  %s6285_s1 = inlined_call_operand.vmem [shape: f32[48,32], index: 1, kind: input, shape index: {}]   ;;  %s6286_s2 = inlined_call_operand.vmem [shape: f32[48,48], index: 2, kind: input, shape index: {}]   ;;  %s6287_s3 = inlined_call_operand.vmem [shape: f32[48,32], index: 3, kind: input, shape index: {}]   ;;  %s6288_s4 = inlined_call_operand.vmem [shape: f32[2,9,32], index: 4, kind: input, shape index: {}]   ;;  %s6289_s5 = inlined_call_operand.vmem [shape: f32[2,3,32,32], index: 5, kind: input, shape index: {}]   ;;  %s6290_s6 = inlined_call_operand.vmem [shape: f32[2,32,32], index: 6, kind: input, shape index: {}]   ;;  %s6291_s7 = inlined_call_operand.vmem [shape: f32[2,32,128], index: 7, kind: input, shape index: {}]   ;;  %s6292_s8 = inlined_call_operand.vmem [shape: f32[2,1,128], index: 8, kind: input, shape index: {}]   ;;  %s6293_s9 = inlined_call_operand.vmem [shape: f32[2,128,32], index: 9, kind: input, shape index: {}]   ;;  %s6294_s10 = inlined_call_operand.vmem [shape: f32[1,32], index: 10, kind: input, shape index: {}]   ;;  %s6295_s11 = inlined_call_operand.vmem [shape: f32[1,32], index: 11, kind: input, shape index: {}]   ;;  %s6296_s12 = inlined_call_operand.hbm [shape: f32[48,128], index: 12, kind: output, shape index: {}]  }
   0x1   :  { %v53_v0 = vld [vmem:[%s6287_s3 + $0x28] sm:$0xff]  ;;  %v52_v1 = vld [vmem:[%s6287_s3 + $0x20] sm:$0xff]  ;;  %v51_v2 = vld [vmem:[%s6287_s3 + $0x18] sm:$0xff] }
   0x2   :  { %4235 = vmatprep.subr.mxu1 %v53_v0  ;;  %v42_v3 = vld [vmem:[%s6284_s0] sm:$0xff]  ;;  %v50_v4 = vld [vmem:[%s6287_s3 + $0x10] sm:$0xff] }
   0x3   :  { %4236 = vmatpush3.msra.mxu1 %v53_v0  ;;  %4247 = vmatprep.mubr.msk.f32.mxu1 %vm60_vm0, %v42_v3 }
   0x4   :  { %4237 = vmatprep.subr.mxu1 %v52_v1 }
   0x5   :  { %4238 = vmatpush3.msra.mxu1 %v52_v1 }
   0x6   :  { %17 = vsyncpa [#allocation3], 0  ;;  %4239 = vmatprep.subr.mxu1 %v51_v2  ;;  %v49_v5 = vld [vmem:[%s6287_s3 + $0x8] sm:$0xff]  ;;  %v48_v6 = vld [vmem:[%s6287_s3] sm:$0xff]  ;;  %vm206_vm1 = vcmask 261120  }
   0x7   :  { %4240 = vmatpush3.msra.mxu1 %v51_v2  ;;  %v43_v7 = vld [vmem:[%s6284_s0 + $0x8] sm:$0xff]  ;;  %v44_v8 = vld [vmem:[%s6284_s0 + $0x10] sm:$0xff]  ;;  %v45_v9 = vld [vmem:[%s6284_s0 + $0x18] sm:$0xff] }
   0x8   :  { %4241 = vmatprep.subr.mxu1 %v50_v4  ;;  %v46_v10 = vld [vmem:[%s6284_s0 + $0x20] sm:$0xff]  ;;  %v47_v11 = vld [vmem:[%s6284_s0 + $0x28] sm:$0xff]  ;;  %v56_v18 = vld [vmem:[%s6285_s1 + $0x10] sm:$0xff] }
   0x9   :  { %4242 = vmatpush3.msra.mxu1 %v50_v4  ;;  %v54_v13 = vld [vmem:[%s6285_s1] sm:$0xff]  ;;  %v55_v14 = vld [vmem:[%s6285_s1 + $0x8] sm:$0xff]  ;;  %v57_v21 = vld [vmem:[%s6285_s1 + $0x18] sm:$0xff] }
   0xa   :  { %4243 = vmatprep.subr.mxu1 %v49_v5  ;;  %v58_v25 = vld [vmem:[%s6285_s1 + $0x20] sm:$0xff]  ;;  %v59_v29 = vld [vmem:[%s6285_s1 + $0x28] sm:$0xff]  ;;  %v193_v2 = vld [vmem:[%s6289_s5 + $0x18] sm:$0xff] }
   0xb   :  { %4244 = vmatpush3.msra.mxu1 %v49_v5  ;;  %v201_v3 = vld [vmem:[%s6289_s5 + $0x58] sm:$0xff]  ;;  %v192_v4 = vld [vmem:[%s6289_s5 + $0x10] sm:$0xff] }
   0xc   :  { %4245 = vmatprep.subr.mxu1 %v48_v6  ;;  %4290 = vmatprep.subr.mxu0 %v201_v3  ;;  %v200_v5 = vld [vmem:[%s6289_s5 + $0x50] sm:$0xff] }
   0xd   :  { %4246 = vmatpush3.msra.mxu1 %v48_v6  ;;  %4291 = vmatpush3.msra.mxu0 %v201_v3  ;;  %v191_v6 = vld [vmem:[%s6289_s5 + $0x8] sm:$0xff] }
   0xe   :  { %4248 = vmatmul.mubr.msk.f32.vlgmr.msra.gmra.mxu1 %vm60_vm0, %v43_v7  ;;  %4256 = vmatprep.subr.mxu1 %v193_v2  ;;  %v190_v7 = vld [vmem:[%s6289_s5] sm:$0xff] }
   0xf   :  { %4250 = vmatprep.mubr.msk.f32.mxu1 %vm60_vm0, %v44_v8  ;;  %4257 = vmatpush3.msra.mxu1 %v193_v2  ;;  %v199_v8 = vld [vmem:[%s6289_s5 + $0x48] sm:$0xff] }
  0x10   :  { %4258 = vmatprep.subr.mxu1 %v192_v4  ;;  %4292 = vmatprep.subr.mxu0 %v200_v5  ;;  %v195_v2 = vld [vmem:[%s6289_s5 + $0x28] sm:$0xff] }
  0x11   :  { %4259 = vmatpush3.msra.mxu1 %v192_v4  ;;  %4293 = vmatpush3.msra.mxu0 %v200_v5  ;;  %v194_v5 = vld [vmem:[%s6289_s5 + $0x20] sm:$0xff] }
  0x12   :  { %4251 = vmatmul.mubr.msk.f32.gmra.mxu1 %vm60_vm0, %v45_v9  ;;  %4260 = vmatprep.subr.mxu1 %v191_v6  ;;  %v198_v9 = vld [vmem:[%s6289_s5 + $0x40] sm:$0xff] }
  0x13   :  { %4253 = vmatprep.mubr.msk.f32.mxu1 %vm60_vm0, %v46_v10  ;;  %4294 = vmatprep.subr.mxu0 %v199_v8  ;;  %v197_v10 = vld [vmem:[%s6289_s5 + $0x38] sm:$0xff] }
  0x14   :  { %4261 = vmatpush3.msra.mxu1 %v191_v6  ;;  %4295 = vmatpush3.msra.mxu0 %v199_v8  ;;  %v5197_v6 = vld [vmem:[%s6290_s6 + $0x10] sm:$0xff]  ;;  %v5211_v8 = vld [vmem:[%s6290_s6] sm:$0xff] }
  0x15   :  { %4262 = vmatprep.subr.mxu1 %v190_v7  ;;  %4296 = vmatprep.subr.mxu0 %v198_v9 }
  0x16   :  { %4254 = vmatmul.mubr.msk.f32.gmra.mxu1 %vm60_vm0, %v47_v11  ;;  %4297 = vmatpush3.msra.mxu0 %v198_v9  ;;  %v5141_v11 = vld [vmem:[%s6290_s6 + $0x18] sm:$0xff] }
  0x17   :  { %4263 = vmatpush3.msra.mxu1 %v190_v7  ;;  %4328 = vmatprep.subr.mxu0 %v5141_v11  ;;  %v5204_v7 = vld [vmem:[%s6290_s6 + $0x8] sm:$0xff] }
  0x18   :  { %4273 = vmatprep.subr.mxu1 %v197_v10 }
  0xce   :  { %v4249_v12 = vpop.f32.mrf.mxu1 }
  0xcf   :  { %v5044_v19 = vadd.f32 %v4249_v12, %v55_v14 }
  0xd0   :  { %v145_v15 = vpop.f32.mrf.mxu1 }
  0xd1   :  { %v5039_v16 = vadd.f32 %v145_v15, %v54_v13  ;;  %v210_v28 = vsel %vm206_vm1, %v5044_v19, 0.0 }
  0xd2   :  { %v4252_v17 = vpop.f32.mrf.mxu1 }
  0xd3   :  { %v207_v20 = vsel %vm206_vm1, %v5039_v16, 0.0  ;;  %v5056_v26 = vadd.f32 %v4252_v17, %v57_v21 }
  0xd4   :  { %v155_v22 = vpop.f32.mrf.mxu1  ;;  %208 = vadd.xlane.f32.xlu0 %v207_v20 }
  0xd5   :  { %v5051_v23 = vadd.f32 %v155_v22, %v56_v18  ;;  %v216_v33 = vsel %vm206_vm1, %v5056_v26, 0.0  ;;  %v174_v18 = vlaneseq }
  0xd6   :  { %v4255_v24 = vpop.f32.mrf.mxu1 }
  0xd7   :  { %v213_v27 = vsel %vm206_vm1, %v5051_v23, 0.0  ;;  %v5067_v32 = vadd.f32 %v4255_v24, %v59_v29 }
  0xd8   :  { %v165_v30 = vpop.f32.mrf.mxu1  ;;  %214 = vadd.xlane.f32.xlu1 %v213_v27  ;;  %211 = vadd.xlane.f32.xlu0 %v210_v28  ;;  %v5145_v28 = vshrl.u32 %v174_v18, 7 }
  0xd9   :  { %v5065_v31 = vadd.f32 %v165_v30, %v58_v25  ;;  %v222_v35 = vsel %vm206_vm1, %v5067_v32, 0.0 }
  0xda   :  { %v524_v9 = vsub.s32 4, %v5145_v28 }
  0xdb   :  { %v219_v34 = vsel %vm206_vm1, %v5065_v31, 0.0 }
  0xdc   :  { %217 = vadd.xlane.f32.xlu1 %v216_v33  ;;  %220 = vadd.xlane.f32.xlu0 %v219_v34 }
  0xe0   :  { %223 = vadd.xlane.f32.xlu1 %v222_v35 }
 0x15d   :  { %v209_v36 = vpop.xlane.xlu0 %208 }
 0x15e   :  { %v226_v37 = vmul.f32 0.03125, %v209_v36  ;;  %v288_v36 = vsub.s32 0, %v5145_v28 }
 0x160   :  { %v5076_v38 = vsub.f32 %v5039_v16, %v226_v37 }
 0x161   :  { %v215_v39 = vpop.xlane.xlu1 %214  ;;  %v212_v40 = vpop.xlane.xlu0 %211 }
 0x162   :  { %v228_v41 = vmul.f32 0.03125, %v215_v39  ;;  %v227_v42 = vmul.f32 0.03125, %v212_v40  ;;  %v238_v43 = vmul.f32 %v5076_v38, %v5076_v38  ;;  %v5151_v39 = vld [vmem:[%s6288_s4] sm:$0xff] }
 0x164   :  { %v5081_v44 = vsub.f32 %v5051_v23, %v228_v41  ;;  %v5084_v45 = vsub.f32 %v5044_v19, %v227_v42  ;;  %v244_v46 = vsel %vm206_vm1, %v238_v43, 0.0  ;;  %v298_v41 = vsub.s32 1, %v5145_v28 }
 0x165   :  { %v218_v47 = vpop.xlane.xlu1 %217  ;;  %245 = vadd.xlane.f32.xlu0 %v244_v46  ;;  %v221_v48 = vpop.xlane.xlu0 %220  ;;  %v289_v42 = vrot.slane %v5151_v39, %v288_v36 }
 0x166   :  { %v229_v49 = vmul.f32 0.03125, %v218_v47  ;;  %v230_v50 = vmul.f32 0.03125, %v221_v48  ;;  %v240_v51 = vmul.f32 %v5081_v44, %v5081_v44  ;;  %v239_v52 = vmul.f32 %v5084_v45, %v5084_v45 }
 0x167   :  { %v299_v47 = vrot.slane %v5151_v39, %v298_v41 }
 0x168   :  { %v5092_v53 = vsub.f32 %v5056_v26, %v229_v49  ;;  %v5095_v54 = vsub.f32 %v5065_v31, %v230_v50  ;;  %v250_v55 = vsel %vm206_vm1, %v240_v51, 0.0  ;;  %v247_v56 = vsel %vm206_vm1, %v239_v52, 0.0 }
 0x169   :  { %v224_v57 = vpop.xlane.xlu1 %223  ;;  %251 = vadd.xlane.f32.xlu0 %v250_v55  ;;  %248 = vadd.xlane.f32.xlu1 %v247_v56 }
 0x16a   :  { %v231_v58 = vmul.f32 0.03125, %v224_v57  ;;  %v241_v59 = vmul.f32 %v5092_v53, %v5092_v53  ;;  %v242_v60 = vmul.f32 %v5095_v54, %v5095_v54 }
 0x16c   :  { %v5104_v61 = vsub.f32 %v5067_v32, %v231_v58  ;;  %v253_v62 = vsel %vm206_vm1, %v241_v59, 0.0  ;;  %v256_v63 = vsel %vm206_vm1, %v242_v60, 0.0 }
 0x16d   :  { %254 = vadd.xlane.f32.xlu1 %v253_v62  ;;  %257 = vadd.xlane.f32.xlu0 %v256_v63  ;;  %v196_v63 = vld [vmem:[%s6289_s5 + $0x30] sm:$0xff] }
 0x16e   :  { %v243_v0 = vmul.f32 %v5104_v61, %v5104_v61 }
 0x170   :  { %v259_v1 = vsel %vm206_vm1, %v243_v0, 0.0 }
 0x171   :  { %260 = vadd.xlane.f32.xlu1 %v259_v1 }
 0x1ee   :  { %v246_v12 = vpop.xlane.xlu0 %245 }
 0x1ef   :  { %v262_v13 = vmul.f32 0.03125, %v246_v12  ;;  %v525_v12 = vrot.slane %v5151_v39, %v524_v9 }
 0x1f1   :  { %v268_v14 = vadd.f32 1e-06, %v262_v13  ;;  %v5221_v13 = vand.u32 127, %v174_v18 }
 0x1f2   :  { %v249_v15 = vpop.xlane.xlu1 %248  ;;  %v252_v17 = vpop.xlane.xlu0 %251 }
 0x1f3   :  { %4713 = vrsqrt.f32 %v268_v14  ;;  %v263_v20 = vmul.f32 0.03125, %v249_v15  ;;  %v264_v21 = vmul.f32 0.03125, %v252_v17  ;;  %vm177_vm2 = vcmp.lt.s32.totalorder %v5221_v13, 16 }
 0x1f4   :  { %vm179_vm3 = vcmp.ge.s32.totalorder %v5221_v13, 16  ;;  %vm180_vm4 = vcmp.lt.s32.totalorder %v5221_v13, 32 }
 0x1f5   :  { %v269_v22 = vadd.f32 1e-06, %v263_v20  ;;  %v270_v24 = vadd.f32 1e-06, %v264_v21  ;;  %vm5274_vm5 = vmand %vm179_vm3, %vm180_vm4 }
 0x1f6   :  { %v255_v25 = vpop.xlane.xlu1 %254  ;;  %v258_v27 = vpop.xlane.xlu0 %257 }
 0x1f7   :  { %4715 = vrsqrt.f32 %v269_v22  ;;  %v265_v29 = vmul.f32 0.03125, %v255_v25  ;;  %v266_v30 = vmul.f32 0.03125, %v258_v27 }
 0x1f8   :  { %4717 = vrsqrt.f32 %v270_v24 }
 0x1f9   :  { %v271_v33 = vadd.f32 1e-06, %v265_v29  ;;  %v272_v34 = vadd.f32 1e-06, %v266_v30 }
 0x1fa   :  { %v261_v35 = vpop.xlane.xlu1 %260 }
 0x1fb   :  { %4719 = vrsqrt.f32 %v271_v33  ;;  %v267_v37 = vmul.f32 0.03125, %v261_v35 }
 0x1fc   :  { %4721 = vrsqrt.f32 %v272_v34 }
 0x1fd   :  { %v273_v40 = vadd.f32 1e-06, %v267_v37 }
 0x1ff   :  { %4723 = vrsqrt.f32 %v273_v40 }
 0x200   :  { %v4714_v43 = vpop.eup %4713 }
 0x201   :  { %v280_v46 = vmul.f32 %v4714_v43, %v5076_v38 }
 0x203   :  { %v290_v48 = vmul.f32 %v289_v42, %v280_v46 }
 0x204   :  { %v4716_v49 = vpop.eup %4715 }
 0x205   :  { %v4718_v50 = vpop.eup %4717  ;;  %v281_v51 = vmul.f32 %v4716_v49, %v5084_v45  ;;  %v300_v52 = vadd.f32 %v299_v47, %v290_v48 }
 0x206   :  { %v282_v55 = vmul.f32 %v4718_v50, %v5081_v44 }
 0x207   :  { %v291_v56 = vmul.f32 %v289_v42, %v281_v51  ;;  %4264 = vmatprep.mubr.msk.f32.mxu1 %vm206_vm1, %v300_v52  ;;  %4298 = vmatprep.mubr.msk.f32.mxu0 %vm206_vm1, %v300_v52 }
 0x208   :  { %v4720_v57 = vpop.eup %4719  ;;  %v292_v58 = vmul.f32 %v289_v42, %v282_v55 }
 0x209   :  { %v4722_v38 = vpop.eup %4721  ;;  %v301_v59 = vadd.f32 %v299_v47, %v291_v56  ;;  %v283_v60 = vmul.f32 %v4720_v57, %v5092_v53 }
 0x20a   :  { %v302_v62 = vadd.f32 %v299_v47, %v292_v58  ;;  %v284_v45 = vmul.f32 %v4722_v38, %v5095_v54  ;;  %v425_v38 = vsub.s32 3, %v5145_v28 }
 0x20b   :  { %4265 = vmatmul.mubr.msk.f32.vlgmr.msra.gmra.mxu1 %vm206_vm1, %v301_v59  ;;  %4299 = vmatmul.mubr.msk.f32.vlgmr.msra.gmra.mxu0 %vm206_vm1, %v301_v59  ;;  %v293_v44 = vmul.f32 %v289_v42, %v283_v60 }
 0x20c   :  { %v4724_v0 = vpop.eup %4723  ;;  %4274 = vmatpush3.msra.mxu1 %v197_v10  ;;  %4267 = vmatprep.mubr.msk.f32.mxu1 %vm206_vm1, %v302_v62  ;;  %v294_v1 = vmul.f32 %v289_v42, %v284_v45  ;;  %v308_v10 = vsub.s32 2, %v5145_v28 }
 0x20d   :  { %4301 = vmatprep.mubr.msk.f32.mxu0 %vm206_vm1, %v302_v62  ;;  %4275 = vmatprep.subr.mxu1 %v196_v63  ;;  %v303_v53 = vadd.f32 %v299_v47, %v293_v44  ;;  %v285_v54 = vmul.f32 %v4724_v0, %v5104_v61 }
 0x20e   :  { %4276 = vmatpush3.msra.mxu1 %v196_v63  ;;  %v304_v3 = vadd.f32 %v299_v47, %v294_v1  ;;  %4329 = vmatpush3.msra.mxu0 %v5141_v11  ;;  %v5228_v17 = vrot.slane %v5151_v39, %v308_v10  ;;  %v426_v63 = vrot.slane %v5151_v39, %v425_v38 }
 0x20f   :  { %4268 = vmatmul.mubr.msk.f32.gmra.mxu1 %vm206_vm1, %v303_v53  ;;  %4302 = vmatmul.mubr.msk.f32.gmra.mxu0 %vm206_vm1, %v303_v53  ;;  %v295_v4 = vmul.f32 %v289_v42, %v285_v54 }
 0x210   :  { %4270 = vmatprep.mubr.msk.f32.mxu1 %vm206_vm1, %v304_v3  ;;  %4277 = vmatprep.subr.mxu1 %v195_v2 }
 0x211   :  { %4304 = vmatprep.mubr.msk.f32.mxu0 %vm206_vm1, %v304_v3  ;;  %4278 = vmatpush3.msra.mxu1 %v195_v2  ;;  %v305_v61 = vadd.f32 %v299_v47, %v295_v4 }
 0x212   :  { %4279 = vmatprep.subr.mxu1 %v194_v5  ;;  %4330 = vmatprep.subr.mxu0 %v5197_v6 }
 0x213   :  { %4271 = vmatmul.mubr.msk.f32.gmra.mxu1 %vm206_vm1, %v305_v61  ;;  %4305 = vmatmul.mubr.msk.f32.gmra.mxu0 %vm206_vm1, %v305_v61 }
 0x214   :  { %4280 = vmatpush3.msra.mxu1 %v194_v5  ;;  %4281 = vmatprep.mubr.msk.f32.mxu1 %vm206_vm1, %v300_v52 }
 0x215   :  { %4331 = vmatpush3.msra.mxu0 %v5197_v6 }
 0x216   :  { %4332 = vmatprep.subr.mxu0 %v5204_v7 }
 0x217   :  { %4282 = vmatmul.mubr.msk.f32.vlgmr.msra.gmra.mxu1 %vm206_vm1, %v301_v59  ;;  %4333 = vmatpush3.msra.mxu0 %v5204_v7 }
 0x218   :  { %4284 = vmatprep.mubr.msk.f32.mxu1 %vm206_vm1, %v302_v62  ;;  %4334 = vmatprep.subr.mxu0 %v5211_v8 }
 0x219   :  { %4335 = vmatpush3.msra.mxu0 %v5211_v8 }
 0x21b   :  { %4285 = vmatmul.mubr.msk.f32.gmra.mxu1 %vm206_vm1, %v303_v53 }
 0x21c   :  { %4287 = vmatprep.mubr.msk.f32.mxu1 %vm206_vm1, %v304_v3 }
 0x21f   :  { %4288 = vmatmul.mubr.msk.f32.gmra.mxu1 %vm206_vm1, %v305_v61 }
 0x2cb   :  { %v5223_v14 = vpop.f32.mrf.mxu1  ;;  %v4300_v15 = vpop.f32.mrf.mxu0 }
 0x2cc   :  { %v5230_v22 = vadd.f32 %v4300_v15, %v525_v12  ;;  %v400_v4 = vadd.f32 %v5223_v14, %v5228_v17 }
 0x2cd   :  { %v394_v20 = vpop.f32.mrf.mxu1  ;;  %v592_v21 = vpop.f32.mrf.mxu0 }
 0x2ce   :  { %v395_v24 = vadd.f32 %v394_v20, %v5228_v17  ;;  %v5234_v25 = vadd.f32 %v592_v21, %v525_v12  ;;  %v837_v35 = vsel %vm177_vm2, %v5230_v22, 0.0  ;;  %v622_v61 = vsel %vm177_vm2, %v400_v4, 0.0 }
 0x2cf   :  { %v5236_v18 = vpop.f32.mrf.mxu1  ;;  %v4303_v27 = vpop.f32.mrf.mxu0 }
 0x2d0   :  { %v621_v29 = vsel %vm177_vm2, %v395_v24, 0.0  ;;  %v836_v30 = vsel %vm177_vm2, %v5234_v25, 0.0  ;;  %v5248_v37 = vadd.f32 %v4303_v27, %v525_v12  ;;  %v955_v59 = vsel %vm5274_vm5, %v395_v24, 0.0 }
 0x2d1   :  { %v5243_v33 = vpop.f32.mrf.mxu1  ;;  %v602_v34 = vpop.f32.mrf.mxu0  ;;  %4319 = vmatprep.mubr.msk.f32.mxu1 %vm206_vm1, %v621_v29  ;;  %4336 = vmatprep.mubr.msk.f32.mxu0 %vm206_vm1, %v836_v30  ;;  %v410_v15 = vadd.f32 %v5236_v18, %v5228_v17 }
 0x2d2   :  { %v5252_v40 = vadd.f32 %v602_v34, %v525_v12  ;;  %4337 = vmatmul.mubr.msk.f32.vlgmr.msra.gmra.mxu0 %vm206_vm1, %v837_v35  ;;  %v839_v49 = vsel %vm177_vm2, %v5248_v37, 0.0  ;;  %v405_v5 = vadd.f32 %v5243_v33, %v5228_v17  ;;  %v1152_v33 = vsel %vm5274_vm5, %v5234_v25, 0.0 }
 0x2d3   :  { %v5255_v42 = vpop.f32.mrf.mxu1  ;;  %v4306_v43 = vpop.f32.mrf.mxu0  ;;  %v624_v24 = vsel %vm177_vm2, %v410_v15, 0.0  ;;  %v958_v18 = vsel %vm5274_vm5, %v410_v15, 0.0 }
 0x2d4   :  { %v838_v46 = vsel %vm177_vm2, %v5252_v40, 0.0  ;;  %v5263_v50 = vadd.f32 %v4306_v43, %v525_v12  ;;  %v623_v14 = vsel %vm177_vm2, %v405_v5, 0.0  ;;  %v957_v20 = vsel %vm5274_vm5, %v405_v5, 0.0 }
 0x2d5   :  { %v414_v47 = vpop.f32.mrf.mxu1  ;;  %v612_v48 = vpop.f32.mrf.mxu0  ;;  %4339 = vmatprep.mubr.msk.f32.mxu0 %vm206_vm1, %v838_v46  ;;  %v420_v27 = vadd.f32 %v5255_v42, %v5228_v17  ;;  %v1154_v25 = vsel %vm5274_vm5, %v5252_v40, 0.0 }
 0x2d6   :  { %v5268_v51 = vadd.f32 %v612_v48, %v525_v12  ;;  %4340 = vmatmul.mubr.msk.f32.gmra.mxu0 %vm206_vm1, %v839_v49  ;;  %v841_v58 = vsel %vm177_vm2, %v5263_v50, 0.0  ;;  %v956_v12 = vsel %vm5274_vm5, %v400_v4, 0.0  ;;  %v415_v21 = vadd.f32 %v414_v47, %v5228_v17  ;;  %v183_v48 = vld [vmem:[%s6286_s2 + $0x8] sm:$0xff] }
 0x2d7   :  { %v4283_v52 = vpop.f32.mrf.mxu1  ;;  %v960_v17 = vsel %vm5274_vm5, %v420_v27, 0.0 }
 0x2d8   :  { %v840_v55 = vsel %vm177_vm2, %v5268_v51, 0.0  ;;  %v499_v54 = vadd.f32 %v4283_v52, %v426_v63  ;;  %v625_v29 = vsel %vm177_vm2, %v415_v21, 0.0  ;;  %v959_v30 = vsel %vm5274_vm5, %v415_v21, 0.0 }
 0x2d9   :  { %v493_v56 = vpop.f32.mrf.mxu1  ;;  %4342 = vmatprep.mubr.msk.f32.mxu0 %vm206_vm1, %v840_v55  ;;  %v1156_v34 = vsel %vm5274_vm5, %v5268_v51, 0.0 }
 0x2da   :  { %4343 = vmatmul.mubr.msk.f32.gmra.mxu0 %vm206_vm1, %v841_v58  ;;  %v494_v3 = vadd.f32 %v493_v56, %v426_v63 }
 0x2db   :  { %v4286_v60 = vpop.f32.mrf.mxu1  ;;  %4357 = vmatprep.mubr.msk.f32.mxu0 %vm206_vm1, %v955_v59 }
 0x2dc   :  { %v509_v53 = vadd.f32 %v4286_v60, %v426_v63  ;;  %v182_v60 = vld [vmem:[%s6286_s2] sm:$0xff] }
 0x2dd   :  { %v503_v62 = vpop.f32.mrf.mxu1 }
 0x2de   :  { %v504_v2 = vadd.f32 %v503_v62, %v426_v63 }
 0x2df   :  { %v4289_v45 = vpop.f32.mrf.mxu1 }
 0x2e0   :  { %v519_v44 = vadd.f32 %v4289_v45, %v426_v63 }
 0x2e1   :  { %v513_v0 = vpop.f32.mrf.mxu1 }
 0x2e2   :  { %v514_v1 = vadd.f32 %v513_v0, %v426_v63  ;;  %4307 = vmatprep.subr.msk.mxu1 %vm206_vm1, %v519_v44  ;;  %4345 = vmatprep.subr.msk.mxu0 %vm206_vm1, %v519_v44 }
 0x2e3   :  { %4308 = vmatpush3.xpose.msk.msra.mxu1 %vm206_vm1, %v519_v44  ;;  %4346 = vmatpush3.xpose.msk.msra.mxu0 %vm206_vm1, %v519_v44 }
 0x2e4   :  { %4309 = vmatprep.subr.msk.mxu1 %vm206_vm1, %v514_v1  ;;  %4347 = vmatprep.subr.msk.mxu0 %vm206_vm1, %v514_v1 }
 0x2e7   :  { %4310 = vmatpush3.xpose.msk.msra.mxu1 %vm206_vm1, %v514_v1  ;;  %4348 = vmatpush3.xpose.msk.msra.mxu0 %vm206_vm1, %v514_v1 }
 0x2e8   :  { %4311 = vmatprep.subr.msk.mxu1 %vm206_vm1, %v509_v53  ;;  %4349 = vmatprep.subr.msk.mxu0 %vm206_vm1, %v509_v53 }
 0x2eb   :  { %4312 = vmatpush3.xpose.msk.msra.mxu1 %vm206_vm1, %v509_v53  ;;  %4350 = vmatpush3.xpose.msk.msra.mxu0 %vm206_vm1, %v509_v53  ;;  %v185_v53 = vld [vmem:[%s6286_s2 + $0x18] sm:$0xff] }
 0x2ec   :  { %4313 = vmatprep.subr.msk.mxu1 %vm206_vm1, %v504_v2  ;;  %4351 = vmatprep.subr.msk.mxu0 %vm206_vm1, %v504_v2 }
 0x2ef   :  { %4314 = vmatpush3.xpose.msk.msra.mxu1 %vm206_vm1, %v504_v2  ;;  %4352 = vmatpush3.xpose.msk.msra.mxu0 %vm206_vm1, %v504_v2 }
 0x2f0   :  { %4315 = vmatprep.subr.msk.mxu1 %vm206_vm1, %v499_v54  ;;  %4353 = vmatprep.subr.msk.mxu0 %vm206_vm1, %v499_v54 }
 0x2f3   :  { %4316 = vmatpush3.xpose.msk.msra.mxu1 %vm206_vm1, %v499_v54  ;;  %4354 = vmatpush3.xpose.msk.msra.mxu0 %vm206_vm1, %v499_v54 }
 0x2f4   :  { %4317 = vmatprep.subr.msk.mxu1 %vm206_vm1, %v494_v3  ;;  %4355 = vmatprep.subr.msk.mxu0 %vm206_vm1, %v494_v3 }
 0x2f7   :  { %4318 = vmatpush3.xpose.msk.msra.mxu1 %vm206_vm1, %v494_v3  ;;  %4356 = vmatpush3.xpose.msk.msra.mxu0 %vm206_vm1, %v494_v3 }
 0x2f8   :  { %4366 = vmatprep.subr.mxu1 %v5141_v11 }
 0x2fa   :  { %4320 = vmatmul.mubr.msk.f32.vlgmr.msra.gmra.mxu1 %vm206_vm1, %v622_v61  ;;  %4358 = vmatmul.mubr.msk.f32.vlgmr.msra.gmra.mxu0 %vm206_vm1, %v956_v12 }
 0x2fb   :  { %4322 = vmatprep.mubr.msk.f32.mxu1 %vm206_vm1, %v623_v14  ;;  %4360 = vmatprep.mubr.msk.f32.mxu0 %vm206_vm1, %v957_v20 }
 0x2fc   :  { %4367 = vmatpush3.msra.mxu1 %v5141_v11  ;;  %v626_v11 = vsel %vm177_vm2, %v420_v27, 0.0 }
 0x2fd   :  { %4368 = vmatprep.subr.mxu1 %v5197_v6 }
 0x2fe   :  { %4323 = vmatmul.mubr.msk.f32.gmra.mxu1 %vm206_vm1, %v624_v24  ;;  %4361 = vmatmul.mubr.msk.f32.gmra.mxu0 %vm206_vm1, %v958_v18 }
 0x2ff   :  { %4325 = vmatprep.mubr.msk.f32.mxu1 %vm206_vm1, %v625_v29  ;;  %4363 = vmatprep.mubr.msk.f32.mxu0 %vm206_vm1, %v959_v30  ;;  %v184_v29 = vld [vmem:[%s6286_s2 + $0x10] sm:$0xff] }
 0x300   :  { %4369 = vmatpush3.msra.mxu1 %v5197_v6  ;;  %v1153_v6 = vsel %vm5274_vm5, %v5230_v22, 0.0 }
 0x301   :  { %4370 = vmatprep.subr.mxu1 %v5204_v7 }
 0x302   :  { %4326 = vmatmul.mubr.msk.f32.gmra.mxu1 %vm206_vm1, %v626_v11  ;;  %4364 = vmatmul.mubr.msk.f32.gmra.mxu0 %vm206_vm1, %v960_v17 }
 0x303   :  { %4371 = vmatpush3.msra.mxu1 %v5204_v7  ;;  %4374 = vmatprep.mubr.msk.f32.mxu1 %vm206_vm1, %v1152_v33  ;;  %v1155_v7 = vsel %vm5274_vm5, %v5248_v37, 0.0 }
 0x304   :  { %4372 = vmatprep.subr.mxu1 %v5211_v8 }
 0x305   :  { %4373 = vmatpush3.msra.mxu1 %v5211_v8  ;;  %v1157_v8 = vsel %vm5274_vm5, %v5263_v50, 0.0 }
 0x306   :  { %4375 = vmatmul.mubr.msk.f32.vlgmr.msra.gmra.mxu1 %vm206_vm1, %v1153_v6 }
 0x307   :  { %4377 = vmatprep.mubr.msk.f32.mxu1 %vm206_vm1, %v1154_v25 }
 0x30a   :  { %4378 = vmatmul.mubr.msk.f32.gmra.mxu1 %vm206_vm1, %v1155_v7 }
 0x30b   :  { %4380 = vmatprep.mubr.msk.f32.mxu1 %vm206_vm1, %v1156_v34 }
 0x30e   :  { %4381 = vmatmul.mubr.msk.f32.gmra.mxu1 %vm206_vm1, %v1157_v8  ;;  %v186_v8 = vld [vmem:[%s6286_s2 + $0x20] sm:$0xff] }
 0x392   :  { %v4338_v22 = vpop.f32.mrf.mxu0 }
 0x394   :  { %v926_v35 = vpop.f32.mrf.mxu0 }
 0x396   :  { %v4341_v40 = vpop.f32.mrf.mxu0 }
 0x398   :  { %v936_v42 = vpop.f32.mrf.mxu0 }
 0x39a   :  { %v4344_v43 = vpop.f32.mrf.mxu0 }
 0x39b   :  { %4404 = vmatprep.subr.mxu0 %v4344_v43 }
 0x39c   :  { %v946_v37 = vpop.f32.mrf.mxu0  ;;  %4405 = vmatpush3.msra.mxu0 %v4344_v43 }
 0x39d   :  { %4406 = vmatprep.subr.mxu0 %v946_v37 }
 0x39e   :  { %4407 = vmatpush3.msra.mxu0 %v946_v37 }
 0x39f   :  { %4408 = vmatprep.subr.mxu0 %v4341_v40 }
 0x3a0   :  { %4409 = vmatpush3.msra.mxu0 %v4341_v40 }
 0x3a1   :  { %4410 = vmatprep.subr.mxu0 %v936_v42 }
 0x3a2   :  { %4411 = vmatpush3.msra.mxu0 %v936_v42 }
 0x3a3   :  { %4412 = vmatprep.subr.mxu0 %v4338_v22 }
 0x3a4   :  { %4413 = vmatpush3.msra.mxu0 %v4338_v22 }
 0x3a5   :  { %4414 = vmatprep.subr.mxu0 %v926_v35 }
 0x3a6   :  { %4415 = vmatpush3.msra.mxu0 %v926_v35 }
 0x3ba   :  { %v4321_v46 = vpop.f32.mrf.mxu1  ;;  %v4359_v47 = vpop.f32.mrf.mxu0 }
 0x3bb   :  { %v759_v49 = vmul.f32 0.25, %v4321_v46  ;;  %v1075_v50 = vmul.f32 0.25, %v4359_v47 }
 0x3bc   :  { %v729_v51 = vpop.f32.mrf.mxu1  ;;  %v1045_v52 = vpop.f32.mrf.mxu0 }
 0x3bd   :  { %v758_v55 = vmul.f32 0.25, %v729_v51  ;;  %v1074_v56 = vmul.f32 0.25, %v1045_v52  ;;  %v5388_v58 = vadd.f32 %v1075_v50, %v183_v48  ;;  %v5390_v59 = vadd.f32 %v759_v49, %v183_v48  ;;  %v187_v48 = vld [vmem:[%s6286_s2 + $0x28] sm:$0xff] }
 0x3be   :  { %v4324_v62 = vpop.f32.mrf.mxu1  ;;  %v4362_v63 = vpop.f32.mrf.mxu0 }
 0x3bf   :  { %v761_v45 = vmul.f32 0.25, %v4324_v62  ;;  %v1077_v44 = vmul.f32 0.25, %v4362_v63  ;;  %v1089_v0 = vsel %vm60_vm0, %v5388_v58, -inf  ;;  %v773_v1 = vsel %vm60_vm0, %v5390_v59, -inf }
 0x3c0   :  { %1090 = vmax.xlane.f32.xlu1 %v1089_v0  ;;  %v1055_v2 = vpop.f32.mrf.mxu0  ;;  %774 = vmax.xlane.f32.xlu0 %v773_v1  ;;  %v739_v54 = vpop.f32.mrf.mxu1  ;;  %v5402_v3 = vadd.f32 %v1074_v56, %v182_v60  ;;  %v5404_v4 = vadd.f32 %v758_v55, %v182_v60 }
 0x3c1   :  { %v1076_v5 = vmul.f32 0.25, %v1055_v2  ;;  %v5406_v15 = vadd.f32 %v1077_v44, %v185_v53  ;;  %v760_v14 = vmul.f32 0.25, %v739_v54  ;;  %v5412_v24 = vadd.f32 %v761_v45, %v185_v53 }
 0x3c2   :  { %v4327_v61 = vpop.f32.mrf.mxu1  ;;  %v4365_v12 = vpop.f32.mrf.mxu0  ;;  %v1086_v20 = vsel %vm60_vm0, %v5402_v3, -inf  ;;  %v770_v21 = vsel %vm60_vm0, %v5404_v4, -inf }
 0x3c3   :  { %v1095_v11 = vsel %vm60_vm0, %v5406_v15, -inf  ;;  %v779_v33 = vsel %vm60_vm0, %v5412_v24, -inf  ;;  %v5421_v6 = vadd.f32 %v1076_v5, %v184_v29  ;;  %v5423_v25 = vadd.f32 %v760_v14, %v184_v29 }
 0x3c4   :  { %1087 = vmax.xlane.f32.xlu1 %v1086_v20  ;;  %771 = vmax.xlane.f32.xlu0 %v770_v21  ;;  %v749_v18 = vpop.f32.mrf.mxu1  ;;  %v1065_v27 = vpop.f32.mrf.mxu0  ;;  %v1079_v35 = vmul.f32 0.25, %v4365_v12  ;;  %v763_v37 = vmul.f32 0.25, %v4327_v61 }
 0x3c5   :  { %v1078_v17 = vmul.f32 0.25, %v1065_v27  ;;  %v762_v7 = vmul.f32 0.25, %v749_v18  ;;  %v1092_v40 = vsel %vm60_vm0, %v5421_v6, -inf  ;;  %v776_v42 = vsel %vm60_vm0, %v5423_v25, -inf }
 0x3c6   :  { %v4376_v30 = vpop.f32.mrf.mxu1  ;;  %v5441_v51 = vadd.f32 %v1079_v35, %v187_v48  ;;  %v5445_v56 = vadd.f32 %v763_v37, %v187_v48 }
 0x3c7   :  { %v5432_v43 = vadd.f32 %v1078_v17, %v186_v8  ;;  %v5434_v47 = vadd.f32 %v762_v7, %v186_v8 }
 0x3c8   :  { %1096 = vmax.xlane.f32.xlu1 %v1095_v11  ;;  %780 = vmax.xlane.f32.xlu0 %v779_v33  ;;  %v1242_v34 = vpop.f32.mrf.mxu1  ;;  %v1101_v60 = vsel %vm60_vm0, %v5441_v51, -inf  ;;  %v785_v62 = vsel %vm60_vm0, %v5445_v56, -inf }
 0x3c9   :  { %v1098_v50 = vsel %vm60_vm0, %v5432_v43, -inf  ;;  %v782_v55 = vsel %vm60_vm0, %v5434_v47, -inf }
 0x3ca   :  { %v4379_v22 = vpop.f32.mrf.mxu1 }
 0x3cc   :  { %1093 = vmax.xlane.f32.xlu1 %v1092_v40  ;;  %777 = vmax.xlane.f32.xlu0 %v776_v42  ;;  %v1252_v46 = vpop.f32.mrf.mxu1 }
 0x3ce   :  { %v4382_v49 = vpop.f32.mrf.mxu1 }
 0x3cf   :  { %4383 = vmatprep.subr.mxu1 %v4382_v49 }
 0x3d0   :  { %1099 = vmax.xlane.f32.xlu1 %v1098_v50  ;;  %v1262_v52 = vpop.f32.mrf.mxu1  ;;  %4384 = vmatpush3.msra.mxu1 %v4382_v49 }
 0x3d1   :  { %783 = vmax.xlane.f32.xlu0 %v782_v55  ;;  %4385 = vmatprep.subr.mxu1 %v1262_v52 }
 0x3d2   :  { %4386 = vmatpush3.msra.mxu1 %v1262_v52 }
 0x3d3   :  { %4387 = vmatprep.subr.mxu1 %v4379_v22 }
 0x3d4   :  { %1102 = vmax.xlane.f32.xlu1 %v1101_v60  ;;  %4388 = vmatpush3.msra.mxu1 %v4379_v22 }
 0x3d5   :  { %786 = vmax.xlane.f32.xlu0 %v785_v62  ;;  %4389 = vmatprep.subr.mxu1 %v1252_v46 }
 0x3d6   :  { %4390 = vmatpush3.msra.mxu1 %v1252_v46 }
 0x3d7   :  { %4391 = vmatprep.subr.mxu1 %v4376_v30 }
 0x3d8   :  { %4392 = vmatpush3.msra.mxu1 %v4376_v30 }
 0x3d9   :  { %4393 = vmatprep.subr.mxu1 %v1242_v34 }
 0x3da   :  { %4394 = vmatpush3.msra.mxu1 %v1242_v34 }
 0x449   :  { %v1091_v63 = vpop.xlane.xlu1 %1090  ;;  %v775_v45 = vpop.xlane.xlu0 %774 }
 0x44a   :  { %v1105_v44 = vsub.f32 %v5388_v58, %v1091_v63  ;;  %v789_v0 = vsub.f32 %v5390_v59, %v775_v45 }
 0x44c   :  { %v1112_v1 = vmul.f32 1.442695, %v1105_v44  ;;  %v796_v53 = vmul.f32 1.442695, %v789_v0 }
 0x44d   :  { %v1088_v2 = vpop.xlane.xlu1 %1087  ;;  %v772_v54 = vpop.xlane.xlu0 %771 }
 0x44e   :  { %4725 = vpow2.f32 %v1112_v1  ;;  %v1104_v5 = vsub.f32 %v5402_v3, %v1088_v2  ;;  %v788_v61 = vsub.f32 %v5404_v4, %v772_v54 }
 0x44f   :  { %4727 = vpow2.f32 %v796_v53 }
 0x450   :  { %v1110_v12 = vmul.f32 1.442695, %v1104_v5  ;;  %v794_v14 = vmul.f32 1.442695, %v788_v61 }
 0x451   :  { %v1097_v20 = vpop.xlane.xlu1 %1096  ;;  %v781_v21 = vpop.xlane.xlu0 %780 }
 0x452   :  { %4729 = vpow2.f32 %v1110_v12  ;;  %v1107_v18 = vsub.f32 %v5406_v15, %v1097_v20  ;;  %v791_v58 = vsub.f32 %v5412_v24, %v781_v21 }
 0x453   :  { %4731 = vpow2.f32 %v794_v14 }
 0x454   :  { %v1116_v59 = vmul.f32 1.442695, %v1107_v18  ;;  %v800_v27 = vmul.f32 1.442695, %v791_v58 }
 0x455   :  { %v1094_v29 = vpop.xlane.xlu1 %1093  ;;  %v778_v30 = vpop.xlane.xlu0 %777 }
 0x456   :  { %4733 = vpow2.f32 %v1116_v59  ;;  %v1106_v3 = vsub.f32 %v5421_v6, %v1094_v29  ;;  %v790_v4 = vsub.f32 %v5423_v25, %v778_v30 }
 0x457   :  { %4735 = vpow2.f32 %v800_v27 }
 0x458   :  { %v1114_v11 = vmul.f32 1.442695, %v1106_v3  ;;  %v798_v17 = vmul.f32 1.442695, %v790_v4 }
 0x459   :  { %v1100_v33 = vpop.xlane.xlu1 %1099 }
 0x45a   :  { %4737 = vpow2.f32 %v1114_v11  ;;  %v1108_v7 = vsub.f32 %v5432_v43, %v1100_v33  ;;  %v784_v15 = vpop.xlane.xlu0 %783 }
 0x45b   :  { %v5460_v34 = vpop.eup %4725  ;;  %4739 = vpow2.f32 %v798_v17  ;;  %v792_v24 = vsub.f32 %v5434_v47, %v784_v15 }
 0x45c   :  { %v5463_v8 = vpop.eup %4727  ;;  %v1118_v22 = vmul.f32 1.442695, %v1108_v7  ;;  %v1125_v6 = vsel %vm60_vm0, %v5460_v34, 0.0 }
 0x45d   :  { %v802_v25 = vmul.f32 1.442695, %v792_v24  ;;  %1126 = vadd.xlane.f32.xlu1 %v1125_v6  ;;  %v1103_v35 = vpop.xlane.xlu1 %1102  ;;  %v809_v40 = vsel %vm60_vm0, %v5463_v8, 0.0 }
 0x45e   :  { %4741 = vpow2.f32 %v1118_v22  ;;  %v1109_v42 = vsub.f32 %v5441_v51, %v1103_v35  ;;  %810 = vadd.xlane.f32.xlu0 %v809_v40  ;;  %v787_v43 = vpop.xlane.xlu0 %786 }
 0x45f   :  { %v4730_v37 = vpop.eup %4729  ;;  %4743 = vpow2.f32 %v802_v25  ;;  %v793_v46 = vsub.f32 %v5445_v56, %v787_v43 }
 0x460   :  { %v4732_v47 = vpop.eup %4731  ;;  %v1120_v48 = vmul.f32 1.442695, %v1109_v42  ;;  %v1122_v49 = vsel %vm60_vm0, %v4730_v37, 0.0 }
 0x461   :  { %v804_v50 = vmul.f32 1.442695, %v793_v46  ;;  %1123 = vadd.xlane.f32.xlu1 %v1122_v49  ;;  %v806_v52 = vsel %vm60_vm0, %v4732_v47, 0.0 }
 0x462   :  { %4745 = vpow2.f32 %v1120_v48  ;;  %807 = vadd.xlane.f32.xlu0 %v806_v52 }
 0x463   :  { %v5473_v55 = vpop.eup %4733  ;;  %4747 = vpow2.f32 %v804_v50 }
 0x464   :  { %v5475_v51 = vpop.eup %4735  ;;  %v1131_v60 = vsel %vm60_vm0, %v5473_v55, 0.0 }
 0x465   :  { %1132 = vadd.xlane.f32.xlu1 %v1131_v60  ;;  %v815_v56 = vsel %vm60_vm0, %v5475_v51, 0.0 }
 0x466   :  { %816 = vadd.xlane.f32.xlu0 %v815_v56 }
 0x467   :  { %v4738_v62 = vpop.eup %4737 }
 0x468   :  { %v4740_v63 = vpop.eup %4739  ;;  %v1128_v45 = vsel %vm60_vm0, %v4738_v62, 0.0 }
 0x469   :  { %1129 = vadd.xlane.f32.xlu1 %v1128_v45  ;;  %v812_v44 = vsel %vm60_vm0, %v4740_v63, 0.0 }
 0x46a   :  { %813 = vadd.xlane.f32.xlu0 %v812_v44 }
 0x46b   :  { %v4742_v0 = vpop.eup %4741 }
 0x46c   :  { %v4744_v1 = vpop.eup %4743  ;;  %v1134_v53 = vsel %vm60_vm0, %v4742_v0, 0.0 }
 0x46d   :  { %1135 = vadd.xlane.f32.xlu1 %v1134_v53  ;;  %v818_v2 = vsel %vm60_vm0, %v4744_v1, 0.0 }
 0x46e   :  { %819 = vadd.xlane.f32.xlu0 %v818_v2 }
 0x46f   :  { %v4746_v54 = vpop.eup %4745 }
 0x470   :  { %v4748_v5 = vpop.eup %4747  ;;  %v1137_v61 = vsel %vm60_vm0, %v4746_v54, 0.0 }
 0x471   :  { %1138 = vadd.xlane.f32.xlu1 %v1137_v61  ;;  %v821_v12 = vsel %vm60_vm0, %v4748_v5, 0.0 }
 0x472   :  { %822 = vadd.xlane.f32.xlu0 %v821_v12 }
 0x4e6   :  { %v1127_v14 = vpop.xlane.xlu1 %1126 }
 0x4e7   :  { %v811_v20 = vpop.xlane.xlu0 %810  ;;  %4749 = vrcp.f32 %v1127_v14 }
 0x4e8   :  { %4751 = vrcp.f32 %v811_v20 }
 0x4ea   :  { %v1124_v21 = vpop.xlane.xlu1 %1123 }
 0x4eb   :  { %4753 = vrcp.f32 %v1124_v21  ;;  %v808_v18 = vpop.xlane.xlu0 %807 }
 0x4ec   :  { %4755 = vrcp.f32 %v808_v18 }
 0x4ee   :  { %v1133_v58 = vpop.xlane.xlu1 %1132 }
 0x4ef   :  { %v817_v59 = vpop.xlane.xlu0 %816  ;;  %4757 = vrcp.f32 %v1133_v58 }
 0x4f0   :  { %4759 = vrcp.f32 %v817_v59 }
 0x4f2   :  { %v1130_v27 = vpop.xlane.xlu1 %1129 }
 0x4f3   :  { %4761 = vrcp.f32 %v1130_v27  ;;  %v814_v29 = vpop.xlane.xlu0 %813 }
 0x4f4   :  { %4763 = vrcp.f32 %v814_v29  ;;  %v4750_v30 = vpop.eup %4749 }
 0x4f5   :  { %v4752_v4 = vpop.eup %4751  ;;  %v1147_v15 = vmul.f32 %v4750_v30, %v5460_v34 }
 0x4f6   :  { %v1136_v3 = vpop.xlane.xlu1 %1135  ;;  %v831_v6 = vmul.f32 %v4752_v4, %v5463_v8 }
 0x4f7   :  { %4765 = vrcp.f32 %v1136_v3  ;;  %v820_v11 = vpop.xlane.xlu0 %819 }
 0x4f8   :  { %v4754_v17 = vpop.eup %4753  ;;  %4767 = vrcp.f32 %v820_v11 }
 0x4f9   :  { %v4756_v33 = vpop.eup %4755  ;;  %v1146_v7 = vmul.f32 %v4754_v17, %v4730_v37 }
 0x4fa   :  { %v1139_v24 = vpop.xlane.xlu1 %1138  ;;  %v830_v22 = vmul.f32 %v4756_v33, %v4732_v47 }
 0x4fb   :  { %4769 = vrcp.f32 %v1139_v24  ;;  %v823_v25 = vpop.xlane.xlu0 %822  ;;  %4395 = vmatprep.mubr.msk.f32.mxu1 %vm60_vm0, %v1146_v7 }
 0x4fc   :  { %4771 = vrcp.f32 %v823_v25  ;;  %4416 = vmatprep.mubr.msk.f32.mxu0 %vm60_vm0, %v830_v22  ;;  %4396 = vmatmul.mubr.msk.f32.vlgmr.msra.gmra.mxu1 %vm60_vm0, %v1147_v15  ;;  %v4758_v35 = vpop.eup %4757 }
 0x4fd   :  { %4417 = vmatmul.mubr.msk.f32.vlgmr.msra.gmra.mxu0 %vm60_vm0, %v831_v6  ;;  %v4760_v40 = vpop.eup %4759  ;;  %v1149_v46 = vmul.f32 %v4758_v35, %v5473_v55 }
 0x4fe   :  { %v833_v8 = vmul.f32 %v4760_v40, %v5475_v51  ;;  %v1505_v51 = vsub.s32 5, %v5145_v28 }
 0x500   :  { %v4762_v42 = vpop.eup %4761  ;;  %v1506_v44 = vrot.slane %v5151_v39, %v1505_v51 }
 0x501   :  { %v4764_v43 = vpop.eup %4763  ;;  %v1148_v34 = vmul.f32 %v4762_v42, %v4738_v62 }
 0x502   :  { %v832_v37 = vmul.f32 %v4764_v43, %v4740_v63 }
 0x503   :  { %4398 = vmatprep.mubr.msk.f32.mxu1 %vm60_vm0, %v1148_v34 }
 0x504   :  { %v4766_v47 = vpop.eup %4765  ;;  %4419 = vmatprep.mubr.msk.f32.mxu0 %vm60_vm0, %v832_v37  ;;  %4399 = vmatmul.mubr.msk.f32.gmra.mxu1 %vm60_vm0, %v1149_v46 }
 0x505   :  { %v4768_v48 = vpop.eup %4767  ;;  %4420 = vmatmul.mubr.msk.f32.gmra.mxu0 %vm60_vm0, %v833_v8  ;;  %v1150_v49 = vmul.f32 %v4766_v47, %v4742_v0 }
 0x506   :  { %v834_v50 = vmul.f32 %v4768_v48, %v4744_v1 }
 0x507   :  { %4401 = vmatprep.mubr.msk.f32.mxu1 %vm60_vm0, %v1150_v49 }
 0x508   :  { %v4770_v52 = vpop.eup %4769  ;;  %4422 = vmatprep.mubr.msk.f32.mxu0 %vm60_vm0, %v834_v50 }
 0x509   :  { %v4772_v55 = vpop.eup %4771  ;;  %v1151_v60 = vmul.f32 %v4770_v52, %v4746_v54 }
 0x50a   :  { %v835_v56 = vmul.f32 %v4772_v55, %v4748_v5 }
 0x50b   :  { %4402 = vmatmul.mubr.msk.f32.gmra.mxu1 %vm60_vm0, %v1151_v60 }
 0x50c   :  { %4423 = vmatmul.mubr.msk.f32.gmra.mxu0 %vm60_vm0, %v835_v56 }
 0x5bc   :  { %v4397_v62 = vpop.f32.mrf.mxu1 }
 0x5bd   :  { %v4418_v63 = vpop.f32.mrf.mxu0 }
 0x5be   :  { %v1474_v45 = vadd.f32 %v4418_v63, %v4397_v62  ;;  %v1355_v0 = vpop.f32.mrf.mxu1 }
 0x5bf   :  { %v1468_v1 = vpop.f32.mrf.mxu0 }
 0x5c0   :  { %v1498_v53 = vadd.f32 %v1474_v45, %v5044_v19  ;;  %v1469_v2 = vadd.f32 %v1468_v1, %v1355_v0 }
 0x5c2   :  { %v5508_v54 = vadd.f32 %v1506_v44, %v1498_v53  ;;  %v1497_v5 = vadd.f32 %v1469_v2, %v5039_v16 }
 0x5c4   :  { %v5511_v61 = vadd.f32 %v1506_v44, %v1497_v5  ;;  %v4400_v12 = vpop.f32.mrf.mxu1  ;;  %v1516_v14 = vsel %vm206_vm1, %v5508_v54, 0.0 }
 0x5c5   :  { %1517 = vadd.xlane.f32.xlu1 %v1516_v14  ;;  %v4421_v20 = vpop.f32.mrf.mxu0 }
 0x5c6   :  { %v1484_v21 = vadd.f32 %v4421_v20, %v4400_v12  ;;  %v1365_v18 = vpop.f32.mrf.mxu1  ;;  %v1513_v39 = vsel %vm206_vm1, %v5511_v61, 0.0 }
 0x5c7   :  { %1514 = vadd.xlane.f32.xlu0 %v1513_v39  ;;  %v1478_v19 = vpop.f32.mrf.mxu0  ;;  %v1612_v39 = vld [vmem:[%s6291_s7 + $0x8] sm:$0xff] }
 0x5c8   :  { %v1500_v58 = vadd.f32 %v1484_v21, %v5056_v26  ;;  %v1479_v59 = vadd.f32 %v1478_v19, %v1365_v18  ;;  %v1614_v21 = vld [vmem:[%s6291_s7 + $0x18] sm:$0xff]  ;;  %v1613_v18 = vld [vmem:[%s6291_s7 + $0x10] sm:$0xff]  ;;  %v1611_v19 = vld [vmem:[%s6291_s7] sm:$0xff] }
 0x5c9   :  { %4425 = vmatprep.subr.mxu1 %v1614_v21 }
 0x5ca   :  { %v5518_v27 = vadd.f32 %v1506_v44, %v1500_v58  ;;  %v1499_v16 = vadd.f32 %v1479_v59, %v5051_v23  ;;  %4426 = vmatpush3.msra.mxu1 %v1614_v21 }
 0x5cb   :  { %v4403_v29 = vpop.f32.mrf.mxu1  ;;  %4427 = vmatprep.subr.mxu1 %v1613_v18 }
 0x5cc   :  { %v5521_v30 = vadd.f32 %v1506_v44, %v1499_v16  ;;  %v4424_v3 = vpop.f32.mrf.mxu0  ;;  %v1522_v4 = vsel %vm206_vm1, %v5518_v27, 0.0  ;;  %4428 = vmatpush3.msra.mxu1 %v1613_v18 }
 0x5cd   :  { %v1494_v11 = vadd.f32 %v4424_v3, %v4403_v29  ;;  %1523 = vadd.xlane.f32.xlu1 %v1522_v4  ;;  %v1375_v17 = vpop.f32.mrf.mxu1  ;;  %4429 = vmatprep.subr.mxu1 %v1612_v39 }
 0x5ce   :  { %v1488_v33 = vpop.f32.mrf.mxu0  ;;  %v1519_v7 = vsel %vm206_vm1, %v5521_v30, 0.0  ;;  %4430 = vmatpush3.msra.mxu1 %v1612_v39 }
 0x5cf   :  { %v1502_v26 = vadd.f32 %v1494_v11, %v5067_v32  ;;  %v1489_v15 = vadd.f32 %v1488_v33, %v1375_v17  ;;  %1520 = vadd.xlane.f32.xlu0 %v1519_v7  ;;  %4431 = vmatprep.subr.mxu1 %v1611_v19 }
 0x5d0   :  { %4432 = vmatpush3.msra.mxu1 %v1611_v19 }
 0x5d1   :  { %v5528_v24 = vadd.f32 %v1506_v44, %v1502_v26  ;;  %v1501_v23 = vadd.f32 %v1489_v15, %v5065_v31 }
 0x5d3   :  { %v5531_v22 = vadd.f32 %v1506_v44, %v1501_v23  ;;  %v1528_v6 = vsel %vm206_vm1, %v5528_v24, 0.0  ;;  %v1593_v23 = vsub.s32 6, %v5145_v28 }
 0x5d4   :  { %1529 = vadd.xlane.f32.xlu1 %v1528_v6 }
 0x5d5   :  { %v1525_v25 = vsel %vm206_vm1, %v5531_v22, 0.0 }
 0x5d6   :  { %1526 = vadd.xlane.f32.xlu0 %v1525_v25 }
 0x64e   :  { %v1518_v35 = vpop.xlane.xlu1 %1517 }
 0x64f   :  { %v1532_v40 = vmul.f32 0.03125, %v1518_v35 }
 0x650   :  { %v1515_v42 = vpop.xlane.xlu0 %1514 }
 0x651   :  { %v5538_v32 = vsub.f32 %v5508_v54, %v1532_v40  ;;  %v1531_v43 = vmul.f32 0.03125, %v1515_v42  ;;  %v4893_v42 = vld [vmem:[%s6288_s4] sm:$0xff] }
 0x653   :  { %v5541_v34 = vsub.f32 %v5511_v61, %v1531_v43  ;;  %v1544_v31 = vmul.f32 %v5538_v32, %v5538_v32  ;;  %v1594_v43 = vrot.slane %v4893_v42, %v1593_v23 }
 0x655   :  { %v1552_v37 = vsel %vm206_vm1, %v1544_v31, 0.0  ;;  %v1543_v46 = vmul.f32 %v5541_v34, %v5541_v34 }
 0x656   :  { %v1524_v8 = vpop.xlane.xlu1 %1523  ;;  %1553 = vadd.xlane.f32.xlu1 %v1552_v37 }
 0x657   :  { %v1534_v47 = vmul.f32 0.03125, %v1524_v8  ;;  %v1549_v48 = vsel %vm206_vm1, %v1543_v46, 0.0  ;;  %v1603_v46 = vsub.s32 7, %v5145_v28 }
 0x658   :  { %1550 = vadd.xlane.f32.xlu0 %v1549_v48  ;;  %v1521_v49 = vpop.xlane.xlu0 %1520 }
 0x659   :  { %v5550_v50 = vsub.f32 %v5518_v27, %v1534_v47  ;;  %v1533_v52 = vmul.f32 0.03125, %v1521_v49 }
 0x65b   :  { %v5553_v55 = vsub.f32 %v5521_v30, %v1533_v52  ;;  %v1546_v60 = vmul.f32 %v5550_v50, %v5550_v50 }
 0x65d   :  { %v1530_v56 = vpop.xlane.xlu1 %1529  ;;  %v1558_v62 = vsel %vm206_vm1, %v1546_v60, 0.0  ;;  %v1545_v63 = vmul.f32 %v5553_v55, %v5553_v55  ;;  %v1604_v60 = vrot.slane %v4893_v42, %v1603_v46 }
 0x65e   :  { %v1536_v45 = vmul.f32 0.03125, %v1530_v56  ;;  %1559 = vadd.xlane.f32.xlu1 %v1558_v62 }
 0x65f   :  { %v1527_v44 = vpop.xlane.xlu0 %1526  ;;  %v1555_v0 = vsel %vm206_vm1, %v1545_v63, 0.0 }
 0x660   :  { %v5562_v1 = vsub.f32 %v5528_v24, %v1536_v45  ;;  %v1535_v53 = vmul.f32 0.03125, %v1527_v44  ;;  %1556 = vadd.xlane.f32.xlu0 %v1555_v0 }
 0x662   :  { %v5565_v2 = vsub.f32 %v5531_v22, %v1535_v53  ;;  %v1548_v5 = vmul.f32 %v5562_v1, %v5562_v1 }
 0x664   :  { %v1564_v12 = vsel %vm206_vm1, %v1548_v5, 0.0  ;;  %v1547_v14 = vmul.f32 %v5565_v2, %v5565_v2 }
 0x665   :  { %1565 = vadd.xlane.f32.xlu1 %v1564_v12 }
 0x666   :  { %v1561_v20 = vsel %vm206_vm1, %v1547_v14, 0.0 }
 0x667   :  { %1562 = vadd.xlane.f32.xlu0 %v1561_v20 }
 0x6df   :  { %v1554_v58 = vpop.xlane.xlu1 %1553 }
 0x6e0   :  { %v1568_v59 = vmul.f32 0.03125, %v1554_v58 }
 0x6e1   :  { %v1551_v16 = vpop.xlane.xlu0 %1550 }
 0x6e2   :  { %v1574_v29 = vadd.f32 1e-06, %v1568_v59  ;;  %v1567_v3 = vmul.f32 0.03125, %v1551_v16  ;;  %v1801_v59 = vld [vmem:[%s6293_s9 + $0x60] sm:$0xff]  ;;  %v1800_v16 = vld [vmem:[%s6293_s9 + $0x58] sm:$0xff] }
 0x6e4   :  { %4773 = vrsqrt.f32 %v1574_v29  ;;  %v1573_v4 = vadd.f32 1e-06, %v1567_v3  ;;  %v1799_v29 = vld [vmem:[%s6293_s9 + $0x50] sm:$0xff]  ;;  %v1798_v3 = vld [vmem:[%s6293_s9 + $0x48] sm:$0xff] }
 0x6e6   :  { %4775 = vrsqrt.f32 %v1573_v4  ;;  %v1797_v4 = vld [vmem:[%s6293_s9 + $0x40] sm:$0xff] }
 0x6e7   :  { %v1560_v11 = vpop.xlane.xlu1 %1559 }
 0x6e8   :  { %v1570_v17 = vmul.f32 0.03125, %v1560_v11  ;;  %v1796_v11 = vld [vmem:[%s6293_s9 + $0x38] sm:$0xff] }
 0x6e9   :  { %v1557_v33 = vpop.xlane.xlu0 %1556 }
 0x6ea   :  { %v1576_v7 = vadd.f32 1e-06, %v1570_v17  ;;  %v1569_v26 = vmul.f32 0.03125, %v1557_v33  ;;  %v1795_v17 = vld [vmem:[%s6293_s9 + $0x30] sm:$0xff]  ;;  %v1794_v33 = vld [vmem:[%s6293_s9 + $0x28] sm:$0xff] }
 0x6ec   :  { %4777 = vrsqrt.f32 %v1576_v7  ;;  %v1575_v15 = vadd.f32 1e-06, %v1569_v26  ;;  %v1793_v7 = vld [vmem:[%s6293_s9 + $0x20] sm:$0xff]  ;;  %v1792_v26 = vld [vmem:[%s6293_s9 + $0x18] sm:$0xff] }
 0x6ee   :  { %4779 = vrsqrt.f32 %v1575_v15  ;;  %v1566_v6 = vpop.xlane.xlu1 %1565  ;;  %v1791_v15 = vld [vmem:[%s6293_s9 + $0x10] sm:$0xff] }
 0x6ef   :  { %v1572_v25 = vmul.f32 0.03125, %v1566_v6  ;;  %v1790_v6 = vld [vmem:[%s6293_s9 + $0x8] sm:$0xff] }
 0x6f0   :  { %v1563_v35 = vpop.xlane.xlu0 %1562 }
 0x6f1   :  { %v4774_v40 = vpop.eup %4773  ;;  %v1578_v31 = vadd.f32 1e-06, %v1572_v25  ;;  %v1571_v37 = vmul.f32 0.03125, %v1563_v35  ;;  %v1789_v25 = vld [vmem:[%s6293_s9] sm:$0xff] }
 0x6f2   :  { %v1586_v8 = vmul.f32 %v4774_v40, %v5538_v32  ;;  %v3840_v35 = vld [vmem:[%s6292_s8] ss:$0 sm:$0xff] }
 0x6f3   :  { %v4776_v47 = vpop.eup %4775  ;;  %4781 = vrsqrt.f32 %v1578_v31  ;;  %v1577_v48 = vadd.f32 1e-06, %v1571_v37 }
 0x6f4   :  { %v1585_v49 = vmul.f32 %v4776_v47, %v5541_v34  ;;  %v1596_v52 = vmul.f32 %v1594_v43, %v1586_v8 }
 0x6f5   :  { %4783 = vrsqrt.f32 %v1577_v48 }
 0x6f6   :  { %v1595_v56 = vmul.f32 %v1594_v43, %v1585_v49  ;;  %v1606_v45 = vadd.f32 %v1604_v60, %v1596_v52 }
 0x6f8   :  { %v1605_v62 = vadd.f32 %v1604_v60, %v1595_v56 }
 0x6f9   :  { %v4778_v63 = vpop.eup %4777 }
 0x6fa   :  { %4433 = vmatprep.mubr.msk.f32.mxu1 %vm206_vm1, %v1605_v62  ;;  %v1588_v44 = vmul.f32 %v4778_v63, %v5550_v50 }
 0x6fb   :  { %v4780_v0 = vpop.eup %4779  ;;  %4434 = vmatmul.mubr.msk.f32.vlgmr.msra.gmra.mxu1 %vm206_vm1, %v1606_v45 }
 0x6fc   :  { %v1587_v32 = vmul.f32 %v4780_v0, %v5553_v55  ;;  %v1598_v53 = vmul.f32 %v1594_v43, %v1588_v44  ;;  %v1804_v55 = vld [vmem:[%s6293_s9 + $0x78] sm:$0xff] }
 0x6fd   :  { %4442 = vmatprep.subr.mxu0 %v1804_v55 }
 0x6fe   :  { %v1597_v34 = vmul.f32 %v1594_v43, %v1587_v32  ;;  %v1608_v14 = vadd.f32 %v1604_v60, %v1598_v53  ;;  %4443 = vmatpush3.msra.mxu0 %v1804_v55 }
 0x700   :  { %v4782_v5 = vpop.eup %4781  ;;  %v1607_v12 = vadd.f32 %v1604_v60, %v1597_v34 }
 0x701   :  { %v1590_v20 = vmul.f32 %v4782_v5, %v5562_v1  ;;  %v1803_v1 = vld [vmem:[%s6293_s9 + $0x70] sm:$0xff] }
 0x702   :  { %v4784_v21 = vpop.eup %4783  ;;  %4436 = vmatprep.mubr.msk.f32.mxu1 %vm206_vm1, %v1607_v12  ;;  %4444 = vmatprep.subr.mxu0 %v1803_v1 }
 0x703   :  { %4437 = vmatmul.mubr.msk.f32.gmra.mxu1 %vm206_vm1, %v1608_v14  ;;  %v1589_v18 = vmul.f32 %v4784_v21, %v5565_v2  ;;  %v1600_v50 = vmul.f32 %v1594_v43, %v1590_v20  ;;  %4445 = vmatpush3.msra.mxu0 %v1803_v1  ;;  %v1802_v2 = vld [vmem:[%s6293_s9 + $0x68] sm:$0xff] }
 0x704   :  { %4446 = vmatprep.subr.mxu0 %v1802_v2 }
 0x705   :  { %v1599_v39 = vmul.f32 %v1594_v43, %v1589_v18  ;;  %v1610_v58 = vadd.f32 %v1604_v60, %v1600_v50  ;;  %4447 = vmatpush3.msra.mxu0 %v1802_v2 }
 0x706   :  { %4448 = vmatprep.subr.mxu0 %v1801_v59 }
 0x707   :  { %v1609_v19 = vadd.f32 %v1604_v60, %v1599_v39  ;;  %4449 = vmatpush3.msra.mxu0 %v1801_v59 }
 0x708   :  { %4450 = vmatprep.subr.mxu0 %v1800_v16 }
 0x709   :  { %4439 = vmatprep.mubr.msk.f32.mxu1 %vm206_vm1, %v1609_v19  ;;  %4451 = vmatpush3.msra.mxu0 %v1800_v16 }
 0x70a   :  { %4440 = vmatmul.mubr.msk.f32.gmra.mxu1 %vm206_vm1, %v1610_v58  ;;  %4452 = vmatprep.subr.mxu0 %v1799_v29 }
 0x70b   :  { %4453 = vmatpush3.msra.mxu0 %v1799_v29 }
 0x70c   :  { %4454 = vmatprep.subr.mxu0 %v1798_v3 }
 0x70d   :  { %4455 = vmatpush3.msra.mxu0 %v1798_v3 }
 0x70e   :  { %4456 = vmatprep.subr.mxu0 %v1797_v4 }
 0x70f   :  { %4457 = vmatpush3.msra.mxu0 %v1797_v4 }
 0x710   :  { %4458 = vmatprep.subr.mxu0 %v1796_v11 }
 0x711   :  { %4459 = vmatpush3.msra.mxu0 %v1796_v11 }
 0x712   :  { %4460 = vmatprep.subr.mxu0 %v1795_v17 }
 0x713   :  { %4461 = vmatpush3.msra.mxu0 %v1795_v17 }
 0x714   :  { %4462 = vmatprep.subr.mxu0 %v1794_v33 }
 0x715   :  { %4463 = vmatpush3.msra.mxu0 %v1794_v33 }
 0x716   :  { %4464 = vmatprep.subr.mxu0 %v1793_v7 }
 0x717   :  { %4465 = vmatpush3.msra.mxu0 %v1793_v7 }
 0x718   :  { %4466 = vmatprep.subr.mxu0 %v1792_v26 }
 0x719   :  { %4467 = vmatpush3.msra.mxu0 %v1792_v26 }
 0x71a   :  { %4468 = vmatprep.subr.mxu0 %v1791_v15 }
 0x71b   :  { %4469 = vmatpush3.msra.mxu0 %v1791_v15 }
 0x71c   :  { %4470 = vmatprep.subr.mxu0 %v1790_v6 }
 0x71d   :  { %4471 = vmatpush3.msra.mxu0 %v1790_v6 }
 0x71e   :  { %4472 = vmatprep.subr.mxu0 %v1789_v25 }
 0x71f   :  { %4473 = vmatpush3.msra.mxu0 %v1789_v25 }
 0x7bb   :  { %v4435_v40 = vpop.f32.mrf.mxu1 }
 0x7bc   :  { %v1712_v42 = vadd.f32 %v4435_v40, %v3840_v35 }
 0x7bd   :  { %v1706_v43 = vpop.f32.mrf.mxu1 }
 0x7be   :  { %v1736_v31 = vmul.f32 %v1712_v42, %v1712_v42  ;;  %v1707_v37 = vadd.f32 %v3840_v35, %v1706_v43 }
 0x7c0   :  { %v1742_v8 = vmul.f32 %v1736_v31, %v1712_v42  ;;  %v1735_v47 = vmul.f32 %v1707_v37, %v1707_v37 }
 0x7c2   :  { %v1748_v48 = vmul.f32 0.044715, %v1742_v8  ;;  %v1741_v49 = vmul.f32 %v1735_v47, %v1707_v37 }
 0x7c3   :  { %v4438_v52 = vpop.f32.mrf.mxu1 }
 0x7c4   :  { %v1754_v60 = vadd.f32 %v1748_v48, %v1712_v42  ;;  %v1747_v56 = vmul.f32 0.044715, %v1741_v49  ;;  %v1722_v62 = vadd.f32 %v4438_v52, %v3840_v35 }
 0x7c5   :  { %v1716_v63 = vpop.f32.mrf.mxu1 }
 0x7c6   :  { %v1760_v45 = vmul.f32 0.7978846, %v1754_v60  ;;  %v1753_v44 = vadd.f32 %v1747_v56, %v1707_v37  ;;  %v1738_v0 = vmul.f32 %v1722_v62, %v1722_v62  ;;  %v1717_v32 = vadd.f32 %v3840_v35, %v1716_v63 }
 0x7c8   :  { %4785 = vtanh.f32 %v1760_v45  ;;  %v1759_v53 = vmul.f32 0.7978846, %v1753_v44  ;;  %v1744_v34 = vmul.f32 %v1738_v0, %v1722_v62  ;;  %v1737_v5 = vmul.f32 %v1717_v32, %v1717_v32 }
 0x7ca   :  { %4787 = vtanh.f32 %v1759_v53  ;;  %v1750_v12 = vmul.f32 0.044715, %v1744_v34  ;;  %v1743_v14 = vmul.f32 %v1737_v5, %v1717_v32  ;;  %v4441_v20 = vpop.f32.mrf.mxu1 }
 0x7cb   :  { %v1732_v21 = vadd.f32 %v4441_v20, %v3840_v35 }
 0x7cc   :  { %v1756_v18 = vadd.f32 %v1750_v12, %v1722_v62  ;;  %v1749_v50 = vmul.f32 0.044715, %v1743_v14  ;;  %v1726_v39 = vpop.f32.mrf.mxu1 }
 0x7cd   :  { %v1740_v19 = vmul.f32 %v1732_v21, %v1732_v21  ;;  %v1727_v58 = vadd.f32 %v3840_v35, %v1726_v39 }
 0x7ce   :  { %v1762_v55 = vmul.f32 0.7978846, %v1756_v18  ;;  %v1755_v1 = vadd.f32 %v1749_v50, %v1717_v32 }
 0x7cf   :  { %v1746_v2 = vmul.f32 %v1740_v19, %v1732_v21  ;;  %v1739_v59 = vmul.f32 %v1727_v58, %v1727_v58 }
 0x7d0   :  { %4789 = vtanh.f32 %v1762_v55  ;;  %v1761_v16 = vmul.f32 0.7978846, %v1755_v1 }
 0x7d1   :  { %v1752_v29 = vmul.f32 0.044715, %v1746_v2  ;;  %v1745_v3 = vmul.f32 %v1739_v59, %v1727_v58 }
 0x7d2   :  { %4791 = vtanh.f32 %v1761_v16 }
 0x7d3   :  { %v1758_v4 = vadd.f32 %v1752_v29, %v1732_v21  ;;  %v1751_v11 = vmul.f32 0.044715, %v1745_v3 }
 0x7d5   :  { %v4786_v17 = vpop.eup %4785  ;;  %v1764_v33 = vmul.f32 0.7978846, %v1758_v4  ;;  %v1757_v7 = vadd.f32 %v1751_v11, %v1727_v58 }
 0x7d6   :  { %v1772_v26 = vadd.f32 1.0, %v4786_v17 }
 0x7d7   :  { %v4788_v15 = vpop.eup %4787  ;;  %4793 = vtanh.f32 %v1764_v33  ;;  %v1763_v6 = vmul.f32 0.7978846, %v1757_v7 }
 0x7d8   :  { %v1771_v25 = vadd.f32 1.0, %v4788_v15  ;;  %v1778_v35 = vmul.f32 0.5, %v1772_v26 }
 0x7d9   :  { %4795 = vtanh.f32 %v1763_v6 }
 0x7da   :  { %v1777_v40 = vmul.f32 0.5, %v1771_v25  ;;  %v1784_v8 = vmul.f32 %v1778_v35, %v1712_v42  ;;  %v3847_v42 = vld [vmem:[%s6288_s4 + $0x8] ss:$0 sm:$0xff] }
 0x7dc   :  { %v1783_v43 = vmul.f32 %v1777_v40, %v1707_v37 }
 0x7dd   :  { %v4790_v31 = vpop.eup %4789 }
 0x7de   :  { %4474 = vmatprep.mubr.f32.mxu0 %v1783_v43  ;;  %v1774_v47 = vadd.f32 1.0, %v4790_v31 }
 0x7df   :  { %v4792_v48 = vpop.eup %4791  ;;  %4475 = vmatmul.mubr.f32.vlgmr.msra.gmra.mxu0 %v1784_v8 }
 0x7e0   :  { %v1773_v49 = vadd.f32 1.0, %v4792_v48  ;;  %v1780_v52 = vmul.f32 0.5, %v1774_v47 }
 0x7e2   :  { %v1779_v60 = vmul.f32 0.5, %v1773_v49  ;;  %v1786_v45 = vmul.f32 %v1780_v52, %v1722_v62 }
 0x7e4   :  { %v4794_v56 = vpop.eup %4793  ;;  %v1785_v63 = vmul.f32 %v1779_v60, %v1717_v32 }
 0x7e5   :  { %v1776_v44 = vadd.f32 1.0, %v4794_v56 }
 0x7e6   :  { %v4796_v0 = vpop.eup %4795  ;;  %4477 = vmatprep.mubr.f32.mxu0 %v1785_v63 }
 0x7e7   :  { %4478 = vmatmul.mubr.f32.gmra.mxu0 %v1786_v45  ;;  %v1775_v53 = vadd.f32 1.0, %v4796_v0  ;;  %v1782_v34 = vmul.f32 0.5, %v1776_v44 }
 0x7e9   :  { %v1781_v5 = vmul.f32 0.5, %v1775_v53  ;;  %v1788_v12 = vmul.f32 %v1782_v34, %v1732_v21 }
 0x7eb   :  { %v1787_v37 = vmul.f32 %v1781_v5, %v1727_v58 }
 0x7ed   :  { %4480 = vmatprep.mubr.f32.mxu0 %v1787_v37 }
 0x7ee   :  { %4481 = vmatmul.mubr.f32.gmra.mxu0 %v1788_v12 }
 0x89f   :  { %v4476_v14 = vpop.f32.mrf.mxu0 }
 0x8a0   :  { %v1881_v20 = vadd.f32 %v4476_v14, %v3847_v42 }
 0x8a1   :  { %v1875_v18 = vpop.f32.mrf.mxu0 }
 0x8a2   :  { %v5661_v62 = vadd.f32 %v1881_v20, %v5508_v54  ;;  %v1876_v32 = vadd.f32 %v3847_v42, %v1875_v18  ;;  %v3853_v20 = vld [vmem:[%s6289_s5 + $0x78] sm:$0xff] }
 0x8a3   :  { %v3861_v18 = vld [vmem:[%s6289_s5 + $0xb8] sm:$0xff]  ;;  %4483 = vmatprep.subr.mxu1 %v3853_v20 }
 0x8a4   :  { %v5664_v50 = vadd.f32 %v1876_v32, %v5511_v61  ;;  %v1934_v39 = vsel %vm206_vm1, %v5661_v62, 0.0  ;;  %4517 = vmatprep.subr.mxu0 %v3861_v18  ;;  %4484 = vmatpush3.msra.mxu1 %v3853_v20  ;;  %v3852_v32 = vld [vmem:[%s6289_s5 + $0x70] sm:$0xff] }
 0x8a5   :  { %1935 = vadd.xlane.f32.xlu1 %v1934_v39  ;;  %4518 = vmatpush3.msra.mxu0 %v3861_v18  ;;  %v3860_v39 = vld [vmem:[%s6289_s5 + $0xb0] sm:$0xff]  ;;  %v3854_v18 = vld [vmem:[%s6289_s5 + $0x80] sm:$0xff] }
 0x8a6   :  { %v1931_v21 = vsel %vm206_vm1, %v5664_v50, 0.0  ;;  %4485 = vmatprep.subr.mxu1 %v3852_v32  ;;  %4519 = vmatprep.subr.mxu0 %v3860_v39 }
 0x8a7   :  { %1932 = vadd.xlane.f32.xlu0 %v1931_v21  ;;  %v4479_v19 = vpop.f32.mrf.mxu0  ;;  %v3851_v21 = vld [vmem:[%s6289_s5 + $0x68] sm:$0xff]  ;;  %4486 = vmatpush3.msra.mxu1 %v3852_v32 }
 0x8a8   :  { %v1891_v58 = vadd.f32 %v4479_v19, %v3847_v42  ;;  %v3859_v19 = vld [vmem:[%s6289_s5 + $0xa8] sm:$0xff]  ;;  %4520 = vmatpush3.msra.mxu0 %v3860_v39  ;;  %4487 = vmatprep.subr.mxu1 %v3851_v21 }
 0x8a9   :  { %v1885_v55 = vpop.f32.mrf.mxu0  ;;  %4521 = vmatprep.subr.mxu0 %v3859_v19  ;;  %4488 = vmatpush3.msra.mxu1 %v3851_v21 }
 0x8aa   :  { %v5671_v1 = vadd.f32 %v1891_v58, %v5518_v27  ;;  %v1886_v54 = vadd.f32 %v3847_v42, %v1885_v55  ;;  %v3850_v58 = vld [vmem:[%s6289_s5 + $0x60] sm:$0xff]  ;;  %4522 = vmatpush3.msra.mxu0 %v3859_v19 }
 0x8ab   :  { %v3858_v55 = vld [vmem:[%s6289_s5 + $0xa0] sm:$0xff]  ;;  %4489 = vmatprep.subr.mxu1 %v3850_v58 }
 0x8ac   :  { %v5674_v2 = vadd.f32 %v1886_v54, %v5521_v30  ;;  %v1940_v61 = vsel %vm206_vm1, %v5671_v1, 0.0  ;;  %4523 = vmatprep.subr.mxu0 %v3858_v55  ;;  %4490 = vmatpush3.msra.mxu1 %v3850_v58  ;;  %v3857_v54 = vld [vmem:[%s6289_s5 + $0x98] sm:$0xff] }
 0x8ad   :  { %1941 = vadd.xlane.f32.xlu1 %v1940_v61  ;;  %4524 = vmatpush3.msra.mxu0 %v3858_v55  ;;  %v5756_v61 = vld [vmem:[%s6290_s6 + $0x38] sm:$0xff] }
 0x8ae   :  { %v4482_v59 = vpop.f32.mrf.mxu0  ;;  %v1937_v16 = vsel %vm206_vm1, %v5674_v2, 0.0  ;;  %4500 = vmatprep.subr.mxu1 %v3857_v54  ;;  %4555 = vmatprep.subr.mxu0 %v5756_v61 }
 0x8af   :  { %v1901_v29 = vadd.f32 %v4482_v59, %v3847_v42  ;;  %1938 = vadd.xlane.f32.xlu0 %v1937_v16 }
 0x8b0   :  { %v1895_v3 = vpop.f32.mrf.mxu0 }
 0x8b1   :  { %v5681_v4 = vadd.f32 %v1901_v29, %v5528_v24  ;;  %v1896_v27 = vadd.f32 %v3847_v42, %v1895_v3 }
 0x8b3   :  { %v5684_v11 = vadd.f32 %v1896_v27, %v5531_v22  ;;  %v1946_v30 = vsel %vm206_vm1, %v5681_v4, 0.0 }
 0x8b4   :  { %1947 = vadd.xlane.f32.xlu1 %v1946_v30 }
 0x8b5   :  { %v1943_v17 = vsel %vm206_vm1, %v5684_v11, 0.0 }
 0x8b6   :  { %1944 = vadd.xlane.f32.xlu0 %v1943_v17 }
 0x92e   :  { %v1936_v33 = vpop.xlane.xlu1 %1935 }
 0x92f   :  { %v1950_v7 = vmul.f32 0.03125, %v1936_v33 }
 0x930   :  { %v1933_v26 = vpop.xlane.xlu0 %1932 }
 0x931   :  { %v5691_v15 = vsub.f32 %v5661_v62, %v1950_v7  ;;  %v1949_v24 = vmul.f32 0.03125, %v1933_v26 }
 0x933   :  { %v5694_v6 = vsub.f32 %v5664_v50, %v1949_v24  ;;  %v1962_v22 = vmul.f32 %v5691_v15, %v5691_v15 }
 0x935   :  { %v1970_v25 = vsel %vm206_vm1, %v1962_v22, 0.0  ;;  %v1961_v35 = vmul.f32 %v5694_v6, %v5694_v6 }
 0x936   :  { %v1942_v40 = vpop.xlane.xlu1 %1941  ;;  %1971 = vadd.xlane.f32.xlu1 %v1970_v25  ;;  %v5762_v25 = vld [vmem:[%s6288_s4 + $0x10] sm:$0xff] }
 0x937   :  { %v1952_v43 = vmul.f32 0.03125, %v1942_v40  ;;  %v1967_v31 = vsel %vm206_vm1, %v1961_v35, 0.0 }
 0x938   :  { %1968 = vadd.xlane.f32.xlu0 %v1967_v31  ;;  %v1939_v8 = vpop.xlane.xlu0 %1938 }
 0x939   :  { %v5703_v47 = vsub.f32 %v5671_v1, %v1952_v43  ;;  %v1951_v48 = vmul.f32 0.03125, %v1939_v8  ;;  %v2012_v8 = vrot.slane %v5762_v25, %v288_v36 }
 0x93b   :  { %v5706_v49 = vsub.f32 %v5674_v2, %v1951_v48  ;;  %v1964_v52 = vmul.f32 %v5703_v47, %v5703_v47 }
 0x93d   :  { %v1948_v60 = vpop.xlane.xlu1 %1947  ;;  %v1976_v56 = vsel %vm206_vm1, %v1964_v52, 0.0  ;;  %v1963_v63 = vmul.f32 %v5706_v49, %v5706_v49 }
 0x93e   :  { %v1954_v45 = vmul.f32 0.03125, %v1948_v60  ;;  %1977 = vadd.xlane.f32.xlu1 %v1976_v56 }
 0x93f   :  { %v1945_v44 = vpop.xlane.xlu0 %1944  ;;  %v1973_v0 = vsel %vm206_vm1, %v1963_v63, 0.0 }
 0x940   :  { %v5715_v53 = vsub.f32 %v5681_v4, %v1954_v45  ;;  %v1953_v34 = vmul.f32 0.03125, %v1945_v44  ;;  %1974 = vadd.xlane.f32.xlu0 %v1973_v0  ;;  %v2022_v0 = vrot.slane %v5762_v25, %v298_v41 }
 0x942   :  { %v5718_v5 = vsub.f32 %v5684_v11, %v1953_v34  ;;  %v1966_v37 = vmul.f32 %v5715_v53, %v5715_v53 }
 0x944   :  { %v1982_v12 = vsel %vm206_vm1, %v1966_v37, 0.0  ;;  %v1965_v42 = vmul.f32 %v5718_v5, %v5718_v5 }
 0x945   :  { %1983 = vadd.xlane.f32.xlu1 %v1982_v12 }
 0x946   :  { %v1979_v14 = vsel %vm206_vm1, %v1965_v42, 0.0 }
 0x947   :  { %1980 = vadd.xlane.f32.xlu0 %v1979_v14  ;;  %v3855_v14 = vld [vmem:[%s6289_s5 + $0x88] sm:$0xff] }
 0x9bf   :  { %v1972_v59 = vpop.xlane.xlu1 %1971 }
 0x9c0   :  { %v1986_v16 = vmul.f32 0.03125, %v1972_v59 }
 0x9c1   :  { %v1969_v29 = vpop.xlane.xlu0 %1968 }
 0x9c2   :  { %v1992_v3 = vadd.f32 1e-06, %v1986_v16  ;;  %v1985_v27 = vmul.f32 0.03125, %v1969_v29  ;;  %v5821_v29 = vld [vmem:[%s6290_s6 + $0x20] sm:$0xff] }
 0x9c4   :  { %4797 = vrsqrt.f32 %v1992_v3  ;;  %v1991_v30 = vadd.f32 1e-06, %v1985_v27  ;;  %v2248_v3 = vrot.slane %v5762_v25, %v524_v9 }
 0x9c6   :  { %4799 = vrsqrt.f32 %v1991_v30 }
 0x9c7   :  { %v1978_v17 = vpop.xlane.xlu1 %1977 }
 0x9c8   :  { %v1988_v33 = vmul.f32 0.03125, %v1978_v17  ;;  %v5833_v17 = vrot.slane %v5762_v25, %v308_v10 }
 0x9c9   :  { %v1975_v7 = vpop.xlane.xlu0 %1974 }
 0x9ca   :  { %v1994_v26 = vadd.f32 1e-06, %v1988_v33  ;;  %v1987_v24 = vmul.f32 0.03125, %v1975_v7 }
 0x9cc   :  { %4801 = vrsqrt.f32 %v1994_v26  ;;  %v1993_v22 = vadd.f32 1e-06, %v1987_v24 }
 0x9ce   :  { %4803 = vrsqrt.f32 %v1993_v22  ;;  %v1984_v35 = vpop.xlane.xlu1 %1983 }
 0x9cf   :  { %v1990_v40 = vmul.f32 0.03125, %v1984_v35 }
 0x9d0   :  { %v1981_v43 = vpop.xlane.xlu0 %1980 }
 0x9d1   :  { %v4798_v31 = vpop.eup %4797  ;;  %v1996_v48 = vadd.f32 1e-06, %v1990_v40  ;;  %v1989_v52 = vmul.f32 0.03125, %v1981_v43 }
 0x9d2   :  { %v2004_v60 = vmul.f32 %v4798_v31, %v5691_v15  ;;  %v3856_v15 = vld [vmem:[%s6289_s5 + $0x90] sm:$0xff] }
 0x9d3   :  { %v4800_v56 = vpop.eup %4799  ;;  %4805 = vrsqrt.f32 %v1996_v48  ;;  %v1995_v63 = vadd.f32 1e-06, %v1989_v52 }
 0x9d4   :  { %v2003_v45 = vmul.f32 %v4800_v56, %v5694_v6  ;;  %v2014_v44 = vmul.f32 %v2012_v8, %v2004_v60 }
 0x9d5   :  { %4807 = vrsqrt.f32 %v1995_v63 }
 0x9d6   :  { %v2013_v34 = vmul.f32 %v2012_v8, %v2003_v45  ;;  %v2024_v42 = vadd.f32 %v2022_v0, %v2014_v44 }
 0x9d8   :  { %v2023_v37 = vadd.f32 %v2022_v0, %v2013_v34 }
 0x9d9   :  { %v4802_v12 = vpop.eup %4801 }
 0x9da   :  { %4491 = vmatprep.mubr.msk.f32.mxu1 %vm206_vm1, %v2023_v37  ;;  %4525 = vmatprep.mubr.msk.f32.mxu0 %vm206_vm1, %v2023_v37  ;;  %v2006_v36 = vmul.f32 %v4802_v12, %v5703_v47 }
 0x9db   :  { %v4804_v6 = vpop.eup %4803  ;;  %4492 = vmatmul.mubr.msk.f32.vlgmr.msra.gmra.mxu1 %vm206_vm1, %v2024_v42  ;;  %4526 = vmatmul.mubr.msk.f32.vlgmr.msra.gmra.mxu0 %vm206_vm1, %v2024_v42 }
 0x9dc   :  { %v2005_v41 = vmul.f32 %v4804_v6, %v5706_v49  ;;  %4501 = vmatpush3.msra.mxu1 %v3857_v54  ;;  %4556 = vmatpush3.msra.mxu0 %v5756_v61  ;;  %v2016_v20 = vmul.f32 %v2012_v8, %v2006_v36 }
 0x9dd   :  { %4502 = vmatprep.subr.mxu1 %v3856_v15 }
 0x9de   :  { %v2015_v47 = vmul.f32 %v2012_v8, %v2005_v41  ;;  %4503 = vmatpush3.msra.mxu1 %v3856_v15  ;;  %v2026_v49 = vadd.f32 %v2022_v0, %v2016_v20  ;;  %v2149_v20 = vrot.slane %v5762_v25, %v425_v38 }
 0x9df   :  { %4504 = vmatprep.subr.mxu1 %v3855_v14 }
 0x9e0   :  { %v4806_v32 = vpop.eup %4805  ;;  %v2025_v39 = vadd.f32 %v2022_v0, %v2015_v47  ;;  %4505 = vmatpush3.msra.mxu1 %v3855_v14 }
 0x9e1   :  { %v2008_v21 = vmul.f32 %v4806_v32, %v5715_v53  ;;  %4506 = vmatprep.subr.mxu1 %v3854_v18  ;;  %v5807_v53 = vld [vmem:[%s6290_s6 + $0x30] sm:$0xff] }
 0x9e2   :  { %v4808_v19 = vpop.eup %4807  ;;  %4494 = vmatprep.mubr.msk.f32.mxu1 %vm206_vm1, %v2025_v39  ;;  %4528 = vmatprep.mubr.msk.f32.mxu0 %vm206_vm1, %v2025_v39 }
 0x9e3   :  { %4495 = vmatmul.mubr.msk.f32.gmra.mxu1 %vm206_vm1, %v2026_v49  ;;  %4529 = vmatmul.mubr.msk.f32.gmra.mxu0 %vm206_vm1, %v2026_v49  ;;  %v2007_v58 = vmul.f32 %v4808_v19, %v5718_v5  ;;  %v2018_v55 = vmul.f32 %v2012_v8, %v2008_v21  ;;  %v5814_v5 = vld [vmem:[%s6290_s6 + $0x28] sm:$0xff] }
 0x9e4   :  { %4507 = vmatpush3.msra.mxu1 %v3854_v18  ;;  %4557 = vmatprep.subr.mxu0 %v5807_v53 }
 0x9e5   :  { %v2017_v54 = vmul.f32 %v2012_v8, %v2007_v58  ;;  %v2028_v16 = vadd.f32 %v2022_v0, %v2018_v55  ;;  %4558 = vmatpush3.msra.mxu0 %v5807_v53 }
 0x9e6   :  { %4559 = vmatprep.subr.mxu0 %v5814_v5 }
 0x9e7   :  { %v2027_v59 = vadd.f32 %v2022_v0, %v2017_v54  ;;  %4560 = vmatpush3.msra.mxu0 %v5814_v5 }
 0x9e8   :  { %4561 = vmatprep.subr.mxu0 %v5821_v29 }
 0x9e9   :  { %4497 = vmatprep.mubr.msk.f32.mxu1 %vm206_vm1, %v2027_v59  ;;  %4531 = vmatprep.mubr.msk.f32.mxu0 %vm206_vm1, %v2027_v59 }
 0x9ea   :  { %4498 = vmatmul.mubr.msk.f32.gmra.mxu1 %vm206_vm1, %v2028_v16  ;;  %4532 = vmatmul.mubr.msk.f32.gmra.mxu0 %vm206_vm1, %v2028_v16 }
 0x9eb   :  { %4508 = vmatprep.mubr.msk.f32.mxu1 %vm206_vm1, %v2023_v37  ;;  %4562 = vmatpush3.msra.mxu0 %v5821_v29 }
 0x9ee   :  { %4509 = vmatmul.mubr.msk.f32.vlgmr.msra.gmra.mxu1 %vm206_vm1, %v2024_v42 }
 0x9ef   :  { %4511 = vmatprep.mubr.msk.f32.mxu1 %vm206_vm1, %v2025_v39 }
 0x9f2   :  { %4512 = vmatmul.mubr.msk.f32.gmra.mxu1 %vm206_vm1, %v2026_v49 }
 0x9f3   :  { %4514 = vmatprep.mubr.msk.f32.mxu1 %vm206_vm1, %v2027_v59 }
 0x9f6   :  { %4515 = vmatmul.mubr.msk.f32.gmra.mxu1 %vm206_vm1, %v2028_v16 }
 0xa9b   :  { %v5828_v27 = vpop.f32.mrf.mxu1  ;;  %v4527_v30 = vpop.f32.mrf.mxu0 }
 0xa9c   :  { %v5835_v26 = vadd.f32 %v4527_v30, %v2248_v3  ;;  %v2123_v58 = vadd.f32 %v5828_v27, %v5833_v17 }
 0xa9d   :  { %v2117_v33 = vpop.f32.mrf.mxu1  ;;  %v2315_v7 = vpop.f32.mrf.mxu0 }
 0xa9e   :  { %v2118_v24 = vadd.f32 %v2117_v33, %v5833_v17  ;;  %v5838_v22 = vadd.f32 %v2315_v7, %v2248_v3  ;;  %v2560_v10 = vsel %vm177_vm2, %v5835_v26, 0.0  ;;  %v2345_v54 = vsel %vm177_vm2, %v2123_v58, 0.0 }
 0xa9f   :  { %v2679_v59 = vsel %vm5274_vm5, %v2123_v58, 0.0  ;;  %v2876_v13 = vsel %vm5274_vm5, %v5835_v26, 0.0 }
 0xaa0   :  { %v2344_v35 = vsel %vm177_vm2, %v2118_v24, 0.0  ;;  %v2559_v9 = vsel %vm177_vm2, %v5838_v22, 0.0  ;;  %v2678_v6 = vsel %vm5274_vm5, %v2118_v24, 0.0 }
 0xaa1   :  { %4546 = vmatprep.mubr.msk.f32.mxu1 %vm206_vm1, %v2344_v35  ;;  %4563 = vmatprep.mubr.msk.f32.mxu0 %vm206_vm1, %v2559_v9 }
 0xaa2   :  { %4564 = vmatmul.mubr.msk.f32.vlgmr.msra.gmra.mxu0 %vm206_vm1, %v2560_v10  ;;  %v2875_v10 = vsel %vm5274_vm5, %v5838_v22, 0.0 }
 0xaa3   :  { %v4530_v40 = vpop.f32.mrf.mxu0  ;;  %v5851_v43 = vpop.f32.mrf.mxu1 }
 0xaa4   :  { %v5853_v8 = vadd.f32 %v4530_v40, %v2248_v3  ;;  %v2133_v16 = vadd.f32 %v5851_v43, %v5833_v17 }
 0xaa5   :  { %v2325_v31 = vpop.f32.mrf.mxu0  ;;  %v2127_v52 = vpop.f32.mrf.mxu1 }
 0xaa6   :  { %v5855_v48 = vadd.f32 %v2325_v31, %v2248_v3  ;;  %v2562_v56 = vsel %vm177_vm2, %v5853_v8, 0.0  ;;  %v2128_v55 = vadd.f32 %v2127_v52, %v5833_v17  ;;  %v2347_v33 = vsel %vm177_vm2, %v2133_v16, 0.0 }
 0xaa7   :  { %v2681_v7 = vsel %vm5274_vm5, %v2133_v16, 0.0 }
 0xaa8   :  { %v2561_v60 = vsel %vm177_vm2, %v5855_v48, 0.0  ;;  %v2680_v27 = vsel %vm5274_vm5, %v2128_v55, 0.0 }
 0xaa9   :  { %4566 = vmatprep.mubr.msk.f32.mxu0 %vm206_vm1, %v2561_v60 }
 0xaaa   :  { %v5864_v63 = vpop.f32.mrf.mxu1  ;;  %v4533_v45 = vpop.f32.mrf.mxu0  ;;  %4567 = vmatmul.mubr.msk.f32.gmra.mxu0 %vm206_vm1, %v2562_v56 }
 0xaab   :  { %v5867_v34 = vadd.f32 %v4533_v45, %v2248_v3  ;;  %v2143_v24 = vadd.f32 %v5864_v63, %v5833_v17 }
 0xaac   :  { %v2137_v44 = vpop.f32.mrf.mxu1  ;;  %v2335_v0 = vpop.f32.mrf.mxu0 }
 0xaad   :  { %v5869_v37 = vadd.f32 %v2335_v0, %v2248_v3  ;;  %v2564_v15 = vsel %vm177_vm2, %v5867_v34, 0.0  ;;  %v2346_v3 = vsel %vm177_vm2, %v2128_v55, 0.0  ;;  %v2138_v30 = vadd.f32 %v2137_v44, %v5833_v17 }
 0xaae   :  { %v4510_v12 = vpop.f32.mrf.mxu1  ;;  %v2683_v17 = vsel %vm5274_vm5, %v2143_v24, 0.0 }
 0xaaf   :  { %v2563_v42 = vsel %vm177_vm2, %v5869_v37, 0.0  ;;  %v2222_v21 = vadd.f32 %v4510_v12, %v2149_v20  ;;  %v2348_v35 = vsel %vm177_vm2, %v2138_v30, 0.0  ;;  %v2682_v9 = vsel %vm5274_vm5, %v2138_v30, 0.0 }
 0xab0   :  { %v2216_v36 = vpop.f32.mrf.mxu1  ;;  %4569 = vmatprep.mubr.msk.f32.mxu0 %vm206_vm1, %v2563_v42  ;;  %v2879_v22 = vsel %vm5274_vm5, %v5869_v37, 0.0 }
 0xab1   :  { %4570 = vmatmul.mubr.msk.f32.gmra.mxu0 %vm206_vm1, %v2564_v15  ;;  %v2217_v19 = vadd.f32 %v2216_v36, %v2149_v20 }
 0xab2   :  { %v4513_v41 = vpop.f32.mrf.mxu1  ;;  %4584 = vmatprep.mubr.msk.f32.mxu0 %vm206_vm1, %v2678_v6 }
 0xab3   :  { %v2232_v49 = vadd.f32 %v4513_v41, %v2149_v20 }
 0xab4   :  { %v2226_v14 = vpop.f32.mrf.mxu1 }
 0xab5   :  { %v2227_v38 = vadd.f32 %v2226_v14, %v2149_v20 }
 0xab6   :  { %v4516_v47 = vpop.f32.mrf.mxu1 }
 0xab7   :  { %v2242_v18 = vadd.f32 %v4516_v47, %v2149_v20 }
 0xab8   :  { %v2236_v32 = vpop.f32.mrf.mxu1 }
 0xab9   :  { %v2237_v39 = vadd.f32 %v2236_v32, %v2149_v20  ;;  %4534 = vmatprep.subr.msk.mxu1 %vm206_vm1, %v2242_v18  ;;  %4572 = vmatprep.subr.msk.mxu0 %vm206_vm1, %v2242_v18 }
 0xaba   :  { %4535 = vmatpush3.xpose.msk.msra.mxu1 %vm206_vm1, %v2242_v18  ;;  %4573 = vmatpush3.xpose.msk.msra.mxu0 %vm206_vm1, %v2242_v18  ;;  %v4895_v18 = vld [vmem:[%s6286_s2] sm:$0xff] }
 0xabb   :  { %4536 = vmatprep.subr.msk.mxu1 %vm206_vm1, %v2237_v39  ;;  %4574 = vmatprep.subr.msk.mxu0 %vm206_vm1, %v2237_v39 }
 0xabe   :  { %4537 = vmatpush3.xpose.msk.msra.mxu1 %vm206_vm1, %v2237_v39  ;;  %4575 = vmatpush3.xpose.msk.msra.mxu0 %vm206_vm1, %v2237_v39 }
 0xabf   :  { %4538 = vmatprep.subr.msk.mxu1 %vm206_vm1, %v2232_v49  ;;  %4576 = vmatprep.subr.msk.mxu0 %vm206_vm1, %v2232_v49 }
 0xac2   :  { %4539 = vmatpush3.xpose.msk.msra.mxu1 %vm206_vm1, %v2232_v49  ;;  %4577 = vmatpush3.xpose.msk.msra.mxu0 %vm206_vm1, %v2232_v49 }
 0xac3   :  { %4540 = vmatprep.subr.msk.mxu1 %vm206_vm1, %v2227_v38  ;;  %4578 = vmatprep.subr.msk.mxu0 %vm206_vm1, %v2227_v38 }
 0xac6   :  { %4541 = vmatpush3.xpose.msk.msra.mxu1 %vm206_vm1, %v2227_v38  ;;  %4579 = vmatpush3.xpose.msk.msra.mxu0 %vm206_vm1, %v2227_v38 }
 0xac7   :  { %4542 = vmatprep.subr.msk.mxu1 %vm206_vm1, %v2222_v21  ;;  %4580 = vmatprep.subr.msk.mxu0 %vm206_vm1, %v2222_v21 }
 0xaca   :  { %4543 = vmatpush3.xpose.msk.msra.mxu1 %vm206_vm1, %v2222_v21  ;;  %4581 = vmatpush3.xpose.msk.msra.mxu0 %vm206_vm1, %v2222_v21 }
 0xacb   :  { %4544 = vmatprep.subr.msk.mxu1 %vm206_vm1, %v2217_v19  ;;  %4582 = vmatprep.subr.msk.mxu0 %vm206_vm1, %v2217_v19 }
 0xace   :  { %4545 = vmatpush3.xpose.msk.msra.mxu1 %vm206_vm1, %v2217_v19  ;;  %4583 = vmatpush3.xpose.msk.msra.mxu0 %vm206_vm1, %v2217_v19  ;;  %v4896_v19 = vld [vmem:[%s6286_s2 + $0x18] sm:$0xff] }
 0xacf   :  { %4593 = vmatprep.subr.mxu1 %v5756_v61 }
 0xad1   :  { %4547 = vmatmul.mubr.msk.f32.vlgmr.msra.gmra.mxu1 %vm206_vm1, %v2345_v54  ;;  %4585 = vmatmul.mubr.msk.f32.vlgmr.msra.gmra.mxu0 %vm206_vm1, %v2679_v59 }
 0xad2   :  { %4549 = vmatprep.mubr.msk.f32.mxu1 %vm206_vm1, %v2346_v3  ;;  %4587 = vmatprep.mubr.msk.f32.mxu0 %vm206_vm1, %v2680_v27 }
 0xad3   :  { %4594 = vmatpush3.msra.mxu1 %v5756_v61  ;;  %v2349_v61 = vsel %vm177_vm2, %v2143_v24, 0.0 }
 0xad4   :  { %4595 = vmatprep.subr.mxu1 %v5807_v53 }
 0xad5   :  { %4550 = vmatmul.mubr.msk.f32.gmra.mxu1 %vm206_vm1, %v2347_v33  ;;  %4588 = vmatmul.mubr.msk.f32.gmra.mxu0 %vm206_vm1, %v2681_v7 }
 0xad6   :  { %4552 = vmatprep.mubr.msk.f32.mxu1 %vm206_vm1, %v2348_v35  ;;  %4590 = vmatprep.mubr.msk.f32.mxu0 %vm206_vm1, %v2682_v9  ;;  %v4897_v35 = vld [vmem:[%s6286_s2 + $0x10] sm:$0xff] }
 0xad7   :  { %4596 = vmatpush3.msra.mxu1 %v5807_v53  ;;  %v2877_v53 = vsel %vm5274_vm5, %v5855_v48, 0.0 }
 0xad8   :  { %4597 = vmatprep.subr.mxu1 %v5814_v5 }
 0xad9   :  { %4553 = vmatmul.mubr.msk.f32.gmra.mxu1 %vm206_vm1, %v2349_v61  ;;  %4591 = vmatmul.mubr.msk.f32.gmra.mxu0 %vm206_vm1, %v2683_v17 }
 0xada   :  { %4598 = vmatpush3.msra.mxu1 %v5814_v5  ;;  %4601 = vmatprep.mubr.msk.f32.mxu1 %vm206_vm1, %v2875_v10  ;;  %v2878_v5 = vsel %vm5274_vm5, %v5853_v8, 0.0 }
 0xadb   :  { %4599 = vmatprep.subr.mxu1 %v5821_v29 }
 0xadc   :  { %4600 = vmatpush3.msra.mxu1 %v5821_v29  ;;  %v2880_v29 = vsel %vm5274_vm5, %v5867_v34, 0.0  ;;  %v4894_v34 = vld [vmem:[%s6286_s2 + $0x8] sm:$0xff] }
 0xadd   :  { %4602 = vmatmul.mubr.msk.f32.vlgmr.msra.gmra.mxu1 %vm206_vm1, %v2876_v13 }
 0xade   :  { %4604 = vmatprep.mubr.msk.f32.mxu1 %vm206_vm1, %v2877_v53 }
 0xae1   :  { %4605 = vmatmul.mubr.msk.f32.gmra.mxu1 %vm206_vm1, %v2878_v5 }
 0xae2   :  { %4607 = vmatprep.mubr.msk.f32.mxu1 %vm206_vm1, %v2879_v22 }
 0xae5   :  { %4608 = vmatmul.mubr.msk.f32.gmra.mxu1 %vm206_vm1, %v2880_v29  ;;  %v4898_v29 = vld [vmem:[%s6286_s2 + $0x20] sm:$0xff] }
 0xb62   :  { %v4565_v26 = vpop.f32.mrf.mxu0 }
 0xb64   :  { %v2649_v40 = vpop.f32.mrf.mxu0 }
 0xb6a   :  { %v4568_v43 = vpop.f32.mrf.mxu0 }
 0xb6c   :  { %v2659_v31 = vpop.f32.mrf.mxu0 }
 0xb71   :  { %v4571_v48 = vpop.f32.mrf.mxu0 }
 0xb72   :  { %4631 = vmatprep.subr.mxu0 %v4571_v48 }
 0xb73   :  { %v2669_v8 = vpop.f32.mrf.mxu0  ;;  %4632 = vmatpush3.msra.mxu0 %v4571_v48 }
 0xb74   :  { %4633 = vmatprep.subr.mxu0 %v2669_v8 }
 0xb75   :  { %4634 = vmatpush3.msra.mxu0 %v2669_v8 }
 0xb76   :  { %4635 = vmatprep.subr.mxu0 %v4568_v43 }
 0xb77   :  { %4636 = vmatpush3.msra.mxu0 %v4568_v43 }
 0xb78   :  { %4637 = vmatprep.subr.mxu0 %v2659_v31 }
 0xb79   :  { %4638 = vmatpush3.msra.mxu0 %v2659_v31 }
 0xb7a   :  { %4639 = vmatprep.subr.mxu0 %v4565_v26 }
 0xb7b   :  { %4640 = vmatpush3.msra.mxu0 %v4565_v26 }
 0xb7c   :  { %4641 = vmatprep.subr.mxu0 %v2649_v40 }
 0xb7d   :  { %4642 = vmatpush3.msra.mxu0 %v2649_v40 }
 0xb91   :  { %v4548_v57 = vpop.f32.mrf.mxu1  ;;  %v4586_v52 = vpop.f32.mrf.mxu0 }
 0xb92   :  { %v2482_v60 = vmul.f32 0.25, %v4548_v57  ;;  %v2798_v56 = vmul.f32 0.25, %v4586_v52  ;;  %v4899_v57 = vld [vmem:[%s6286_s2 + $0x28] sm:$0xff] }
 0xb93   :  { %v2452_v63 = vpop.f32.mrf.mxu1  ;;  %v2768_v45 = vpop.f32.mrf.mxu0 }
 0xb94   :  { %v2481_v44 = vmul.f32 0.25, %v2452_v63  ;;  %v2797_v0 = vmul.f32 0.25, %v2768_v45  ;;  %v5982_v37 = vadd.f32 %v4894_v34, %v2798_v56  ;;  %v5984_v12 = vadd.f32 %v4894_v34, %v2482_v60 }
 0xb95   :  { %v4551_v42 = vpop.f32.mrf.mxu1  ;;  %v4589_v36 = vpop.f32.mrf.mxu0 }
 0xb96   :  { %v2484_v15 = vmul.f32 0.25, %v4551_v42  ;;  %v2800_v6 = vmul.f32 0.25, %v4589_v36  ;;  %v2812_v41 = vsel %vm60_vm0, %v5982_v37, -inf  ;;  %v2496_v14 = vsel %vm60_vm0, %v5984_v12, -inf }
 0xb97   :  { %2813 = vmax.xlane.f32.xlu1 %v2812_v41  ;;  %v2778_v20 = vpop.f32.mrf.mxu0  ;;  %2497 = vmax.xlane.f32.xlu0 %v2496_v14  ;;  %v2462_v47 = vpop.f32.mrf.mxu1  ;;  %v5993_v32 = vadd.f32 %v4895_v18, %v2797_v0  ;;  %v5995_v39 = vadd.f32 %v4895_v18, %v2481_v44 }
 0xb98   :  { %v2799_v49 = vmul.f32 0.25, %v2778_v20  ;;  %v6000_v58 = vadd.f32 %v4896_v19, %v2800_v6  ;;  %v2483_v55 = vmul.f32 0.25, %v2462_v47  ;;  %v6006_v16 = vadd.f32 %v4896_v19, %v2484_v15 }
 0xb99   :  { %v4554_v38 = vpop.f32.mrf.mxu1  ;;  %v4592_v21 = vpop.f32.mrf.mxu0  ;;  %v2809_v54 = vsel %vm60_vm0, %v5993_v32, -inf  ;;  %v2493_v59 = vsel %vm60_vm0, %v5995_v39, -inf }
 0xb9a   :  { %v2818_v33 = vsel %vm60_vm0, %v6000_v58, -inf  ;;  %v2502_v24 = vsel %vm60_vm0, %v6006_v16, -inf  ;;  %v6015_v9 = vadd.f32 %v4897_v35, %v2799_v49  ;;  %v6017_v61 = vadd.f32 %v4897_v35, %v2483_v55 }
 0xb9b   :  { %2810 = vmax.xlane.f32.xlu1 %v2809_v54  ;;  %2494 = vmax.xlane.f32.xlu0 %v2493_v59  ;;  %v2472_v3 = vpop.f32.mrf.mxu1  ;;  %v2788_v27 = vpop.f32.mrf.mxu0  ;;  %v2802_v53 = vmul.f32 0.25, %v4592_v21  ;;  %v2486_v40 = vmul.f32 0.25, %v4554_v38 }
 0xb9c   :  { %v2801_v7 = vmul.f32 0.25, %v2788_v27  ;;  %v2485_v17 = vmul.f32 0.25, %v2472_v3  ;;  %v2815_v5 = vsel %vm60_vm0, %v6015_v9, -inf  ;;  %v2499_v22 = vsel %vm60_vm0, %v6017_v61, -inf }
 0xb9d   :  { %v4603_v30 = vpop.f32.mrf.mxu1  ;;  %v6035_v52 = vadd.f32 %v4899_v57, %v2802_v53  ;;  %v6039_v63 = vadd.f32 %v4899_v57, %v2486_v40 }
 0xb9e   :  { %v6026_v26 = vadd.f32 %v4898_v29, %v2801_v7  ;;  %v6028_v31 = vadd.f32 %v4898_v29, %v2485_v17 }
 0xb9f   :  { %2819 = vmax.xlane.f32.xlu1 %v2818_v33  ;;  %2503 = vmax.xlane.f32.xlu0 %v2502_v24  ;;  %v2965_v10 = vpop.f32.mrf.mxu1  ;;  %v2824_v45 = vsel %vm60_vm0, %v6035_v52, -inf  ;;  %v2508_v44 = vsel %vm60_vm0, %v6039_v63, -inf }
 0xba0   :  { %v2821_v8 = vsel %vm60_vm0, %v6026_v26, -inf  ;;  %v2505_v56 = vsel %vm60_vm0, %v6028_v31, -inf }
 0xba1   :  { %v4606_v13 = vpop.f32.mrf.mxu1 }
 0xba3   :  { %2816 = vmax.xlane.f32.xlu1 %v2815_v5  ;;  %2500 = vmax.xlane.f32.xlu0 %v2499_v22  ;;  %v2975_v43 = vpop.f32.mrf.mxu1 }
 0xba5   :  { %v4609_v48 = vpop.f32.mrf.mxu1 }
 0xba6   :  { %4610 = vmatprep.subr.mxu1 %v4609_v48 }
 0xba7   :  { %2822 = vmax.xlane.f32.xlu1 %v2821_v8  ;;  %v2985_v60 = vpop.f32.mrf.mxu1  ;;  %4611 = vmatpush3.msra.mxu1 %v4609_v48 }
 0xba8   :  { %2506 = vmax.xlane.f32.xlu0 %v2505_v56  ;;  %4612 = vmatprep.subr.mxu1 %v2985_v60 }
 0xba9   :  { %4613 = vmatpush3.msra.mxu1 %v2985_v60 }
 0xbaa   :  { %4614 = vmatprep.subr.mxu1 %v4606_v13 }
 0xbab   :  { %2825 = vmax.xlane.f32.xlu1 %v2824_v45  ;;  %4615 = vmatpush3.msra.mxu1 %v4606_v13 }
 0xbac   :  { %2509 = vmax.xlane.f32.xlu0 %v2508_v44  ;;  %4616 = vmatprep.subr.mxu1 %v2975_v43 }
 0xbad   :  { %4617 = vmatpush3.msra.mxu1 %v2975_v43 }
 0xbae   :  { %4618 = vmatprep.subr.mxu1 %v4603_v30 }
 0xbaf   :  { %4619 = vmatpush3.msra.mxu1 %v4603_v30 }
 0xbb0   :  { %4620 = vmatprep.subr.mxu1 %v2965_v10 }
 0xbb1   :  { %4621 = vmatpush3.msra.mxu1 %v2965_v10 }
 0xc20   :  { %v2814_v0 = vpop.xlane.xlu1 %2813  ;;  %v2498_v34 = vpop.xlane.xlu0 %2497 }
 0xc21   :  { %v2828_v42 = vsub.f32 %v5982_v37, %v2814_v0  ;;  %v2512_v36 = vsub.f32 %v5984_v12, %v2498_v34 }
 0xc23   :  { %v2835_v15 = vmul.f32 1.442695, %v2828_v42  ;;  %v2519_v6 = vmul.f32 1.442695, %v2512_v36 }
 0xc24   :  { %v2811_v41 = vpop.xlane.xlu1 %2810  ;;  %v2495_v14 = vpop.xlane.xlu0 %2494 }
 0xc25   :  { %4809 = vpow2.f32 %v2835_v15  ;;  %v2827_v20 = vsub.f32 %v5993_v32, %v2811_v41  ;;  %v2511_v47 = vsub.f32 %v5995_v39, %v2495_v14 }
 0xc26   :  { %4811 = vpow2.f32 %v2519_v6 }
 0xc27   :  { %v2833_v18 = vmul.f32 1.442695, %v2827_v20  ;;  %v2517_v49 = vmul.f32 1.442695, %v2511_v47 }
 0xc28   :  { %v2820_v38 = vpop.xlane.xlu1 %2819  ;;  %v2504_v21 = vpop.xlane.xlu0 %2503 }
 0xc29   :  { %4813 = vpow2.f32 %v2833_v18  ;;  %v2830_v19 = vsub.f32 %v6000_v58, %v2820_v38  ;;  %v2514_v37 = vsub.f32 %v6006_v16, %v2504_v21 }
 0xc2a   :  { %4815 = vpow2.f32 %v2517_v49 }
 0xc2b   :  { %v2839_v12 = vmul.f32 1.442695, %v2830_v19  ;;  %v2523_v55 = vmul.f32 1.442695, %v2514_v37 }
 0xc2c   :  { %v2817_v54 = vpop.xlane.xlu1 %2816  ;;  %v2501_v59 = vpop.xlane.xlu0 %2500 }
 0xc2d   :  { %4817 = vpow2.f32 %v2839_v12  ;;  %v2829_v32 = vsub.f32 %v6015_v9, %v2817_v54  ;;  %v2513_v39 = vsub.f32 %v6017_v61, %v2501_v59 }
 0xc2e   :  { %4819 = vpow2.f32 %v2523_v55 }
 0xc2f   :  { %v2837_v3 = vmul.f32 1.442695, %v2829_v32  ;;  %v2521_v27 = vmul.f32 1.442695, %v2513_v39 }
 0xc30   :  { %v2823_v30 = vpop.xlane.xlu1 %2822 }
 0xc31   :  { %4821 = vpow2.f32 %v2837_v3  ;;  %v2831_v33 = vsub.f32 %v6026_v26, %v2823_v30  ;;  %v2507_v58 = vpop.xlane.xlu0 %2506 }
 0xc32   :  { %v6054_v7 = vpop.eup %4809  ;;  %4823 = vpow2.f32 %v2521_v27  ;;  %v2515_v16 = vsub.f32 %v6028_v31, %v2507_v58 }
 0xc33   :  { %v6057_v24 = vpop.eup %4811  ;;  %v2841_v35 = vmul.f32 1.442695, %v2831_v33  ;;  %v2848_v9 = vsel %vm60_vm0, %v6054_v7, 0.0 }
 0xc34   :  { %v2525_v61 = vmul.f32 1.442695, %v2515_v16  ;;  %2849 = vadd.xlane.f32.xlu1 %v2848_v9  ;;  %v2826_v17 = vpop.xlane.xlu1 %2825  ;;  %v2532_v10 = vsel %vm60_vm0, %v6057_v24, 0.0 }
 0xc35   :  { %4825 = vpow2.f32 %v2841_v35  ;;  %v2832_v13 = vsub.f32 %v6035_v52, %v2826_v17  ;;  %2533 = vadd.xlane.f32.xlu0 %v2532_v10  ;;  %v2510_v53 = vpop.xlane.xlu0 %2509 }
 0xc36   :  { %v4814_v5 = vpop.eup %4813  ;;  %4827 = vpow2.f32 %v2525_v61  ;;  %v2516_v22 = vsub.f32 %v6039_v63, %v2510_v53 }
 0xc37   :  { %v4816_v29 = vpop.eup %4815  ;;  %v2843_v26 = vmul.f32 1.442695, %v2832_v13  ;;  %v2845_v40 = vsel %vm60_vm0, %v4814_v5, 0.0 }
 0xc38   :  { %v2527_v43 = vmul.f32 1.442695, %v2516_v22  ;;  %2846 = vadd.xlane.f32.xlu1 %v2845_v40  ;;  %v2529_v31 = vsel %vm60_vm0, %v4816_v29, 0.0 }
 0xc39   :  { %4829 = vpow2.f32 %v2843_v26  ;;  %2530 = vadd.xlane.f32.xlu0 %v2529_v31 }
 0xc3a   :  { %v6067_v48 = vpop.eup %4817  ;;  %4831 = vpow2.f32 %v2527_v43 }
 0xc3b   :  { %v6069_v8 = vpop.eup %4819  ;;  %v2854_v57 = vsel %vm60_vm0, %v6067_v48, 0.0 }
 0xc3c   :  { %2855 = vadd.xlane.f32.xlu1 %v2854_v57  ;;  %v2538_v52 = vsel %vm60_vm0, %v6069_v8, 0.0  ;;  %v3229_v57 = vrot.slane %v5762_v25, %v1505_v51 }
 0xc3d   :  { %2539 = vadd.xlane.f32.xlu0 %v2538_v52 }
 0xc3e   :  { %v4822_v60 = vpop.eup %4821 }
 0xc3f   :  { %v4824_v56 = vpop.eup %4823  ;;  %v2851_v63 = vsel %vm60_vm0, %v4822_v60, 0.0 }
 0xc40   :  { %2852 = vadd.xlane.f32.xlu1 %v2851_v63  ;;  %v2535_v45 = vsel %vm60_vm0, %v4824_v56, 0.0 }
 0xc41   :  { %2536 = vadd.xlane.f32.xlu0 %v2535_v45 }
 0xc42   :  { %v4826_v44 = vpop.eup %4825 }
 0xc43   :  { %v4828_v0 = vpop.eup %4827  ;;  %v2857_v34 = vsel %vm60_vm0, %v4826_v44, 0.0 }
 0xc44   :  { %2858 = vadd.xlane.f32.xlu1 %v2857_v34  ;;  %v2541_v42 = vsel %vm60_vm0, %v4828_v0, 0.0 }
 0xc45   :  { %2542 = vadd.xlane.f32.xlu0 %v2541_v42 }
 0xc46   :  { %v4830_v36 = vpop.eup %4829 }
 0xc47   :  { %v4832_v15 = vpop.eup %4831  ;;  %v2860_v6 = vsel %vm60_vm0, %v4830_v36, 0.0 }
 0xc48   :  { %2861 = vadd.xlane.f32.xlu1 %v2860_v6  ;;  %v2544_v41 = vsel %vm60_vm0, %v4832_v15, 0.0 }
 0xc49   :  { %2545 = vadd.xlane.f32.xlu0 %v2544_v41 }
 0xcbd   :  { %v2850_v14 = vpop.xlane.xlu1 %2849 }
 0xcbe   :  { %v2534_v20 = vpop.xlane.xlu0 %2533  ;;  %4833 = vrcp.f32 %v2850_v14 }
 0xcbf   :  { %4835 = vrcp.f32 %v2534_v20 }
 0xcc1   :  { %v2847_v47 = vpop.xlane.xlu1 %2846 }
 0xcc2   :  { %4837 = vrcp.f32 %v2847_v47  ;;  %v2531_v18 = vpop.xlane.xlu0 %2530 }
 0xcc3   :  { %4839 = vrcp.f32 %v2531_v18 }
 0xcc5   :  { %v2856_v49 = vpop.xlane.xlu1 %2855 }
 0xcc6   :  { %v2540_v38 = vpop.xlane.xlu0 %2539  ;;  %4841 = vrcp.f32 %v2856_v49 }
 0xcc7   :  { %4843 = vrcp.f32 %v2540_v38 }
 0xcc9   :  { %v2853_v21 = vpop.xlane.xlu1 %2852 }
 0xcca   :  { %4845 = vrcp.f32 %v2853_v21  ;;  %v2537_v19 = vpop.xlane.xlu0 %2536 }
 0xccb   :  { %4847 = vrcp.f32 %v2537_v19  ;;  %v4834_v37 = vpop.eup %4833 }
 0xccc   :  { %v4836_v55 = vpop.eup %4835  ;;  %v2870_v3 = vmul.f32 %v4834_v37, %v6054_v7 }
 0xccd   :  { %v2859_v12 = vpop.xlane.xlu1 %2858  ;;  %v2554_v33 = vmul.f32 %v4836_v55, %v6057_v24 }
 0xcce   :  { %4849 = vrcp.f32 %v2859_v12  ;;  %v2543_v54 = vpop.xlane.xlu0 %2542 }
 0xccf   :  { %v4838_v59 = vpop.eup %4837  ;;  %4851 = vrcp.f32 %v2543_v54 }
 0xcd0   :  { %v4840_v32 = vpop.eup %4839  ;;  %v2869_v39 = vmul.f32 %v4838_v59, %v4814_v5 }
 0xcd1   :  { %v2862_v27 = vpop.xlane.xlu1 %2861  ;;  %v2553_v30 = vmul.f32 %v4840_v32, %v4816_v29 }
 0xcd2   :  { %4853 = vrcp.f32 %v2862_v27  ;;  %v2546_v58 = vpop.xlane.xlu0 %2545  ;;  %4622 = vmatprep.mubr.msk.f32.mxu1 %vm60_vm0, %v2869_v39 }
 0xcd3   :  { %4855 = vrcp.f32 %v2546_v58  ;;  %4643 = vmatprep.mubr.msk.f32.mxu0 %vm60_vm0, %v2553_v30  ;;  %4623 = vmatmul.mubr.msk.f32.vlgmr.msra.gmra.mxu1 %vm60_vm0, %v2870_v3  ;;  %v4842_v16 = vpop.eup %4841 }
 0xcd4   :  { %4644 = vmatmul.mubr.msk.f32.vlgmr.msra.gmra.mxu0 %vm60_vm0, %v2554_v33  ;;  %v4844_v35 = vpop.eup %4843  ;;  %v2872_v10 = vmul.f32 %v4842_v16, %v6067_v48 }
 0xcd5   :  { %v2556_v24 = vmul.f32 %v4844_v35, %v6069_v8 }
 0xcd7   :  { %v4846_v9 = vpop.eup %4845 }
 0xcd8   :  { %v4848_v61 = vpop.eup %4847  ;;  %v2871_v7 = vmul.f32 %v4846_v9, %v4822_v60 }
 0xcd9   :  { %v2555_v17 = vmul.f32 %v4848_v61, %v4824_v56 }
 0xcda   :  { %4625 = vmatprep.mubr.msk.f32.mxu1 %vm60_vm0, %v2871_v7 }
 0xcdb   :  { %v4850_v13 = vpop.eup %4849  ;;  %4646 = vmatprep.mubr.msk.f32.mxu0 %vm60_vm0, %v2555_v17  ;;  %4626 = vmatmul.mubr.msk.f32.gmra.mxu1 %vm60_vm0, %v2872_v10 }
 0xcdc   :  { %v4852_v53 = vpop.eup %4851  ;;  %4647 = vmatmul.mubr.msk.f32.gmra.mxu0 %vm60_vm0, %v2556_v24  ;;  %v2873_v5 = vmul.f32 %v4850_v13, %v4826_v44 }
 0xcdd   :  { %v2557_v22 = vmul.f32 %v4852_v53, %v4828_v0 }
 0xcde   :  { %4628 = vmatprep.mubr.msk.f32.mxu1 %vm60_vm0, %v2873_v5 }
 0xcdf   :  { %v4854_v29 = vpop.eup %4853  ;;  %4649 = vmatprep.mubr.msk.f32.mxu0 %vm60_vm0, %v2557_v22 }
 0xce0   :  { %v4856_v26 = vpop.eup %4855  ;;  %v2874_v40 = vmul.f32 %v4854_v29, %v4830_v36 }
 0xce1   :  { %v2558_v43 = vmul.f32 %v4856_v26, %v4832_v15 }
 0xce2   :  { %4629 = vmatmul.mubr.msk.f32.gmra.mxu1 %vm60_vm0, %v2874_v40 }
 0xce3   :  { %4650 = vmatmul.mubr.msk.f32.gmra.mxu0 %vm60_vm0, %v2558_v43 }
 0xd93   :  { %v4624_v31 = vpop.f32.mrf.mxu1 }
 0xd94   :  { %v4645_v48 = vpop.f32.mrf.mxu0 }
 0xd95   :  { %v3197_v8 = vadd.f32 %v4645_v48, %v4624_v31  ;;  %v3078_v52 = vpop.f32.mrf.mxu1 }
 0xd96   :  { %v3191_v60 = vpop.f32.mrf.mxu0 }
 0xd97   :  { %v3221_v56 = vadd.f32 %v3197_v8, %v5661_v62  ;;  %v3192_v63 = vadd.f32 %v3191_v60, %v3078_v52 }
 0xd99   :  { %v6101_v45 = vadd.f32 %v3229_v57, %v3221_v56  ;;  %v3220_v44 = vadd.f32 %v3192_v63, %v5664_v50  ;;  %v3935_v56 = vld [vmem:[%s6291_s7 + $0x38] sm:$0xff]  ;;  %v3934_v63 = vld [vmem:[%s6291_s7 + $0x30] sm:$0xff] }
 0xd9a   :  { %4652 = vmatprep.subr.mxu1 %v3935_v56 }
 0xd9b   :  { %v6104_v0 = vadd.f32 %v3229_v57, %v3220_v44  ;;  %v4627_v34 = vpop.f32.mrf.mxu1  ;;  %v3239_v42 = vsel %vm206_vm1, %v6101_v45, 0.0  ;;  %4653 = vmatpush3.msra.mxu1 %v3935_v56  ;;  %v3933_v44 = vld [vmem:[%s6291_s7 + $0x28] sm:$0xff]  ;;  %v3950_v56 = vld [vmem:[%s6293_s9 + $0xb0] sm:$0xff] }
 0xd9c   :  { %3240 = vadd.xlane.f32.xlu1 %v3239_v42  ;;  %v4648_v36 = vpop.f32.mrf.mxu0  ;;  %4654 = vmatprep.subr.mxu1 %v3934_v63 }
 0xd9d   :  { %v3207_v15 = vadd.f32 %v4648_v36, %v4627_v34  ;;  %v3088_v6 = vpop.f32.mrf.mxu1  ;;  %v3236_v51 = vsel %vm206_vm1, %v6104_v0, 0.0  ;;  %4655 = vmatpush3.msra.mxu1 %v3934_v63  ;;  %v3932_v34 = vld [vmem:[%s6291_s7 + $0x20] sm:$0xff]  ;;  %v3949_v63 = vld [vmem:[%s6293_s9 + $0xa8] sm:$0xff] }
 0xd9e   :  { %3237 = vadd.xlane.f32.xlu0 %v3236_v51  ;;  %v3201_v62 = vpop.f32.mrf.mxu0  ;;  %4656 = vmatprep.subr.mxu1 %v3933_v44 }
 0xd9f   :  { %v3223_v25 = vadd.f32 %v3207_v15, %v5671_v1  ;;  %v3202_v41 = vadd.f32 %v3201_v62, %v3088_v6  ;;  %4657 = vmatpush3.msra.mxu1 %v3933_v44  ;;  %v3948_v44 = vld [vmem:[%s6293_s9 + $0xa0] sm:$0xff] }
 0xda0   :  { %4658 = vmatprep.subr.mxu1 %v3932_v34 }
 0xda1   :  { %v6111_v14 = vadd.f32 %v3229_v57, %v3223_v25  ;;  %v3222_v50 = vadd.f32 %v3202_v41, %v5674_v2  ;;  %4659 = vmatpush3.msra.mxu1 %v3932_v34  ;;  %v3947_v34 = vld [vmem:[%s6293_s9 + $0x98] sm:$0xff] }
 0xda2   :  { %v4630_v20 = vpop.f32.mrf.mxu1 }
 0xda3   :  { %v6114_v47 = vadd.f32 %v3229_v57, %v3222_v50  ;;  %v4651_v18 = vpop.f32.mrf.mxu0  ;;  %v3245_v49 = vsel %vm206_vm1, %v6111_v14, 0.0 }
 0xda4   :  { %v3217_v38 = vadd.f32 %v4651_v18, %v4630_v20  ;;  %3246 = vadd.xlane.f32.xlu1 %v3245_v49  ;;  %v3098_v21 = vpop.f32.mrf.mxu1 }
 0xda5   :  { %v3211_v19 = vpop.f32.mrf.mxu0  ;;  %v3242_v37 = vsel %vm206_vm1, %v6114_v47, 0.0 }
 0xda6   :  { %v3225_v1 = vadd.f32 %v3217_v38, %v5681_v4  ;;  %v3212_v12 = vadd.f32 %v3211_v19, %v3098_v21  ;;  %3243 = vadd.xlane.f32.xlu0 %v3242_v37 }
 0xda8   :  { %v6121_v55 = vadd.f32 %v3229_v57, %v3225_v1  ;;  %v3224_v2 = vadd.f32 %v3212_v12, %v5684_v11  ;;  %v4900_v1 = vld [vmem:[%s6288_s4 + $0x10] sm:$0xff] }
 0xda9   :  { %v3317_v12 = vrot.slane %v4900_v1, %v1593_v23 }
 0xdaa   :  { %v6124_v54 = vadd.f32 %v3229_v57, %v3224_v2  ;;  %v3251_v59 = vsel %vm206_vm1, %v6121_v55, 0.0 }
 0xdab   :  { %3252 = vadd.xlane.f32.xlu1 %v3251_v59 }
 0xdac   :  { %v3248_v32 = vsel %vm206_vm1, %v6124_v54, 0.0 }
 0xdad   :  { %3249 = vadd.xlane.f32.xlu0 %v3248_v32 }
 0xe25   :  { %v3241_v39 = vpop.xlane.xlu1 %3240 }
 0xe26   :  { %v3255_v3 = vmul.f32 0.03125, %v3241_v39 }
 0xe27   :  { %v3238_v27 = vpop.xlane.xlu0 %3237 }
 0xe28   :  { %v6131_v4 = vsub.f32 %v6101_v45, %v3255_v3  ;;  %v3254_v30 = vmul.f32 0.03125, %v3238_v27 }
 0xe2a   :  { %v6134_v33 = vsub.f32 %v6104_v0, %v3254_v30  ;;  %v3267_v11 = vmul.f32 %v6131_v4, %v6131_v4 }
 0xe2c   :  { %v3275_v58 = vsel %vm206_vm1, %v3267_v11, 0.0  ;;  %v3266_v16 = vmul.f32 %v6134_v33, %v6134_v33  ;;  %v3327_v11 = vrot.slane %v4900_v1, %v1603_v46 }
 0xe2d   :  { %v3247_v35 = vpop.xlane.xlu1 %3246  ;;  %3276 = vadd.xlane.f32.xlu1 %v3275_v58 }
 0xe2e   :  { %v3257_v9 = vmul.f32 0.03125, %v3247_v35  ;;  %v3272_v61 = vsel %vm206_vm1, %v3266_v16, 0.0 }
 0xe2f   :  { %3273 = vadd.xlane.f32.xlu0 %v3272_v61  ;;  %v3244_v7 = vpop.xlane.xlu0 %3243 }
 0xe30   :  { %v6143_v17 = vsub.f32 %v6111_v14, %v3257_v9  ;;  %v3256_v10 = vmul.f32 0.03125, %v3244_v7 }
 0xe32   :  { %v6146_v24 = vsub.f32 %v6114_v47, %v3256_v10  ;;  %v3269_v13 = vmul.f32 %v6143_v17, %v6143_v17 }
 0xe34   :  { %v3253_v53 = vpop.xlane.xlu1 %3252  ;;  %v3281_v5 = vsel %vm206_vm1, %v3269_v13, 0.0  ;;  %v3268_v22 = vmul.f32 %v6146_v24, %v6146_v24 }
 0xe35   :  { %v3259_v29 = vmul.f32 0.03125, %v3253_v53  ;;  %3282 = vadd.xlane.f32.xlu1 %v3281_v5 }
 0xe36   :  { %v3250_v26 = vpop.xlane.xlu0 %3249  ;;  %v3278_v40 = vsel %vm206_vm1, %v3268_v22, 0.0 }
 0xe37   :  { %v6155_v43 = vsub.f32 %v6121_v55, %v3259_v29  ;;  %v3258_v31 = vmul.f32 0.03125, %v3250_v26  ;;  %3279 = vadd.xlane.f32.xlu0 %v3278_v40  ;;  %v3958_v40 = vld [vmem:[%s6293_s9 + $0xf0] sm:$0xff] }
 0xe39   :  { %v6158_v48 = vsub.f32 %v6124_v54, %v3258_v31  ;;  %v3271_v8 = vmul.f32 %v6155_v43, %v6155_v43  ;;  %v3956_v31 = vld [vmem:[%s6293_s9 + $0xe0] sm:$0xff] }
 0xe3b   :  { %v3287_v57 = vsel %vm206_vm1, %v3271_v8, 0.0  ;;  %v3270_v52 = vmul.f32 %v6158_v48, %v6158_v48  ;;  %v3954_v8 = vld [vmem:[%s6293_s9 + $0xd0] sm:$0xff] }
 0xe3c   :  { %3288 = vadd.xlane.f32.xlu1 %v3287_v57  ;;  %v3953_v57 = vld [vmem:[%s6293_s9 + $0xc8] sm:$0xff] }
 0xe3d   :  { %v3284_v60 = vsel %vm206_vm1, %v3270_v52, 0.0  ;;  %v3952_v52 = vld [vmem:[%s6293_s9 + $0xc0] sm:$0xff] }
 0xe3e   :  { %3285 = vadd.xlane.f32.xlu0 %v3284_v60  ;;  %v3951_v60 = vld [vmem:[%s6293_s9 + $0xb8] sm:$0xff] }
 0xeb6   :  { %v3277_v42 = vpop.xlane.xlu1 %3276 }
 0xeb7   :  { %v3291_v36 = vmul.f32 0.03125, %v3277_v42  ;;  %v3946_v42 = vld [vmem:[%s6293_s9 + $0x90] sm:$0xff] }
 0xeb8   :  { %v3274_v15 = vpop.xlane.xlu0 %3273 }
 0xeb9   :  { %v3297_v6 = vadd.f32 1e-06, %v3291_v36  ;;  %v3290_v51 = vmul.f32 0.03125, %v3274_v15  ;;  %v3945_v36 = vld [vmem:[%s6293_s9 + $0x88] sm:$0xff]  ;;  %v3944_v15 = vld [vmem:[%s6293_s9 + $0x80] sm:$0xff] }
 0xebb   :  { %4857 = vrsqrt.f32 %v3297_v6  ;;  %v3296_v62 = vadd.f32 1e-06, %v3290_v51  ;;  %v3937_v6 = vld [vmem:[%s6292_s8 + $0x1] ss:$0 sm:$0xff] }
 0xebd   :  { %4859 = vrsqrt.f32 %v3296_v62 }
 0xebe   :  { %v3283_v25 = vpop.xlane.xlu1 %3282 }
 0xebf   :  { %v3293_v41 = vmul.f32 0.03125, %v3283_v25 }
 0xec0   :  { %v3280_v50 = vpop.xlane.xlu0 %3279 }
 0xec1   :  { %v3299_v20 = vadd.f32 1e-06, %v3293_v41  ;;  %v3292_v18 = vmul.f32 0.03125, %v3280_v50 }
 0xec3   :  { %4861 = vrsqrt.f32 %v3299_v20  ;;  %v3298_v49 = vadd.f32 1e-06, %v3292_v18 }
 0xec5   :  { %4863 = vrsqrt.f32 %v3298_v49  ;;  %v3289_v38 = vpop.xlane.xlu1 %3288 }
 0xec6   :  { %v3295_v21 = vmul.f32 0.03125, %v3289_v38 }
 0xec7   :  { %v3286_v19 = vpop.xlane.xlu0 %3285 }
 0xec8   :  { %v4858_v37 = vpop.eup %4857  ;;  %v3301_v2 = vadd.f32 1e-06, %v3295_v21  ;;  %v3294_v59 = vmul.f32 0.03125, %v3286_v19 }
 0xec9   :  { %v3309_v32 = vmul.f32 %v4858_v37, %v6131_v4 }
 0xeca   :  { %v4860_v39 = vpop.eup %4859  ;;  %4865 = vrsqrt.f32 %v3301_v2  ;;  %v3300_v3 = vadd.f32 1e-06, %v3294_v59 }
 0xecb   :  { %v3308_v27 = vmul.f32 %v4860_v39, %v6134_v33  ;;  %v3319_v30 = vmul.f32 %v3317_v12, %v3309_v32 }
 0xecc   :  { %4867 = vrsqrt.f32 %v3300_v3 }
 0xecd   :  { %v3318_v58 = vmul.f32 %v3317_v12, %v3308_v27  ;;  %v3329_v9 = vadd.f32 %v3327_v11, %v3319_v30 }
 0xecf   :  { %v3328_v16 = vadd.f32 %v3327_v11, %v3318_v58 }
 0xed0   :  { %v4862_v35 = vpop.eup %4861 }
 0xed1   :  { %4660 = vmatprep.mubr.msk.f32.mxu1 %vm206_vm1, %v3328_v16  ;;  %v3311_v23 = vmul.f32 %v4862_v35, %v6143_v17 }
 0xed2   :  { %v4864_v61 = vpop.eup %4863  ;;  %4661 = vmatmul.mubr.msk.f32.vlgmr.msra.gmra.mxu1 %vm206_vm1, %v3329_v9 }
 0xed3   :  { %v3310_v4 = vmul.f32 %v4864_v61, %v6146_v24  ;;  %v3321_v7 = vmul.f32 %v3317_v12, %v3311_v23  ;;  %v3959_v24 = vld [vmem:[%s6293_s9 + $0xf8] sm:$0xff] }
 0xed4   :  { %4669 = vmatprep.subr.mxu0 %v3959_v24 }
 0xed5   :  { %v3320_v33 = vmul.f32 %v3317_v12, %v3310_v4  ;;  %v3331_v53 = vadd.f32 %v3327_v11, %v3321_v7  ;;  %4670 = vmatpush3.msra.mxu0 %v3959_v24 }
 0xed6   :  { %4671 = vmatprep.subr.mxu0 %v3958_v40 }
 0xed7   :  { %v4866_v10 = vpop.eup %4865  ;;  %v3330_v13 = vadd.f32 %v3327_v11, %v3320_v33  ;;  %4672 = vmatpush3.msra.mxu0 %v3958_v40 }
 0xed8   :  { %v3313_v28 = vmul.f32 %v4866_v10, %v6155_v43  ;;  %v3957_v43 = vld [vmem:[%s6293_s9 + $0xe8] sm:$0xff] }
 0xed9   :  { %v4868_v46 = vpop.eup %4867  ;;  %4663 = vmatprep.mubr.msk.f32.mxu1 %vm206_vm1, %v3330_v13  ;;  %4673 = vmatprep.subr.mxu0 %v3957_v43 }
 0xeda   :  { %4664 = vmatmul.mubr.msk.f32.gmra.mxu1 %vm206_vm1, %v3331_v53  ;;  %v3312_v5 = vmul.f32 %v4868_v46, %v6158_v48  ;;  %v3323_v17 = vmul.f32 %v3317_v12, %v3313_v28  ;;  %4674 = vmatpush3.msra.mxu0 %v3957_v43  ;;  %v3955_v48 = vld [vmem:[%s6293_s9 + $0xd8] sm:$0xff] }
 0xedb   :  { %4675 = vmatprep.subr.mxu0 %v3956_v31 }
 0xedc   :  { %v3322_v22 = vmul.f32 %v3317_v12, %v3312_v5  ;;  %v3333_v26 = vadd.f32 %v3327_v11, %v3323_v17  ;;  %4676 = vmatpush3.msra.mxu0 %v3956_v31 }
 0xedd   :  { %4677 = vmatprep.subr.mxu0 %v3955_v48 }
 0xede   :  { %v3332_v29 = vadd.f32 %v3327_v11, %v3322_v22  ;;  %4678 = vmatpush3.msra.mxu0 %v3955_v48 }
 0xedf   :  { %4679 = vmatprep.subr.mxu0 %v3954_v8 }
 0xee0   :  { %4666 = vmatprep.mubr.msk.f32.mxu1 %vm206_vm1, %v3332_v29  ;;  %4680 = vmatpush3.msra.mxu0 %v3954_v8 }
 0xee1   :  { %4667 = vmatmul.mubr.msk.f32.gmra.mxu1 %vm206_vm1, %v3333_v26  ;;  %4681 = vmatprep.subr.mxu0 %v3953_v57 }
 0xee2   :  { %4682 = vmatpush3.msra.mxu0 %v3953_v57 }
 0xee3   :  { %4683 = vmatprep.subr.mxu0 %v3952_v52 }
 0xee4   :  { %4684 = vmatpush3.msra.mxu0 %v3952_v52 }
 0xee5   :  { %4685 = vmatprep.subr.mxu0 %v3951_v60 }
 0xee6   :  { %4686 = vmatpush3.msra.mxu0 %v3951_v60 }
 0xee7   :  { %4687 = vmatprep.subr.mxu0 %v3950_v56 }
 0xee8   :  { %4688 = vmatpush3.msra.mxu0 %v3950_v56 }
 0xee9   :  { %4689 = vmatprep.subr.mxu0 %v3949_v63 }
 0xeea   :  { %4690 = vmatpush3.msra.mxu0 %v3949_v63 }
 0xeeb   :  { %4691 = vmatprep.subr.mxu0 %v3948_v44 }
 0xeec   :  { %4692 = vmatpush3.msra.mxu0 %v3948_v44 }
 0xeed   :  { %4693 = vmatprep.subr.mxu0 %v3947_v34 }
 0xeee   :  { %4694 = vmatpush3.msra.mxu0 %v3947_v34 }
 0xeef   :  { %4695 = vmatprep.subr.mxu0 %v3946_v42 }
 0xef0   :  { %4696 = vmatpush3.msra.mxu0 %v3946_v42 }
 0xef1   :  { %4697 = vmatprep.subr.mxu0 %v3945_v36 }
 0xef2   :  { %4698 = vmatpush3.msra.mxu0 %v3945_v36 }
 0xef3   :  { %4699 = vmatprep.subr.mxu0 %v3944_v15 }
 0xef4   :  { %4700 = vmatpush3.msra.mxu0 %v3944_v15 }
 0xf92   :  { %v4662_v51 = vpop.f32.mrf.mxu1 }
 0xf93   :  { %v3437_v62 = vadd.f32 %v4662_v51, %v3937_v6 }
 0xf94   :  { %v3431_v25 = vpop.f32.mrf.mxu1 }
 0xf95   :  { %v3461_v41 = vmul.f32 %v3437_v62, %v3437_v62  ;;  %v3432_v50 = vadd.f32 %v3937_v6, %v3431_v25 }
 0xf97   :  { %v3467_v20 = vmul.f32 %v3461_v41, %v3437_v62  ;;  %v3460_v18 = vmul.f32 %v3432_v50, %v3432_v50 }
 0xf99   :  { %v3473_v49 = vmul.f32 0.044715, %v3467_v20  ;;  %v3466_v38 = vmul.f32 %v3460_v18, %v3432_v50 }
 0xf9a   :  { %v4665_v21 = vpop.f32.mrf.mxu1 }
 0xf9b   :  { %v3479_v19 = vadd.f32 %v3473_v49, %v3437_v62  ;;  %v3472_v37 = vmul.f32 0.044715, %v3466_v38  ;;  %v3447_v1 = vadd.f32 %v4665_v21, %v3937_v6 }
 0xf9c   :  { %v3441_v12 = vpop.f32.mrf.mxu1 }
 0xf9d   :  { %v3485_v2 = vmul.f32 0.7978846, %v3479_v19  ;;  %v3478_v59 = vadd.f32 %v3472_v37, %v3432_v50  ;;  %v3463_v32 = vmul.f32 %v3447_v1, %v3447_v1  ;;  %v3442_v39 = vadd.f32 %v3937_v6, %v3441_v12 }
 0xf9f   :  { %4869 = vtanh.f32 %v3485_v2  ;;  %v3484_v3 = vmul.f32 0.7978846, %v3478_v59  ;;  %v3469_v27 = vmul.f32 %v3463_v32, %v3447_v1  ;;  %v3462_v30 = vmul.f32 %v3442_v39, %v3442_v39 }
 0xfa1   :  { %4871 = vtanh.f32 %v3484_v3  ;;  %v3475_v11 = vmul.f32 0.044715, %v3469_v27  ;;  %v3468_v58 = vmul.f32 %v3462_v30, %v3442_v39  ;;  %v4668_v16 = vpop.f32.mrf.mxu1 }
 0xfa2   :  { %v3457_v35 = vadd.f32 %v4668_v16, %v3937_v6 }
 0xfa3   :  { %v3481_v9 = vadd.f32 %v3475_v11, %v3447_v1  ;;  %v3474_v23 = vmul.f32 0.044715, %v3468_v58  ;;  %v3451_v61 = vpop.f32.mrf.mxu1 }
 0xfa4   :  { %v3465_v4 = vmul.f32 %v3457_v35, %v3457_v35  ;;  %v3452_v7 = vadd.f32 %v3937_v6, %v3451_v61 }
 0xfa5   :  { %v3487_v33 = vmul.f32 0.7978846, %v3481_v9  ;;  %v3480_v10 = vadd.f32 %v3474_v23, %v3442_v39 }
 0xfa6   :  { %v3471_v13 = vmul.f32 %v3465_v4, %v3457_v35  ;;  %v3464_v53 = vmul.f32 %v3452_v7, %v3452_v7 }
 0xfa7   :  { %4873 = vtanh.f32 %v3487_v33  ;;  %v3486_v28 = vmul.f32 0.7978846, %v3480_v10 }
 0xfa8   :  { %v3477_v46 = vmul.f32 0.044715, %v3471_v13  ;;  %v3470_v5 = vmul.f32 %v3464_v53, %v3452_v7 }
 0xfa9   :  { %4875 = vtanh.f32 %v3486_v28 }
 0xfaa   :  { %v3483_v17 = vadd.f32 %v3477_v46, %v3457_v35  ;;  %v3476_v22 = vmul.f32 0.044715, %v3470_v5 }
 0xfac   :  { %v4870_v29 = vpop.eup %4869  ;;  %v3489_v26 = vmul.f32 0.7978846, %v3483_v17  ;;  %v3482_v24 = vadd.f32 %v3476_v22, %v3452_v7 }
 0xfad   :  { %v3497_v40 = vadd.f32 1.0, %v4870_v29 }
 0xfae   :  { %v4872_v43 = vpop.eup %4871  ;;  %4877 = vtanh.f32 %v3489_v26  ;;  %v3488_v31 = vmul.f32 0.7978846, %v3482_v24 }
 0xfaf   :  { %v3496_v48 = vadd.f32 1.0, %v4872_v43  ;;  %v3503_v8 = vmul.f32 0.5, %v3497_v40 }
 0xfb0   :  { %4879 = vtanh.f32 %v3488_v31 }
 0xfb1   :  { %v3502_v57 = vmul.f32 0.5, %v3496_v48  ;;  %v3509_v56 = vmul.f32 %v3503_v8, %v3437_v62  ;;  %v3960_v62 = vld [vmem:[%s6288_s4 + $0x18] ss:$0 sm:$0xff] }
 0xfb3   :  { %v3508_v52 = vmul.f32 %v3502_v57, %v3432_v50 }
 0xfb4   :  { %v4874_v60 = vpop.eup %4873 }
 0xfb5   :  { %4701 = vmatprep.mubr.f32.mxu0 %v3508_v52  ;;  %v3499_v63 = vadd.f32 1.0, %v4874_v60 }
 0xfb6   :  { %v4876_v44 = vpop.eup %4875  ;;  %4702 = vmatmul.mubr.f32.vlgmr.msra.gmra.mxu0 %v3509_v56 }
 0xfb7   :  { %v3498_v34 = vadd.f32 1.0, %v4876_v44  ;;  %v3505_v42 = vmul.f32 0.5, %v3499_v63 }
 0xfb9   :  { %v3504_v36 = vmul.f32 0.5, %v3498_v34  ;;  %v3511_v51 = vmul.f32 %v3505_v42, %v3447_v1 }
 0xfbb   :  { %v4878_v15 = vpop.eup %4877  ;;  %v3510_v6 = vmul.f32 %v3504_v36, %v3442_v39 }
 0xfbc   :  { %v3501_v25 = vadd.f32 1.0, %v4878_v15 }
 0xfbd   :  { %v4880_v41 = vpop.eup %4879  ;;  %4704 = vmatprep.mubr.f32.mxu0 %v3510_v6 }
 0xfbe   :  { %4705 = vmatmul.mubr.f32.gmra.mxu0 %v3511_v51  ;;  %v3500_v20 = vadd.f32 1.0, %v4880_v41  ;;  %v3507_v18 = vmul.f32 0.5, %v3501_v25 }
 0xfc0   :  { %v3506_v49 = vmul.f32 0.5, %v3500_v20  ;;  %v3513_v38 = vmul.f32 %v3507_v18, %v3457_v35 }
 0xfc2   :  { %v3512_v50 = vmul.f32 %v3506_v49, %v3452_v7 }
 0xfc4   :  { %4707 = vmatprep.mubr.f32.mxu0 %v3512_v50 }
 0xfc5   :  { %4708 = vmatmul.mubr.f32.gmra.mxu0 %v3513_v38 }
0x1076   :  { %v4703_v21 = vpop.f32.mrf.mxu0 }
0x1077   :  { %v3607_v19 = vadd.f32 %v4703_v21, %v3960_v62 }
0x1078   :  { %v3601_v37 = vpop.f32.mrf.mxu0 }
0x1079   :  { %v3602_v12 = vadd.f32 %v3960_v62, %v3601_v37  ;;  %v3631_v1 = vadd.f32 %v3607_v19, %v6101_v45 }
0x107b   :  { %v3641_v2 = vsel %vm206_vm1, %v3631_v1, 0.0  ;;  %v3630_v59 = vadd.f32 %v3602_v12, %v6104_v0 }
0x107c   :  { %3642 = vadd.xlane.f32.xlu1 %v3641_v2 }
0x107d   :  { %v3638_v32 = vsel %vm206_vm1, %v3630_v59, 0.0 }
0x107e   :  { %3639 = vadd.xlane.f32.xlu0 %v3638_v32  ;;  %v4706_v39 = vpop.f32.mrf.mxu0 }
0x107f   :  { %v3617_v3 = vadd.f32 %v4706_v39, %v3960_v62 }
0x1080   :  { %v3611_v27 = vpop.f32.mrf.mxu0 }
0x1081   :  { %v3633_v30 = vadd.f32 %v3617_v3, %v6111_v14  ;;  %v3612_v11 = vadd.f32 %v3960_v62, %v3611_v27 }
0x1083   :  { %v3632_v58 = vadd.f32 %v3612_v11, %v6114_v47  ;;  %v3647_v16 = vsel %vm206_vm1, %v3633_v30, 0.0 }
0x1084   :  { %3648 = vadd.xlane.f32.xlu1 %v3647_v16 }
0x1085   :  { %v4709_v45 = vpop.f32.mrf.mxu0  ;;  %v3644_v35 = vsel %vm206_vm1, %v3632_v58, 0.0 }
0x1086   :  { %v3627_v9 = vadd.f32 %v4709_v45, %v3960_v62  ;;  %3645 = vadd.xlane.f32.xlu0 %v3644_v35 }
0x1087   :  { %v3621_v0 = vpop.f32.mrf.mxu0 }
0x1088   :  { %v3635_v23 = vadd.f32 %v3627_v9, %v6121_v55  ;;  %v3622_v61 = vadd.f32 %v3960_v62, %v3621_v0 }
0x108a   :  { %v3634_v4 = vadd.f32 %v3622_v61, %v6124_v54  ;;  %v3653_v7 = vsel %vm206_vm1, %v3635_v23, 0.0 }
0x108b   :  { %3654 = vadd.xlane.f32.xlu1 %v3653_v7 }
0x108c   :  { %v3650_v14 = vsel %vm206_vm1, %v3634_v4, 0.0 }
0x108d   :  { %3651 = vadd.xlane.f32.xlu0 %v3650_v14 }
0x1105   :  { %v3643_v47 = vpop.xlane.xlu1 %3642 }
0x1106   :  { %v3657_v33 = vmul.f32 0.03125, %v3643_v47 }
0x1107   :  { %v3640_v10 = vpop.xlane.xlu0 %3639 }
0x1108   :  { %v3663_v13 = vsub.f32 %v3631_v1, %v3657_v33  ;;  %v3656_v53 = vmul.f32 0.03125, %v3640_v10 }
0x110a   :  { %v3662_v28 = vsub.f32 %v3630_v59, %v3656_v53  ;;  %v3669_v46 = vmul.f32 %v3663_v13, %v3663_v13  ;;  %v3961_v59 = vld [vmem:[%s6294_s10] ss:$0 sm:$0xff]  ;;  %s4923_s10 = smov [#allocation2]  }
0x110c   :  { %v3677_v5 = vsel %vm206_vm1, %v3669_v46, 0.0  ;;  %v3668_v17 = vmul.f32 %v3662_v28, %v3662_v28 }
0x110d   :  { %v3649_v55 = vpop.xlane.xlu1 %3648  ;;  %3678 = vadd.xlane.f32.xlu1 %v3677_v5 }
0x110e   :  { %v3659_v22 = vmul.f32 0.03125, %v3649_v55  ;;  %v3674_v54 = vsel %vm206_vm1, %v3668_v17, 0.0 }
0x110f   :  { %3675 = vadd.xlane.f32.xlu0 %v3674_v54  ;;  %v3646_v29 = vpop.xlane.xlu0 %3645 }
0x1110   :  { %v3665_v26 = vsub.f32 %v3633_v30, %v3659_v22  ;;  %v3658_v24 = vmul.f32 0.03125, %v3646_v29  ;;  %v3962_v30 = vld [vmem:[%s6295_s11] ss:$0 sm:$0xff]  ;;  %s3757_s11 = sshll.u32 %s4923_s10, 4  ;;  %s3758_s11 = int_to_ptr.vmem [resolvable:$true] %s3757_s11 }
0x1111   :  { %s4901_s24 = scalar_lea.vmem %s3758_s11, 768  ;;  %p4906_p1 = scmp.lt.s32.totalorder %s3758_s11, %s3758_s11 }
0x1112   :  { %v3664_v40 = vsub.f32 %v3632_v58, %v3658_v24  ;;  %v3671_v43 = vmul.f32 %v3665_v26, %v3665_v26  ;;  %p4902_p0 = scmp.ne.s32.totalorder %s3758_s11, %s4901_s24  ;;  %p4907_p2 = scmp.lt.s32.totalorder %s4901_s24, %s4901_s24 }
0x1114   :  { %v3655_v31 = vpop.xlane.xlu1 %3654  ;;  %v3683_v48 = vsel %vm206_vm1, %v3671_v43, 0.0  ;;  %v3670_v8 = vmul.f32 %v3664_v40, %v3664_v40  ;;  %p4908_p3 = por %p4907_p2, %p4906_p1 }
0x1115   :  { %v3661_v57 = vmul.f32 0.03125, %v3655_v31  ;;  %3684 = vadd.xlane.f32.xlu1 %v3683_v48 }
0x1116   :  { %v3652_v52 = vpop.xlane.xlu0 %3651  ;;  %v3680_v60 = vsel %vm206_vm1, %v3670_v8, 0.0  ;;  %p4909_p4 = pnand %p4908_p3, %p4902_p0 }
0x1117   :  { %v3667_v56 = vsub.f32 %v3635_v23, %v3661_v57  ;;  %v3660_v63 = vmul.f32 0.03125, %v3652_v52  ;;  %3681 = vadd.xlane.f32.xlu0 %v3680_v60 }
0x1119   :  { %v3666_v44 = vsub.f32 %v3634_v4, %v3660_v63  ;;  %v3673_v34 = vmul.f32 %v3667_v56, %v3667_v56 }
0x111b   :  { %v3689_v42 = vsel %vm206_vm1, %v3673_v34, 0.0  ;;  %v3672_v36 = vmul.f32 %v3666_v44, %v3666_v44 }
0x111c   :  { %3690 = vadd.xlane.f32.xlu1 %v3689_v42 }
0x111d   :  { %v3686_v15 = vsel %vm206_vm1, %v3672_v36, 0.0 }
0x111e   :  { %3687 = vadd.xlane.f32.xlu0 %v3686_v15 }
0x1196   :  { %v3679_v6 = vpop.xlane.xlu1 %3678 }
0x1197   :  { %v3693_v51 = vmul.f32 0.03125, %v3679_v6 }
0x1198   :  { %v3676_v25 = vpop.xlane.xlu0 %3675 }
0x1199   :  { %v3699_v41 = vadd.f32 1e-06, %v3693_v51  ;;  %v3692_v20 = vmul.f32 0.03125, %v3676_v25 }
0x119b   :  { %4881 = vrsqrt.f32 %v3699_v41  ;;  %v3698_v18 = vadd.f32 1e-06, %v3692_v20 }
0x119d   :  { %4883 = vrsqrt.f32 %v3698_v18 }
0x119e   :  { %v3685_v49 = vpop.xlane.xlu1 %3684 }
0x119f   :  { %v3695_v50 = vmul.f32 0.03125, %v3685_v49 }
0x11a0   :  { %v3682_v38 = vpop.xlane.xlu0 %3681 }
0x11a1   :  { %v3701_v62 = vadd.f32 1e-06, %v3695_v50  ;;  %v3694_v21 = vmul.f32 0.03125, %v3682_v38 }
0x11a3   :  { %4885 = vrsqrt.f32 %v3701_v62  ;;  %v3700_v19 = vadd.f32 1e-06, %v3694_v21 }
0x11a5   :  { %4887 = vrsqrt.f32 %v3700_v19  ;;  %v3691_v37 = vpop.xlane.xlu1 %3690 }
0x11a6   :  { %v3697_v12 = vmul.f32 0.03125, %v3691_v37 }
0x11a7   :  { %v3688_v1 = vpop.xlane.xlu0 %3687 }
0x11a8   :  { %v4882_v2 = vpop.eup %4881  ;;  %v3703_v32 = vadd.f32 1e-06, %v3697_v12  ;;  %v3696_v39 = vmul.f32 0.03125, %v3688_v1 }
0x11a9   :  { %v3711_v3 = vmul.f32 %v4882_v2, %v3663_v13 }
0x11aa   :  { %v4884_v27 = vpop.eup %4883  ;;  %4889 = vrsqrt.f32 %v3703_v32  ;;  %v3702_v11 = vadd.f32 1e-06, %v3696_v39 }
0x11ab   :  { %v3723_v58 = vmul.f32 %v3961_v59, %v3711_v3  ;;  %v3710_v16 = vmul.f32 %v4884_v27, %v3662_v28 }
0x11ac   :  { %4891 = vrsqrt.f32 %v3702_v11 }
0x11ad   :  { %v3735_v45 = vadd.f32 %v3962_v30, %v3723_v58  ;;  %v3722_v35 = vmul.f32 %v3961_v59, %v3710_v16 }
0x11af   :  { %v3741_v9 = vsel %vm206_vm1, %v3735_v45, 0.0  ;;  %v3734_v0 = vadd.f32 %v3962_v30, %v3722_v35 }
0x11b0   :  { %v4886_v23 = vpop.eup %4885  ;;  %3747 = vst [vmem:[#allocation2 + $0x8] sm:$0xff] %v3741_v9 }
0x11b1   :  { %v3740_v61 = vsel %vm206_vm1, %v3734_v0, 0.0  ;;  %v3713_v4 = vmul.f32 %v4886_v23, %v3665_v26 }
0x11b2   :  { %v4888_v7 = vpop.eup %4887  ;;  %3746 = vst [vmem:[#allocation2] sm:$0xff] %v3740_v61 }
0x11b3   :  { %v3725_v14 = vmul.f32 %v3961_v59, %v3713_v4  ;;  %v3712_v47 = vmul.f32 %v4888_v7, %v3664_v40 }
0x11b5   :  { %v3737_v33 = vadd.f32 %v3962_v30, %v3725_v14  ;;  %v3724_v10 = vmul.f32 %v3961_v59, %v3712_v47 }
0x11b7   :  { %v4890_v13 = vpop.eup %4889  ;;  %v3743_v53 = vsel %vm206_vm1, %v3737_v33, 0.0  ;;  %v3736_v28 = vadd.f32 %v3962_v30, %v3724_v10 }
0x11b8   :  { %3749 = vst [vmem:[#allocation2 + $0x18] sm:$0xff] %v3743_v53  ;;  %v3715_v46 = vmul.f32 %v4890_v13, %v3667_v56 }
0x11b9   :  { %v4892_v5 = vpop.eup %4891  ;;  %v3742_v17 = vsel %vm206_vm1, %v3736_v28, 0.0 }
0x11ba   :  { %3748 = vst [vmem:[#allocation2 + $0x10] sm:$0xff] %v3742_v17  ;;  %v3727_v55 = vmul.f32 %v3961_v59, %v3715_v46  ;;  %v3714_v22 = vmul.f32 %v4892_v5, %v3666_v44 }
0x11bc   :  { %v3739_v54 = vadd.f32 %v3962_v30, %v3727_v55  ;;  %v3726_v29 = vmul.f32 %v3961_v59, %v3714_v22 }
0x11be   :  { %v3745_v26 = vsel %vm206_vm1, %v3739_v54, 0.0  ;;  %v3738_v24 = vadd.f32 %v3962_v30, %v3726_v29 }
0x11bf   :  { %3751 = vst [vmem:[#allocation2 + $0x28] sm:$0xff] %v3745_v26 }
0x11c0   :  { %v3744_v40 = vsel %vm206_vm1, %v3738_v24, 0.0 }
0x11c1   :  { %3750 = vst [vmem:[#allocation2 + $0x20] sm:$0xff] %v3744_v40 }
0x11c2   :  { %4912 = shalt.err (!%p4909_p4)
}
0x11c3   :  { %s4924_s25 = smov 128   ;;  %s4925_s26 = smov 8  }
0x11c4   :  { %3763 = dma.vmem_to_hbm [thread:$0]  %s3758_s11, 768, %s6296_s12, [#allocation3], %s4924_s25, %s4924_s25, %s4925_s26  }
0x11c5   :  { %4921 = dma.done.wait [#allocation3], 768  }
0x11c6   :  { %4922 = vsyncadd [#allocation3], 4294966528 }
0x11c7   :  { %3767 = vsyncpa [#allocation3], 1 }

</bundles_post_ra>
